<compile_context>
chip_gen: v6e
topology: v6e:2x2x1
jax: 0.10.0
libtpu: 0.0.40
codegen_flags: <defaults>
</compile_context>

<pallas_src>
import functools

import jax
import jax.numpy as jnp
from jax.experimental import pallas as pl
from jax.experimental.pallas import tpu as pltpu


def _round_up(n, m):
    return ((n + m - 1) // m) * m


# ---------------------------------------------------------------------------
# Kernels
# ---------------------------------------------------------------------------
def fused_kernel(x_ref, y_ref,
                 w1_ref, b1_ref, w2_ref, b2_ref, w3_ref, b3_ref,
                 w4y_ref, w4f_ref, b4_ref, w5_ref, b5_ref, w6_ref, b6_ref,
                 o_ref, *, tp, k1):
    t = pl.program_id(1)

    def dense_relu_bf16(h, w_ref, b_ref):
        acc = jnp.dot(h, w_ref[...], preferred_element_type=jnp.float32) + b_ref[...]
        return jnp.maximum(acc, 0.0).astype(jnp.bfloat16)    # ReLU on f32 accumulator

    # --- net3DV_1: per-neighbor MLP gost -> 64 -> 64 -> 256 -----------------------
    x = x_ref[0]                                              # (TP*K1, C0) bf16
    h = dense_relu_bf16(x, w1_ref, b1_ref)                    # (TP*K1, 64)
    h = dense_relu_bf16(h, w2_ref, b2_ref)                    # (TP*K1, 64)
    h = dense_relu_bf16(h, w3_ref, b3_ref)                    # (TP*K1, 256) bf16 pre-max
    # MaxPool2d((1, K1)) == max over the K1 neighbor axis (bf16 reduce: half the traffic).
    f1 = jnp.max(h.reshape(tp, k1, -1), axis=1)               # (TP, 256) bf16

    # --- net3DV_3 first layer; cat((yt, feat), 1) replaced by split weights -------
    # K=3 contraction as 3 VPU broadcast FMAs (frees one MXU pass per grid step).
    yf = y_ref[0].astype(jnp.float32)                         # (TP, 3)
    w4y = w4y_ref[...].astype(jnp.float32)                    # (3, 256)
    gy = (yf[:, 0:1] * w4y[0:1, :]
          + yf[:, 1:2] * w4y[1:2, :]
          + yf[:, 2:3] * w4y[2:3, :])                         # (TP, 256) f32
    g = gy + jnp.dot(f1, w4f_ref[...], preferred_element_type=jnp.float32) + b4_ref[...]
    g = jnp.maximum(g, 0.0).astype(jnp.bfloat16)              # (TP, 256)
    g = dense_relu_bf16(g, w5_ref, b5_ref)                    # (TP, 512)
    g = jnp.dot(g, w6_ref[...], preferred_element_type=jnp.float32) + b6_ref[...]
    g = jnp.maximum(g, 0.0)                                   # (TP, 1024) f32

    # --- MaxPool2d((K2, 1)) == running max over the point axis --------------------
    # Padded rows duplicate the last real point (edge padding), so no mask is needed.
    tile_max = jnp.max(g, axis=0, keepdims=True)              # (1, 1024)

    @pl.when(t == 0)
    def _():
        o_ref[0] = tile_max                                   # store directly, no zero-init

    @pl.when(t > 0)
    def _():
        o_ref[0] = jnp.maximum(o_ref[0], tile_max)


def head_kernel(g_ref, wf1_ref, bf1_ref, wf2_ref, bf2_ref, o_ref):
    # netR_FC run once on the pooled (B, 1024) matrix (M = B instead of M = 1 per step).
    g = g_ref[...].astype(jnp.bfloat16)
    h = jnp.maximum(
        jnp.dot(g, wf1_ref[...], preferred_element_type=jnp.float32) + bf1_ref[...], 0.0)
    o_ref[...] = (jnp.dot(h.astype(jnp.bfloat16), wf2_ref[...],
                          preferred_element_type=jnp.float32) + bf2_ref[...])


# ---------------------------------------------------------------------------
# pallas_call wrappers
# ---------------------------------------------------------------------------
def fused_call(x, yp, p, *, k1, tp, nt):
    B, _, c0 = x.shape
    full = lambda a: pl.BlockSpec(a.shape, lambda b, t: (0,) * a.ndim)
    kernel = functools.partial(fused_kernel, tp=tp, k1=k1)
    return pl.pallas_call(
        kernel,
        out_shape=jax.ShapeDtypeStruct((B, 1, 1024), jnp.float32),
        grid=(B, nt),
        in_specs=[
            pl.BlockSpec((1, tp * k1, c0), lambda b, t: (b, t, 0)),
            pl.BlockSpec((1, tp, 3), lambda b, t: (b, t, 0)),
            full(p["w1"]), full(p["b1"]),
            full(p["w2"]), full(p["b2"]),
            full(p["w3"]), full(p["b3"]),
            full(p["w4y"]), full(p["w4f"]), full(p["b4"]),
            full(p["w5"]), full(p["b5"]),
            full(p["w6"]), full(p["b6"]),
        ],
        out_specs=pl.BlockSpec((1, 1, 1024), lambda b, t: (b, 0, 0)),
        compiler_params=pltpu.CompilerParams(
            dimension_semantics=("parallel", "arbitrary"),
            vmem_limit_bytes=40 << 20),
    )(x, yp, p["w1"], p["b1"], p["w2"], p["b2"], p["w3"], p["b3"],
      p["w4y"], p["w4f"], p["b4"], p["w5"], p["b5"], p["w6"], p["b6"])


def head_call(pooled, p):
    B = pooled.shape[0]
    full = lambda a: pl.BlockSpec(a.shape, lambda i: (0,) * a.ndim)
    return pl.pallas_call(
        head_kernel,
        out_shape=jax.ShapeDtypeStruct((B, 512), jnp.float32),
        grid=(1,),
        in_specs=[full(pooled), full(p["wf1"]), full(p["bf1"]),
                  full(p["wf2"]), full(p["bf2"])],
        out_specs=pl.BlockSpec((B, 512), lambda i: (0, 0)),
        compiler_params=pltpu.CompilerParams(
            dimension_semantics=("arbitrary",),
            vmem_limit_bytes=24 << 20),
    )(pooled, p["wf1"], p["bf1"], p["wf2"], p["bf2"])


# ---------------------------------------------------------------------------
# Forward (glue in plain JAX, hot path in Pallas)
# ---------------------------------------------------------------------------
def _choose_tile(n, k1, max_tp=None):
    """Point tile TP (multiple of 8) and tile count nt; bounds TP*K1 <= 8192 rows."""
    cap = 256 if max_tp is None else max_tp
    cap = min(cap, 8192 // max(k1, 1))
    cap = max(8, (cap // 8) * 8)
    nt = -(-n // cap)
    tp = _round_up(-(-n // nt), 8)
    nt = -(-n // tp)
    return tp, nt


def pointnet_plus_forward(xt, yt, p, max_tp=None):
    """Default branch of PointNet_Plus.forward: returns x of shape (B, 512)."""
    B, C0, N, K1 = xt.shape
    tp, nt = _choose_tile(N, K1, max_tp)
    NP = nt * tp

    x = jnp.transpose(xt, (0, 2, 3, 1))                       # (B, N, K1, gost)
    yp = jnp.transpose(yt[..., 0], (0, 2, 1))                 # (B, N, 3)
    if NP != N:
        # Edge padding duplicates the last real point; duplicates never change a max,
        # so the kernel needs no padding mask at all.
        x = jnp.pad(x, ((0, 0), (0, NP - N), (0, 0), (0, 0)), mode="edge")
        yp = jnp.pad(yp, ((0, 0), (0, NP - N), (0, 0)), mode="edge")
    x = x.reshape(B, NP * K1, C0).astype(jnp.bfloat16)        # row-per-neighbor layout
    yp = yp.astype(jnp.bfloat16)

    pooled = fused_call(x, yp, p, k1=K1, tp=tp, nt=nt)        # (B, 1, 1024)
    return head_call(pooled.reshape(B, 1024), p)              # (B, 512)


# ---------------------------------------------------------------------------
# Deterministic parameter construction (eval-mode BN folded, bf16 weights)
# ---------------------------------------------------------------------------
def _conv_bn_folded(key, cin, cout, eps=1e-5):
    kw, kb, kg, kbt, km, kv = jax.random.split(key, 6)
    w = jax.random.normal(kw, (cin, cout), jnp.float32) / jnp.sqrt(cin)
    b = 0.1 * jax.random.normal(kb, (cout,), jnp.float32)
    gamma = 1.0 + 0.1 * jax.random.normal(kg, (cout,), jnp.float32)
    beta = 0.05 * jax.random.normal(kbt, (cout,), jnp.float32)
    mean = 0.1 * jax.random.normal(km, (cout,), jnp.float32)
    var = 0.5 + jax.random.uniform(kv, (cout,), jnp.float32)
    scale = gamma / jnp.sqrt(var + eps)
    w_f = (w * scale[None, :]).astype(jnp.bfloat16)
    b_f = ((b - mean) * scale + beta)[None, :].astype(jnp.float32)
    return w_f, b_f


def make_params(key, gost=4):
    ks = jax.random.split(key, 8)
    p = {}
    # net3DV_1: gost -> 64 -> 64 -> 256, each Conv2d(1x1)+BN+ReLU
    p["w1"], p["b1"] = _conv_bn_folded(ks[0], gost, 64)
    p["w2"], p["b2"] = _conv_bn_folded(ks[1], 64, 64)
    p["w3"], p["b3"] = _conv_bn_folded(ks[2], 64, 256)
    # net3DV_3: (3+256) -> 256 -> 512 -> 1024; first-layer weight split into y / feature parts
    w4, p["b4"] = _conv_bn_folded(ks[3], 3 + 256, 256)
    p["w4y"], p["w4f"] = w4[:3], w4[3:]
    p["w5"], p["b5"] = _conv_bn_folded(ks[4], 256, 512)
    p["w6"], p["b6"] = _conv_bn_folded(ks[5], 512, 1024)
    # netR_FC: Linear(1024,1024) + (folded eval-mode) BN1d + ReLU, Linear(1024,512)
    kw1, kb1 = jax.random.split(ks[6], 2)
    wf1 = jax.random.normal(kw1, (1024, 1024), jnp.float32) / jnp.sqrt(1024)
    bf1 = 0.1 * jax.random.normal(kb1, (1024,), jnp.float32)
    kf = jax.random.split(ks[6], 5)
    gamma = 1.0 + 0.1 * jax.random.normal(kf[1], (1024,), jnp.float32)
    beta = 0.05 * jax.random.normal(kf[2], (1024,), jnp.float32)
    mean = 0.1 * jax.random.normal(kf[3], (1024,), jnp.float32)
    var = 0.5 + jax.random.uniform(kf[4], (1024,), jnp.float32)
    scale = gamma / jnp.sqrt(var + 1e-5)
    p["wf1"] = (wf1 * scale[None, :]).astype(jnp.bfloat16)
    p["bf1"] = ((bf1 - mean) * scale + beta)[None, :].astype(jnp.float32)
    kw2, kb2 = jax.random.split(ks[7], 2)
    p["wf2"] = (jax.random.normal(kw2, (1024, 512), jnp.float32) / jnp.sqrt(1024)).astype(jnp.bfloat16)
    p["bf2"] = (0.1 * jax.random.normal(kb2, (512,), jnp.float32))[None, :].astype(jnp.float32)
    return p


# ---------------------------------------------------------------------------
# Pure-JAX reference of the same (default-branch) forward pass, same numerics
# (bf16 operands, f32 accumulation / ReLU); runs on the *unpadded* inputs.
# ---------------------------------------------------------------------------
def _ref_dense(h, w, b):
    return jnp.dot(h.astype(jnp.bfloat16), w, preferred_element_type=jnp.float32) + b


def reference_forward(xt, yt, p):
    relu = jax.nn.relu
    x = jnp.transpose(xt, (0, 2, 3, 1))                       # (B, N, K1, gost)
    h = relu(_ref_dense(x, p["w1"], p["b1"]))
    h = relu(_ref_dense(h, p["w2"], p["b2"]))
    h = relu(_ref_dense(h, p["w3"], p["b3"]))
    f1 = jnp.max(h, axis=2)                                   # (B, N, 256)
    yp = jnp.transpose(yt[..., 0], (0, 2, 1))                 # (B, N, 3)
    g = relu(jnp.dot(yp.astype(jnp.bfloat16), p["w4y"], preferred_element_type=jnp.float32)
             + jnp.dot(f1.astype(jnp.bfloat16), p["w4f"], preferred_element_type=jnp.float32)
             + p["b4"])
    g = relu(_ref_dense(g, p["w5"], p["b5"]))
    g = relu(_ref_dense(g, p["w6"], p["b6"]))
    pooled = jnp.max(g, axis=1)                               # (B, 1024)
    hh = relu(_ref_dense(pooled, p["wf1"], p["bf1"]))
    return _ref_dense(hh, p["wf2"], p["bf2"])                 # (B, 512)


# ---------------------------------------------------------------------------
if __name__ == "__main__":
    key = jax.random.PRNGKey(0)
    kx, ky, kp = jax.random.split(key, 3)

    # Test 1: small module-consistent shapes (knn_K = K1 = 16, N = K2 = 16).
    B, GOST, N, K1 = 2, 4, 16, 16
    xt = jax.random.normal(kx, (B, GOST, N, K1), jnp.float32)   # NCHW, like the torch module
    yt = jax.random.normal(ky, (B, 3, N, 1), jnp.float32)
    params = make_params(kp, gost=GOST)

    out = jax.block_until_ready(pointnet_plus_forward(xt, yt, params))
    ref = jax.block_until_ready(reference_forward(xt, yt, params))
    assert out.shape == (B, 512), out.shape
    err1 = float(jnp.max(jnp.abs(out - ref)))
    assert jnp.allclose(out, ref, rtol=1e-2, atol=1e-2), err1

    # Test 2: exercises the multi-tile running max and ragged-N edge padding
    # (N=20, TP forced to 8 -> 3 point tiles, 4 padded points).
    B2, N2, K12 = 1, 20, 8
    kx2, ky2 = jax.random.split(ky, 2)
    xt2 = jax.random.normal(kx2, (B2, GOST, N2, K12), jnp.float32)
    yt2 = jax.random.normal(ky2, (B2, 3, N2, 1), jnp.float32)
    out2 = jax.block_until_ready(pointnet_plus_forward(xt2, yt2, params, max_tp=8))
    ref2 = jax.block_until_ready(reference_forward(xt2, yt2, params))
    assert out2.shape == (B2, 512), out2.shape
    err2 = float(jnp.max(jnp.abs(out2 - ref2)))
    assert jnp.allclose(out2, ref2, rtol=1e-2, atol=1e-2), err2

    print("KERNEL_OK")
</pallas_src>

<mosaic_0001>
module attributes {stable_mosaic.version = 11 : i64} {
  func.func @fused_kernel(%arg0: i32, %arg1: i32, %arg2: memref<1x256x4xbf16, #tpu.memory_space<vmem>>, %arg3: memref<1x16x3xbf16, #tpu.memory_space<vmem>>, %arg4: memref<4x64xbf16, #tpu.memory_space<vmem>>, %arg5: memref<1x64xf32, #tpu.memory_space<vmem>>, %arg6: memref<64x64xbf16, #tpu.memory_space<vmem>>, %arg7: memref<1x64xf32, #tpu.memory_space<vmem>>, %arg8: memref<64x256xbf16, #tpu.memory_space<vmem>>, %arg9: memref<1x256xf32, #tpu.memory_space<vmem>>, %arg10: memref<3x256xbf16, #tpu.memory_space<vmem>>, %arg11: memref<256x256xbf16, #tpu.memory_space<vmem>>, %arg12: memref<1x256xf32, #tpu.memory_space<vmem>>, %arg13: memref<256x512xbf16, #tpu.memory_space<vmem>>, %arg14: memref<1x512xf32, #tpu.memory_space<vmem>>, %arg15: memref<512x1024xbf16, #tpu.memory_space<vmem>>, %arg16: memref<1x1024xf32, #tpu.memory_space<vmem>>, %arg17: memref<1x1x1024xf32, #tpu.memory_space<vmem>>) attributes {dimension_semantics = [#tpu.dimension_semantics<parallel>, #tpu.dimension_semantics<arbitrary>], iteration_bounds = array<i64: 2, 1>, scalar_prefetch = 0 : i64, scratch_operands = 0 : i64, tpu.core_type = #tpu.core_type<tc>, window_params = [{transform_indices = @transform_0, window_bounds = array<i64: 1, 256, 4>}, {transform_indices = @transform_1, window_bounds = array<i64: 1, 16, 3>}, {pipeline_mode = #tpu.pipeline_mode<synchronous>, transform_indices = @transform_2, window_bounds = array<i64: 4, 64>}, {pipeline_mode = #tpu.pipeline_mode<synchronous>, transform_indices = @transform_3, window_bounds = array<i64: 1, 64>}, {pipeline_mode = #tpu.pipeline_mode<synchronous>, transform_indices = @transform_4, window_bounds = array<i64: 64, 64>}, {pipeline_mode = #tpu.pipeline_mode<synchronous>, transform_indices = @transform_5, window_bounds = array<i64: 1, 64>}, {pipeline_mode = #tpu.pipeline_mode<synchronous>, transform_indices = @transform_6, window_bounds = array<i64: 64, 256>}, {pipeline_mode = #tpu.pipeline_mode<synchronous>, transform_indices = @transform_7, window_bounds = array<i64: 1, 256>}, {pipeline_mode = #tpu.pipeline_mode<synchronous>, transform_indices = @transform_8, window_bounds = array<i64: 3, 256>}, {pipeline_mode = #tpu.pipeline_mode<synchronous>, transform_indices = @transform_9, window_bounds = array<i64: 256, 256>}, {pipeline_mode = #tpu.pipeline_mode<synchronous>, transform_indices = @transform_10, window_bounds = array<i64: 1, 256>}, {pipeline_mode = #tpu.pipeline_mode<synchronous>, transform_indices = @transform_11, window_bounds = array<i64: 256, 512>}, {pipeline_mode = #tpu.pipeline_mode<synchronous>, transform_indices = @transform_12, window_bounds = array<i64: 1, 512>}, {pipeline_mode = #tpu.pipeline_mode<synchronous>, transform_indices = @transform_13, window_bounds = array<i64: 512, 1024>}, {pipeline_mode = #tpu.pipeline_mode<synchronous>, transform_indices = @transform_14, window_bounds = array<i64: 1, 1024>}, {transform_indices = @transform_15, window_bounds = array<i64: 1, 1, 1024>}]} {
    %c0 = arith.constant 0 : index
    %c0_0 = arith.constant 0 : index
    %c0_1 = arith.constant 0 : index
    %0 = vector.load %arg2[%c0, %c0_0, %c0_1] : memref<1x256x4xbf16, #tpu.memory_space<vmem>>, vector<1x256x4xbf16>
    %1 = vector.shape_cast %0 : vector<1x256x4xbf16> to vector<256x4xbf16>
    %c0_2 = arith.constant 0 : index
    %c0_3 = arith.constant 0 : index
    %2 = vector.load %arg4[%c0_2, %c0_3] : memref<4x64xbf16, #tpu.memory_space<vmem>>, vector<4x64xbf16>
    %cst = arith.constant dense<0.000000e+00> : vector<256x64xf32>
    %3 = tpu.matmul %1, %2, %cst {dimension_numbers = #tpu.dot_dimension_numbers<[1], [0], [0], [1], [0, 0, 1, 1], [], []>} : vector<256x4xbf16>, vector<4x64xbf16>, vector<256x64xf32> -> vector<256x64xf32>
    %c0_4 = arith.constant 0 : index
    %c0_5 = arith.constant 0 : index
    %4 = vector.load %arg5[%c0_4, %c0_5] : memref<1x64xf32, #tpu.memory_space<vmem>>, vector<1x64xf32>
    %5 = vector.broadcast %4 : vector<1x64xf32> to vector<256x64xf32>
    %6 = arith.addf %3, %5 : vector<256x64xf32>
    %cst_6 = arith.constant 0.000000e+00 : f32
    %7 = vector.broadcast %cst_6 : f32 to vector<256x64xf32>
    %8 = arith.maximumf %6, %7 : vector<256x64xf32>
    %9 = arith.truncf %8 : vector<256x64xf32> to vector<256x64xbf16>
    %c0_7 = arith.constant 0 : index
    %c0_8 = arith.constant 0 : index
    %10 = vector.load %arg6[%c0_7, %c0_8] : memref<64x64xbf16, #tpu.memory_space<vmem>>, vector<64x64xbf16>
    %cst_9 = arith.constant dense<0.000000e+00> : vector<256x64xf32>
    %11 = tpu.matmul %9, %10, %cst_9 {dimension_numbers = #tpu.dot_dimension_numbers<[1], [0], [0], [1], [0, 0, 1, 1], [], []>} : vector<256x64xbf16>, vector<64x64xbf16>, vector<256x64xf32> -> vector<256x64xf32>
    %c0_10 = arith.constant 0 : index
    %c0_11 = arith.constant 0 : index
    %12 = vector.load %arg7[%c0_10, %c0_11] : memref<1x64xf32, #tpu.memory_space<vmem>>, vector<1x64xf32>
    %13 = vector.broadcast %12 : vector<1x64xf32> to vector<256x64xf32>
    %14 = arith.addf %11, %13 : vector<256x64xf32>
    %cst_12 = arith.constant 0.000000e+00 : f32
    %15 = vector.broadcast %cst_12 : f32 to vector<256x64xf32>
    %16 = arith.maximumf %14, %15 : vector<256x64xf32>
    %17 = arith.truncf %16 : vector<256x64xf32> to vector<256x64xbf16>
    %c0_13 = arith.constant 0 : index
    %c0_14 = arith.constant 0 : index
    %18 = vector.load %arg8[%c0_13, %c0_14] : memref<64x256xbf16, #tpu.memory_space<vmem>>, vector<64x256xbf16>
    %cst_15 = arith.constant dense<0.000000e+00> : vector<256x256xf32>
    %19 = tpu.matmul %17, %18, %cst_15 {dimension_numbers = #tpu.dot_dimension_numbers<[1], [0], [0], [1], [0, 0, 1, 1], [], []>} : vector<256x64xbf16>, vector<64x256xbf16>, vector<256x256xf32> -> vector<256x256xf32>
    %c0_16 = arith.constant 0 : index
    %c0_17 = arith.constant 0 : index
    %20 = vector.load %arg9[%c0_16, %c0_17] : memref<1x256xf32, #tpu.memory_space<vmem>>, vector<1x256xf32>
    %21 = vector.broadcast %20 : vector<1x256xf32> to vector<256x256xf32>
    %22 = arith.addf %19, %21 : vector<256x256xf32>
    %cst_18 = arith.constant 0.000000e+00 : f32
    %23 = vector.broadcast %cst_18 : f32 to vector<256x256xf32>
    %24 = arith.maximumf %22, %23 : vector<256x256xf32>
    %25 = arith.truncf %24 : vector<256x256xf32> to vector<256x256xbf16>
    %26 = vector.shape_cast %25 : vector<256x256xbf16> to vector<16x16x256xbf16>
    %cst_19 = arith.constant dense<0xFF80> : vector<16x256xbf16>
    %27 = vector.multi_reduction <maximumf>, %26, %cst_19 [1] : vector<16x16x256xbf16> to vector<16x256xbf16>
    %c0_20 = arith.constant 0 : index
    %c0_21 = arith.constant 0 : index
    %c0_22 = arith.constant 0 : index
    %28 = vector.load %arg3[%c0_20, %c0_21, %c0_22] : memref<1x16x3xbf16, #tpu.memory_space<vmem>>, vector<1x16x3xbf16>
    %29 = vector.shape_cast %28 : vector<1x16x3xbf16> to vector<16x3xbf16>
    %30 = arith.extf %29 : vector<16x3xbf16> to vector<16x3xf32>
    %c0_23 = arith.constant 0 : index
    %c0_24 = arith.constant 0 : index
    %31 = vector.load %arg10[%c0_23, %c0_24] : memref<3x256xbf16, #tpu.memory_space<vmem>>, vector<3x256xbf16>
    %32 = arith.extf %31 : vector<3x256xbf16> to vector<3x256xf32>
    %33 = vector.extract_strided_slice %30 {offsets = [0, 0], sizes = [16, 1], strides = [1, 1]} : vector<16x3xf32> to vector<16x1xf32>
    %34 = vector.extract_strided_slice %32 {offsets = [0, 0], sizes = [1, 256], strides = [1, 1]} : vector<3x256xf32> to vector<1x256xf32>
    %35 = vector.broadcast %33 : vector<16x1xf32> to vector<16x256xf32>
    %36 = vector.broadcast %34 : vector<1x256xf32> to vector<16x256xf32>
    %37 = arith.mulf %35, %36 : vector<16x256xf32>
    %38 = vector.extract_strided_slice %30 {offsets = [0, 1], sizes = [16, 1], strides = [1, 1]} : vector<16x3xf32> to vector<16x1xf32>
    %39 = vector.extract_strided_slice %32 {offsets = [1, 0], sizes = [1, 256], strides = [1, 1]} : vector<3x256xf32> to vector<1x256xf32>
    %40 = vector.broadcast %38 : vector<16x1xf32> to vector<16x256xf32>
    %41 = vector.broadcast %39 : vector<1x256xf32> to vector<16x256xf32>
    %42 = arith.mulf %40, %41 : vector<16x256xf32>
    %43 = arith.addf %37, %42 : vector<16x256xf32>
    %44 = vector.extract_strided_slice %30 {offsets = [0, 2], sizes = [16, 1], strides = [1, 1]} : vector<16x3xf32> to vector<16x1xf32>
    %45 = vector.extract_strided_slice %32 {offsets = [2, 0], sizes = [1, 256], strides = [1, 1]} : vector<3x256xf32> to vector<1x256xf32>
    %46 = vector.broadcast %44 : vector<16x1xf32> to vector<16x256xf32>
    %47 = vector.broadcast %45 : vector<1x256xf32> to vector<16x256xf32>
    %48 = arith.mulf %46, %47 : vector<16x256xf32>
    %49 = arith.addf %43, %48 : vector<16x256xf32>
    %c0_25 = arith.constant 0 : index
    %c0_26 = arith.constant 0 : index
    %50 = vector.load %arg11[%c0_25, %c0_26] : memref<256x256xbf16, #tpu.memory_space<vmem>>, vector<256x256xbf16>
    %cst_27 = arith.constant dense<0.000000e+00> : vector<16x256xf32>
    %51 = tpu.matmul %27, %50, %cst_27 {dimension_numbers = #tpu.dot_dimension_numbers<[1], [0], [0], [1], [0, 0, 1, 1], [], []>} : vector<16x256xbf16>, vector<256x256xbf16>, vector<16x256xf32> -> vector<16x256xf32>
    %52 = arith.addf %49, %51 : vector<16x256xf32>
    %c0_28 = arith.constant 0 : index
    %c0_29 = arith.constant 0 : index
    %53 = vector.load %arg12[%c0_28, %c0_29] : memref<1x256xf32, #tpu.memory_space<vmem>>, vector<1x256xf32>
    %54 = vector.broadcast %53 : vector<1x256xf32> to vector<16x256xf32>
    %55 = arith.addf %52, %54 : vector<16x256xf32>
    %cst_30 = arith.constant 0.000000e+00 : f32
    %56 = vector.broadcast %cst_30 : f32 to vector<16x256xf32>
    %57 = arith.maximumf %55, %56 : vector<16x256xf32>
    %58 = arith.truncf %57 : vector<16x256xf32> to vector<16x256xbf16>
    %c0_31 = arith.constant 0 : index
    %c0_32 = arith.constant 0 : index
    %59 = vector.load %arg13[%c0_31, %c0_32] : memref<256x512xbf16, #tpu.memory_space<vmem>>, vector<256x512xbf16>
    %cst_33 = arith.constant dense<0.000000e+00> : vector<16x512xf32>
    %60 = tpu.matmul %58, %59, %cst_33 {dimension_numbers = #tpu.dot_dimension_numbers<[1], [0], [0], [1], [0, 0, 1, 1], [], []>} : vector<16x256xbf16>, vector<256x512xbf16>, vector<16x512xf32> -> vector<16x512xf32>
    %c0_34 = arith.constant 0 : index
    %c0_35 = arith.constant 0 : index
    %61 = vector.load %arg14[%c0_34, %c0_35] : memref<1x512xf32, #tpu.memory_space<vmem>>, vector<1x512xf32>
    %62 = vector.broadcast %61 : vector<1x512xf32> to vector<16x512xf32>
    %63 = arith.addf %60, %62 : vector<16x512xf32>
    %cst_36 = arith.constant 0.000000e+00 : f32
    %64 = vector.broadcast %cst_36 : f32 to vector<16x512xf32>
    %65 = arith.maximumf %63, %64 : vector<16x512xf32>
    %66 = arith.truncf %65 : vector<16x512xf32> to vector<16x512xbf16>
    %c0_37 = arith.constant 0 : index
    %c0_38 = arith.constant 0 : index
    %67 = vector.load %arg15[%c0_37, %c0_38] : memref<512x1024xbf16, #tpu.memory_space<vmem>>, vector<512x1024xbf16>
    %cst_39 = arith.constant dense<0.000000e+00> : vector<16x1024xf32>
    %68 = tpu.matmul %66, %67, %cst_39 {dimension_numbers = #tpu.dot_dimension_numbers<[1], [0], [0], [1], [0, 0, 1, 1], [], []>} : vector<16x512xbf16>, vector<512x1024xbf16>, vector<16x1024xf32> -> vector<16x1024xf32>
    %c0_40 = arith.constant 0 : index
    %c0_41 = arith.constant 0 : index
    %69 = vector.load %arg16[%c0_40, %c0_41] : memref<1x1024xf32, #tpu.memory_space<vmem>>, vector<1x1024xf32>
    %70 = vector.broadcast %69 : vector<1x1024xf32> to vector<16x1024xf32>
    %71 = arith.addf %68, %70 : vector<16x1024xf32>
    %cst_42 = arith.constant 0.000000e+00 : f32
    %72 = vector.broadcast %cst_42 : f32 to vector<16x1024xf32>
    %73 = arith.maximumf %71, %72 : vector<16x1024xf32>
    %cst_43 = arith.constant dense<0xFF800000> : vector<1024xf32>
    %74 = vector.multi_reduction <maximumf>, %73, %cst_43 [0] : vector<16x1024xf32> to vector<1024xf32>
    %75 = vector.shape_cast %74 : vector<1024xf32> to vector<1x1024xf32>
    %c0_i32 = arith.constant 0 : i32
    %76 = arith.cmpi eq, %arg1, %c0_i32 : i32
    %77 = arith.extui %76 : i1 to i32
    %c0_i32_44 = arith.constant 0 : i32
    %78 = arith.cmpi ne, %77, %c0_i32_44 : i32
    scf.if %78 {
      %c0_47 = arith.constant 0 : index
      %c0_48 = arith.constant 0 : index
      %c0_49 = arith.constant 0 : index
      %82 = vector.load %arg17[%c0_47, %c0_48, %c0_49] : memref<1x1x1024xf32, #tpu.memory_space<vmem>>, vector<1x1x1024xf32>
      %83 = vector.shape_cast %82 : vector<1x1x1024xf32> to vector<1x1024xf32>
      %84 = vector.shape_cast %75 : vector<1x1024xf32> to vector<1x1x1024xf32>
      tpu.vector_store %arg17[%c0_47, %c0_48, %c0_49], %84 {strides = array<i32>} : memref<1x1x1024xf32, #tpu.memory_space<vmem>>, vector<1x1x1024xf32>,
    } else {
    }
    %c0_i32_45 = arith.constant 0 : i32
    %79 = arith.cmpi sgt, %arg1, %c0_i32_45 : i32
    %80 = arith.extui %79 : i1 to i32
    %c0_i32_46 = arith.constant 0 : i32
    %81 = arith.cmpi ne, %80, %c0_i32_46 : i32
    scf.if %81 {
      %c0_47 = arith.constant 0 : index
      %c0_48 = arith.constant 0 : index
      %c0_49 = arith.constant 0 : index
      %82 = vector.load %arg17[%c0_47, %c0_48, %c0_49] : memref<1x1x1024xf32, #tpu.memory_space<vmem>>, vector<1x1x1024xf32>
      %83 = vector.shape_cast %82 : vector<1x1x1024xf32> to vector<1x1024xf32>
      %84 = arith.maximumf %83, %75 : vector<1x1024xf32>
      %c0_50 = arith.constant 0 : index
      %c0_51 = arith.constant 0 : index
      %c0_52 = arith.constant 0 : index
      %85 = vector.load %arg17[%c0_50, %c0_51, %c0_52] : memref<1x1x1024xf32, #tpu.memory_space<vmem>>, vector<1x1x1024xf32>
      %86 = vector.shape_cast %85 : vector<1x1x1024xf32> to vector<1x1024xf32>
      %87 = vector.shape_cast %84 : vector<1x1024xf32> to vector<1x1x1024xf32>
      tpu.vector_store %arg17[%c0_50, %c0_51, %c0_52], %87 {strides = array<i32>} : memref<1x1x1024xf32, #tpu.memory_space<vmem>>, vector<1x1x1024xf32>,
    } else {
    }
    return
  }
  func.func @transform_0(%arg0: i32, %arg1: i32) -> (i32, i32, i32) {
    %c0_i32 = arith.constant 0 : i32
    %c0_i32_0 = arith.constant 0 : i32
    return %arg0, %arg1, %c0_i32 : i32, i32, i32
  }
  func.func @transform_1(%arg0: i32, %arg1: i32) -> (i32, i32, i32) {
    %c0_i32 = arith.constant 0 : i32
    %c0_i32_0 = arith.constant 0 : i32
    return %arg0, %arg1, %c0_i32 : i32, i32, i32
  }
  func.func @transform_2(%arg0: i32, %arg1: i32) -> (i32, i32) {
    %c0_i32 = arith.constant 0 : i32
    %c0_i32_0 = arith.constant 0 : i32
    %c0_i32_1 = arith.constant 0 : i32
    return %c0_i32, %c0_i32_0 : i32, i32
  }
  func.func @transform_3(%arg0: i32, %arg1: i32) -> (i32, i32) {
    %c0_i32 = arith.constant 0 : i32
    %c0_i32_0 = arith.constant 0 : i32
    %c0_i32_1 = arith.constant 0 : i32
    return %c0_i32, %c0_i32_0 : i32, i32
  }
  func.func @transform_4(%arg0: i32, %arg1: i32) -> (i32, i32) {
    %c0_i32 = arith.constant 0 : i32
    %c0_i32_0 = arith.constant 0 : i32
    %c0_i32_1 = arith.constant 0 : i32
    return %c0_i32, %c0_i32_0 : i32, i32
  }
  func.func @transform_5(%arg0: i32, %arg1: i32) -> (i32, i32) {
    %c0_i32 = arith.constant 0 : i32
    %c0_i32_0 = arith.constant 0 : i32
    %c0_i32_1 = arith.constant 0 : i32
    return %c0_i32, %c0_i32_0 : i32, i32
  }
  func.func @transform_6(%arg0: i32, %arg1: i32) -> (i32, i32) {
    %c0_i32 = arith.constant 0 : i32
    %c0_i32_0 = arith.constant 0 : i32
    %c0_i32_1 = arith.constant 0 : i32
    return %c0_i32, %c0_i32_0 : i32, i32
  }
  func.func @transform_7(%arg0: i32, %arg1: i32) -> (i32, i32) {
    %c0_i32 = arith.constant 0 : i32
    %c0_i32_0 = arith.constant 0 : i32
    %c0_i32_1 = arith.constant 0 : i32
    return %c0_i32, %c0_i32_0 : i32, i32
  }
  func.func @transform_8(%arg0: i32, %arg1: i32) -> (i32, i32) {
    %c0_i32 = arith.constant 0 : i32
    %c0_i32_0 = arith.constant 0 : i32
    %c0_i32_1 = arith.constant 0 : i32
    return %c0_i32, %c0_i32_0 : i32, i32
  }
  func.func @transform_9(%arg0: i32, %arg1: i32) -> (i32, i32) {
    %c0_i32 = arith.constant 0 : i32
    %c0_i32_0 = arith.constant 0 : i32
    %c0_i32_1 = arith.constant 0 : i32
    return %c0_i32, %c0_i32_0 : i32, i32
  }
  func.func @transform_10(%arg0: i32, %arg1: i32) -> (i32, i32) {
    %c0_i32 = arith.constant 0 : i32
    %c0_i32_0 = arith.constant 0 : i32
    %c0_i32_1 = arith.constant 0 : i32
    return %c0_i32, %c0_i32_0 : i32, i32
  }
  func.func @transform_11(%arg0: i32, %arg1: i32) -> (i32, i32) {
    %c0_i32 = arith.constant 0 : i32
    %c0_i32_0 = arith.constant 0 : i32
    %c0_i32_1 = arith.constant 0 : i32
    return %c0_i32, %c0_i32_0 : i32, i32
  }
  func.func @transform_12(%arg0: i32, %arg1: i32) -> (i32, i32) {
    %c0_i32 = arith.constant 0 : i32
    %c0_i32_0 = arith.constant 0 : i32
    %c0_i32_1 = arith.constant 0 : i32
    return %c0_i32, %c0_i32_0 : i32, i32
  }
  func.func @transform_13(%arg0: i32, %arg1: i32) -> (i32, i32) {
    %c0_i32 = arith.constant 0 : i32
    %c0_i32_0 = arith.constant 0 : i32
    %c0_i32_1 = arith.constant 0 : i32
    return %c0_i32, %c0_i32_0 : i32, i32
  }
  func.func @transform_14(%arg0: i32, %arg1: i32) -> (i32, i32) {
    %c0_i32 = arith.constant 0 : i32
    %c0_i32_0 = arith.constant 0 : i32
    %c0_i32_1 = arith.constant 0 : i32
    return %c0_i32, %c0_i32_0 : i32, i32
  }
  func.func @transform_15(%arg0: i32, %arg1: i32) -> (i32, i32, i32) {
    %c0_i32 = arith.constant 0 : i32
    %c0_i32_0 = arith.constant 0 : i32
    %c0_i32_1 = arith.constant 0 : i32
    return %arg0, %c0_i32, %c0_i32_0 : i32, i32, i32
  }
}

</mosaic_0001>

<bundles_post_ra>
// kernel: tpu_custom_call.1
= control target key start
LH: loop header
LB: loop body
LE: loop exit
PB: predicated region body
PF: predicated region fallthrough
CT: control target
= control target key end

     0   :  { %s7429_s0 = inlined_call_operand.vmem [shape: bf16[2,256,4], index: 0, kind: input, shape index: {}]   ;;  %s7430_s1 = inlined_call_operand.vmem [shape: bf16[2,16,3], index: 1, kind: input, shape index: {}]   ;;  %s7431_s2 = inlined_call_operand.hbm [shape: bf16[4,64], index: 2, kind: input, shape index: {}]   ;;  %s7432_s3 = inlined_call_operand.vmem [shape: f32[1,64], index: 3, kind: input, shape index: {}]   ;;  %s7433_s4 = inlined_call_operand.vmem [shape: bf16[64,64], index: 4, kind: input, shape index: {}]   ;;  %s7434_s5 = inlined_call_operand.hbm [shape: f32[1,64], index: 5, kind: input, shape index: {}]   ;;  %s7435_s6 = inlined_call_operand.hbm [shape: bf16[64,256], index: 6, kind: input, shape index: {}]   ;;  %s7436_s7 = inlined_call_operand.hbm [shape: f32[1,256], index: 7, kind: input, shape index: {}]   ;;  %s7437_s8 = inlined_call_operand.hbm [shape: bf16[3,256], index: 8, kind: input, shape index: {}]   ;;  %s7438_s9 = inlined_call_operand.vmem [shape: bf16[256,256], index: 9, kind: input, shape index: {}]   ;;  %s7439_s10 = inlined_call_operand.hbm [shape: f32[1,256], index: 10, kind: input, shape index: {}]   ;;  %s7440_s11 = inlined_call_operand.hbm [shape: bf16[256,512], index: 11, kind: input, shape index: {}]   ;;  %s7441_s12 = inlined_call_operand.vmem [shape: f32[1,512], index: 12, kind: input, shape index: {}]   ;;  %s7442_s13 = inlined_call_operand.hbm [shape: bf16[512,1024], index: 13, kind: input, shape index: {}]   ;;  %s7443_s14 = inlined_call_operand.vmem [shape: f32[1,1024], index: 14, kind: input, shape index: {}]   ;;  %s7444_s15 = inlined_call_operand.hbm [shape: f32[2,1,1024], index: 15, kind: output, shape index: {}]  }
   0x1   :  { %7456 = sst [smem:[#allocation30_spill]] %s7431_s2 }
   0x2   :  { %7457 = sst [smem:[#allocation31_spill]] %s7434_s5 }
   0x3   :  { %7458 = sst [smem:[#allocation32_spill]] %s7436_s7 }
   0x4   :  { %20 = vsyncpa [#allocation3], 0 }
   0x5   :  { %21 = vsyncpa [#allocation6], 0 }
   0x6   :  { %22 = vsyncpa [#allocation9], 0 }
   0x7   :  { %23 = vsyncpa [#allocation12], 0 }
   0x8   :  { %24 = vsyncpa [#allocation15], 0 }
   0x9   :  { %25 = vsyncpa [#allocation4], 0 }
   0xa   :  { %27 = vsyncpa [#allocation4 + $0x1], 0  ;;  %s6672_s18 = smov 0   ;;  %s6674_s19 = smov 0  }
   0xb   :  { %s6676_s20 = smov 0   ;;  %s6678_s21 = smov 0  }
   0xc   :  { %s6680_s22 = smov 0   ;;  %s6682_s23 = smov 0  }
   0xd LB: > { %7459 = sst [smem:[#allocation23_spill]] %s6551_s18  ;;  %s5343_s24 = sadd.s32 4294967295, %s6571_s23   ;;  %s6571_s23 = sphi %s6682_s23, %s33_s23   ;;  %s6567_s22 = sphi %s6680_s22, %s7485_s22   ;;  %s6563_s21 = sphi %s6678_s21, %s7484_s21   ;;  %s6559_s20 = sphi %s6676_s20, %s7483_s20   ;;  %s6555_s19 = sphi %s6674_s19, %s7487_s19   ;;  %s6551_s18 = sphi %s6672_s18, %s7486_s18  }
   0xe   : > { %7460 = sst [smem:[#allocation24_spill]] %s6559_s20  ;;  %s5344_s25 = sadd.s32 4294967294, %s6571_s23  }
   0xf   : > { %7461 = sst [smem:[#allocation25_spill]] %s6567_s22  ;;  %s45_s26 = sadd.s32 1, %s6567_s22 }
  0x10   : > { %7462 = sst [smem:[#allocation26_spill]] %s6571_s23  ;;  %s381_s27 = sadd.s32 1, %s6559_s20 }
  0x11   : > { %p47_p0 = scmp.ge.s32.totalorder %s45_s26, 2  ;;  %p391_p1 = scmp.ne.s32.totalorder %s6559_s20, %s6555_s19 }
  0x12   : > { %p392_p2 = scmp.eq.s32.totalorder %s5343_s24, 1  ;;  %p397_p3 = scmp.ne.s32.totalorder %s6555_s19, %s6551_s18 }
  0x13   : > { %s7489_s26 = smov (%p47_p0, %s45_s26), 0  ;;  %p398_p5 = scmp.eq.s32.totalorder %s5344_s25, 1 }
  0x14   : > { %7463 = sst [smem:[#allocation27_spill]] %s7489_s26  ;;  %p6712_p4 = por %p392_p2, %p391_p1 }
  0x15   : > { %s378_s29 = ssub.s32 %s6567_s22, %s7489_s26  ;;  %p5345_p6 = scmp.ge.s32.totalorder %s6571_s23, 1 }
  0x16   : > { %s7464_s28 = scalar_select %p6712_p4, 1, 0 }
  0x17   : > { %p379_p7 = scmp.eq.s32.totalorder %s378_s29, 0  ;;  %p6719_p8 = por %p398_p5, %p397_p3 }
  0x18   : > { %p405_p9 = scmp.lt.s32.totalorder %s6571_s23, 3  ;;  %p6731_p11 = scmp.eq.s32.totalorder %s5343_s24, 0 }
  0x19   : > { %s7465_s30 = scalar_select %p6719_p8, 1, 0 }
  0x1a   : > { %s6725_s16 = scalar_select %p379_p7, %s6559_s20, %s381_s27  }
  0x1b   : > { %7466 = sst [smem:[#allocation28_spill]] %s7465_s30  ;;  %p6727_p10 = pnand %p5345_p6, %p405_p9 }
  0x1c   : > { %7467 = sst [smem:[#allocation29_spill]] %s6725_s16  ;;  %s6573_s25 = smov [#allocation5]  }
  0x1d   : > { %s7468_s17 = scalar_select %p6727_p10, 1, 0 }
  0x1e   : > { %s7469_s18 = scalar_select %p6731_p11, 1, 0 }
  0x1f   : > { %p5960_p12 = pneg %p6727_p10  ;;  %s435_s29 = sshll.u32 %s6573_s25, 4  ;;  %s436_s29 = int_to_ptr.vmem [resolvable:$true] %s435_s29 }
  0x20   : > { %s6574_s26 = smov [#allocation8]   ;;  %s6575_s16 = smov [#allocation11]  }
  0x21   : > { %s459_s22 = sshll.u32 %s6574_s26, 4  ;;  %p6739_p13 = pnand %p6731_p11, %p5960_p12  ;;  %s460_s22 = int_to_ptr.vmem [resolvable:$true] %s459_s22 }
  0x22   : > { %s484_s24 = sshll.u32 %s6575_s16, 4  ;;  %s6278_s30 = scalar_lea.vmem %s436_s29, 16  ;;  %s485_s24 = int_to_ptr.vmem [resolvable:$true] %s484_s24 }
  0x23   : > { %p6745_p0 = pneg %p6739_p13  ;;  %p6279_p1 = scmp.ne.s32.totalorder %s436_s29, %s6278_s30 }
  0x24   : > { %s6285_s26 = scalar_lea.vmem %s436_s29, 32  ;;  %p6286_p5 = scmp.lt.s32.totalorder %s436_s29, %s436_s29 }
  0x25   : > { %p6281_p2 = pnand %p6279_p1, %p6745_p0  ;;  %p6287_p6 = scmp.lt.s32.totalorder %s6285_s26, %s6278_s30 }
  0x27   : > { %p6282_p3 = pneg %p6281_p2  ;;  %p6288_p7 = por %p6287_p6, %p6286_p5 }
  0x29   : > { %p6289_p9 = pnand %p6288_p7, %p6282_p3 }
  0x2b   : > { %6292 = shalt.err (!%p6289_p9)
}
  0x2c   : > { %s7472_s5 = sld [smem:[#allocation31_spill]]  ;;  %s6304_s23 = scalar_lea.vmem %s460_s22, 32 }
  0x2d   : > { %p6305_p12 = scmp.ne.s32.totalorder %s460_s22, %s6304_s23  ;;  %p6312_p1 = scmp.lt.s32.totalorder %s460_s22, %s460_s22 }
  0x2e   : > { %p6313_p2 = scmp.lt.s32.totalorder %s6304_s23, %s6304_s23 }
  0x2f   : > { %p6307_p8 = pnand %p6305_p12, %p6745_p0 }
  0x30   : > { %p6314_p11 = por %p6313_p2, %p6312_p1 }
  0x31   : > { %p6308_p4 = pneg %p6307_p8 }
  0x32   : > { %5966 = dma.hbm_to_vmem [thread:$0]  (!%p6739_p13), %s7472_s5, 16, %s436_s29, [#allocation6]  }
  0x33   : > { %p6315_p10 = pnand %p6314_p11, %p6308_p4 }
  0x35   : > { %6318 = shalt.err (!%p6315_p10)
}
  0x36   : > { %s7473_s7 = sld [smem:[#allocation32_spill]]  ;;  %s6330_s16 = scalar_lea.vmem %s485_s24, 32 }
  0x37   : > { %p6331_p3 = scmp.ne.s32.totalorder %s485_s24, %s6330_s16  ;;  %p6338_p7 = scmp.lt.s32.totalorder %s485_s24, %s485_s24 }
  0x38   : > { %p6339_p8 = scmp.lt.s32.totalorder %s6330_s16, %s6330_s16 }
  0x39   : > { %p6333_p5 = pnand %p6331_p3, %p6745_p0 }
  0x3a   : > { %p6340_p9 = por %p6339_p8, %p6338_p7 }
  0x3b   : > { %p6334_p6 = pneg %p6333_p5 }
  0x3c   : > { %5972 = dma.hbm_to_vmem [thread:$0]  (!%p6739_p13), %s7473_s7, 32, %s460_s22, [#allocation9]  }
  0x3d   : > { %p6341_p12 = pnand %p6340_p9, %p6334_p6 }
  0x3f   : > { %6344 = shalt.err (!%p6341_p12)
}
  0x40   : > { %5978 = dma.hbm_to_vmem [thread:$0]  (!%p6739_p13), %s7439_s10, 32, %s485_s24, [#allocation12]  }
  0x41   : > { %s6576_s25 = smov [#allocation2]   ;;  %s6577_s30 = smov [#allocation7]  }
  0x42   : > { %s418_s22 = sshll.u32 %s6576_s25, 4  ;;  %s445_s26 = sshll.u32 %s6577_s30, 4  ;;  %s419_s22 = int_to_ptr.vmem [resolvable:$true] %s418_s22  ;;  %s446_s26 = int_to_ptr.vmem [resolvable:$true] %s445_s26 }
  0x43   : > { %s6356_s5 = scalar_lea.vmem %s419_s22, 32  ;;  %p6364_p1 = scmp.lt.s32.totalorder %s419_s22, %s419_s22 }
  0x44   : > { %p6357_p4 = scmp.ne.s32.totalorder %s419_s22, %s6356_s5  ;;  %p6365_p2 = scmp.lt.s32.totalorder %s6356_s5, %s6356_s5 }
  0x46   : > { %p6359_p10 = pnand %p6357_p4, %p6745_p0  ;;  %p6366_p3 = por %p6365_p2, %p6364_p1 }
  0x48   : > { %p6360_p11 = pneg %p6359_p10 }
  0x4a   : > { %p6367_p5 = pnand %p6366_p3, %p6360_p11 }
  0x4c   : > { %6370 = shalt.err (!%p6367_p5)
}
  0x4d   : > { %s7474_s2 = sld [smem:[#allocation30_spill]]  ;;  %s6382_s23 = scalar_lea.vmem %s446_s26, 1024 }
  0x4e   : > { %p6383_p6 = scmp.ne.s32.totalorder %s446_s26, %s6382_s23  ;;  %p6390_p9 = scmp.lt.s32.totalorder %s446_s26, %s446_s26 }
  0x4f   : > { %p6391_p12 = scmp.lt.s32.totalorder %s6382_s23, %s6382_s23 }
  0x50   : > { %p6385_p7 = pnand %p6383_p6, %p6745_p0 }
  0x51   : > { %p6392_p4 = por %p6391_p12, %p6390_p9 }
  0x52   : > { %p6386_p8 = pneg %p6385_p7 }
  0x53   : > { %5963 = dma.hbm_to_vmem [thread:$0]  (!%p6739_p13), %s7474_s2, 32, %s419_s22, [#allocation3]  }
  0x54   : > { %p6393_p10 = pnand %p6392_p4, %p6386_p8 }
  0x56   : > { %6396 = shalt.err (!%p6393_p10)
}
  0x57   : > { %s6578_s5 = smov 128   ;;  %s6579_s29 = smov 8  }
  0x58   : > { %5969 = dma.hbm_to_vmem [thread:$0]  (!%p6739_p13), %s7435_s6, 1024, %s446_s26, [#allocation6], %s6578_s5, %s6578_s5, %s6579_s29  }
  0x59   : > { %s6580_s22 = smov [#allocation10]   ;;  %s6581_s24 = smov [#allocation13]  }
  0x5a   : > { %s470_s16 = sshll.u32 %s6580_s22, 4  ;;  %s494_s2 = sshll.u32 %s6581_s24, 4  ;;  %s471_s16 = int_to_ptr.vmem [resolvable:$true] %s470_s16  ;;  %s495_s2 = int_to_ptr.vmem [resolvable:$true] %s494_s2 }
  0x5b   : > { %s6408_s7 = scalar_lea.vmem %s471_s16, 64  ;;  %p6416_p3 = scmp.lt.s32.totalorder %s471_s16, %s471_s16 }
  0x5c   : > { %p6409_p11 = scmp.ne.s32.totalorder %s471_s16, %s6408_s7  ;;  %p6417_p5 = scmp.lt.s32.totalorder %s6408_s7, %s6408_s7 }
  0x5e   : > { %p6411_p1 = pnand %p6409_p11, %p6745_p0  ;;  %p6418_p6 = por %p6417_p5, %p6416_p3 }
  0x60   : > { %p6412_p2 = pneg %p6411_p1 }
  0x62   : > { %p6419_p7 = pnand %p6418_p6, %p6412_p2 }
  0x64   : > { %6422 = shalt.err (!%p6419_p7)
}
  0x65   : > { %5975 = dma.hbm_to_vmem [thread:$0]  (!%p6739_p13), %s7437_s8, 64, %s471_s16, [#allocation9]  }
  0x66   : > { %s6434_s5 = scalar_lea.vmem %s495_s2, 8192  ;;  %p6442_p4 = scmp.lt.s32.totalorder %s495_s2, %s495_s2 }
  0x67   : > { %p6435_p8 = scmp.ne.s32.totalorder %s495_s2, %s6434_s5  ;;  %p6443_p10 = scmp.lt.s32.totalorder %s6434_s5, %s6434_s5 }
  0x69   : > { %p6437_p9 = pnand %p6435_p8, %p6745_p0  ;;  %p6444_p11 = por %p6443_p10, %p6442_p4 }
  0x6b   : > { %p6438_p12 = pneg %p6437_p9 }
  0x6d   : > { %p6445_p1 = pnand %p6444_p11, %p6438_p12 }
  0x6f   : > { %6448 = shalt.err (!%p6445_p1)
}
  0x70   : > { %s6582_s7 = smov 256   ;;  %s6583_s29 = smov 16  }
  0x71   : > { %5981 = dma.hbm_to_vmem [thread:$0]  (!%p6739_p13), %s7440_s11, 8192, %s495_s2, [#allocation12], %s6582_s7, %s6582_s7, %s6583_s29  }
  0x72   : > { %s6584_s22 = smov [#allocation14]  }
  0x73   : > { %s510_s16 = sshll.u32 %s6584_s22, 4  ;;  %s511_s16 = int_to_ptr.vmem [resolvable:$true] %s510_s16 }
  0x74   : > { %s6460_s24 = scalar_lea.vmem %s511_s16, 32768  ;;  %p6468_p6 = scmp.lt.s32.totalorder %s511_s16, %s511_s16 }
  0x75   : > { %p6461_p2 = scmp.ne.s32.totalorder %s511_s16, %s6460_s24  ;;  %p6469_p7 = scmp.lt.s32.totalorder %s6460_s24, %s6460_s24 }
  0x77   : > { %p6463_p3 = pnand %p6461_p2, %p6745_p0  ;;  %p6470_p8 = por %p6469_p7, %p6468_p6 }
  0x79   : > { %p6464_p5 = pneg %p6463_p3 }
  0x7b   : > { %p6471_p9 = pnand %p6470_p8, %p6464_p5 }
  0x7d   : > { %6474 = shalt.err (!%p6471_p9)
}
  0x7e   : > { %s6585_s23 = smov 512   ;;  %s6586_s26 = smov 32  }
  0x7f   : > { %5984 = dma.hbm_to_vmem [thread:$0]  (!%p6739_p13), %s7442_s13, 32768, %s511_s16, [#allocation15], %s6585_s23, %s6585_s23, %s6586_s26  }
  0x80   : > { %p7475_p12 = scmp.ne.s32.totalorder %s7468_s17, 0 }
  0x81   : > { %p7476_p4 = scmp.ne.s32.totalorder (!%p7475_p12), %s7469_s18, 0 }
  0x82   : > { %555 = sbr.rel (%p7475_p12) target bundleno = 1761 (0x6e1), region = 80 }
  0x87   : > { %6526 = dma.done.wait (%p7476_p4), [#allocation3], 32  }
  0x88   : > { %6528 = vsyncadd (%p7476_p4), [#allocation3], 4294967264 }
  0x89   : > { %6530 = dma.done.wait (%p7476_p4), [#allocation6], 1040  }
  0x8a   : > { %6532 = vsyncadd (%p7476_p4), [#allocation6], 4294966256 }
  0x8b   : > { %6534 = dma.done.wait (%p7476_p4), [#allocation9], 96  }
  0x8c   : > { %6536 = vsyncadd (%p7476_p4), [#allocation9], 4294967200 }
  0x8d   : > { %6538 = dma.done.wait (%p7476_p4), [#allocation12], 8224  }
  0x8e   : > { %6540 = vsyncadd (%p7476_p4), [#allocation12], 4294959072 }
  0x8f   : > { %6542 = dma.done.wait (%p7476_p4), [#allocation15], 32768  }
  0x90   : > { %6544 = vsyncadd (%p7476_p4), [#allocation15], 4294934528  ;;  %p645_p13 = scmp.lt.s32.totalorder %s6563_s21, 1  ;;  %vm834_vm0 = vcmask 1041408   ;;  %vm785_vm1 = vcmask 31744   ;;  %v6107_v13 = vld [vmem:[%s7433_s4 + $0x18] sm:$0xff]  }
  0x91   : > { %v697_v0 = vld [vmem:[#allocation2] sm:$0x3]  ;;  %v6108_v15 = vld [vmem:[%s7433_s4 + $0x10] sm:$0xff]   ;;  %v6109_v16 = vld [vmem:[%s7433_s4 + $0x8] sm:$0xff]   ;;  %vm1086_vm2 = vcmask 523264   ;;  %vm2264_vm3 = vcmask 1041409  }
  0x92   : > { %s6829_s2 = scalar_select %p645_p13, %s6563_s21, 1  ;;  %5924 = vmatprep.subr.msk.bf16.mxu0 %vm834_vm0, %v697_v0  ;;  %v836_v1 = vsel %vm834_vm0, %v697_v0, 0  ;;  %5925 = vmatprep.subr.msk.bf16.mxu1 %vm834_vm0, %v697_v0  ;;  %v6110_v21 = vld [vmem:[%s7433_s4] sm:$0xff]   ;;  %v6111_v22 = vld [vmem:[#allocation7 + $0x30] ss:$8 sps:$4 sm:$0xff]   ;;  %vm2266_vm4 = vcmask 1042434  }
  0x93   : > { %5849 = vmatpush3.bf16.msra.mxu0 %v836_v1  ;;  %5923 = vmatpush3.bf16.msra.mxu1 %v836_v1  ;;  %v6113_v23 = vld [vmem:[#allocation7 + $0x34] ss:$8 sps:$4 sm:$0xff]   ;;  %v6116_v24 = vld [vmem:[#allocation7 + $0x24] ss:$8 sps:$4 sm:$0xff]   ;;  %v6114_v25 = vld [vmem:[#allocation7 + $0x20] ss:$8 sps:$4 sm:$0xff]  }
  0x94   : > { %s5804_s20 = sshll.u32 %s6829_s2, 7  ;;  %5882 = vmatprep.subr.bf16.mxu1 %v6107_v13  ;;  %1460 = vmatprep.subr.bf16.mxu0 %v6113_v23  ;;  %v6119_v26 = vld [vmem:[#allocation7 + $0x14] ss:$8 sps:$4 sm:$0xff]   ;;  %v6117_v27 = vld [vmem:[#allocation7 + $0x10] ss:$8 sps:$4 sm:$0xff]   ;;  %vm2268_vm5 = vcmask 1043459  }
  0x95   : > { %s6835_s7 = scalar_lea.vmem %s7429_s0, %s5804_s20  ;;  %v6884_v30 = vld [vmem:[%s7432_s3] ss:$0 sm:$0xff]  ;;  %vm2270_vm6 = vcmask 1044484   ;;  %vm2272_vm7 = vcmask 1045509   ;;  %vm2274_vm8 = vcmask 1046534   ;;  %vm2276_vm9 = vcmask 1047559  }
  0x96   : > { %v6091_v2 = vld [vmem:[%s6835_s7] sm:$0xff]   ;;  %v6092_v3 = vld [vmem:[%s6835_s7 + $0x8] sm:$0xff]   ;;  %v6093_v4 = vld [vmem:[%s6835_s7 + $0x10] sm:$0xff]   ;;  %s5805_s16 = sshll.u32 %s6829_s2, 3  ;;  %s641_s17 = sand.u32 1, %s6555_s19  }
  0x97   : > { %5850 = vmatprep.mubr.msk.bf16.mxu0 %vm785_vm1, %v6091_v2  ;;  %v6094_v5 = vld [vmem:[%s6835_s7 + $0x18] sm:$0xff]   ;;  %v6095_v6 = vld [vmem:[%s6835_s7 + $0x20] sm:$0xff]   ;;  %v6100_v8 = vld [vmem:[%s6835_s7 + $0x48] sm:$0xff]   ;;  %s662_s26 = scalar_lea.vmem %s7430_s1, %s5805_s16  ;;  %s5364_s27 = sshll.u32 %s641_s17, 3 }
  0x98   : > { %5851 = vmatmul.mubr.msk.bf16.vlgmr.msra.gmra.mxu0 %vm785_vm1, %v6092_v3  ;;  %v6099_v7 = vld [vmem:[%s6835_s7 + $0x40] sm:$0xff]   ;;  %v6101_v9 = vld [vmem:[%s6835_s7 + $0x50] sm:$0xff]   ;;  %v6096_v10 = vld [vmem:[%s6835_s7 + $0x28] sm:$0xff]   ;;  %s643_s18 = scalar_lea.vmem [#allocation16], %s5364_s27  ;;  %s5159_s24 = scalar_lea.sflag [#allocation4], %s641_s17 }
  0x99   : > { %5854 = vmatprep.mubr.msk.bf16.mxu0 %vm785_vm1, %v6093_v4  ;;  %5866 = vmatprep.mubr.msk.bf16.mxu1 %vm785_vm1, %v6099_v7  ;;  %v6102_v11 = vld [vmem:[%s6835_s7 + $0x58] sm:$0xff]   ;;  %v6103_v12 = vld [vmem:[%s6835_s7 + $0x60] sm:$0xff]   ;;  %v6097_v14 = vld [vmem:[%s6835_s7 + $0x30] sm:$0xff]   ;;  %s5173_s29 = sshll.u32 %s643_s18, 4  ;;  %p7477_p10 = scmp.ne.s32.totalorder %s7464_s28, 0  ;;  %s5174_s29 = int_to_ptr.vmem [resolvable:$true] %s5173_s29 }
  0x9a   : > { %5867 = vmatmul.mubr.msk.bf16.vlgmr.msra.gmra.mxu1 %vm785_vm1, %v6100_v8  ;;  %v6104_v17 = vld [vmem:[%s6835_s7 + $0x68] sm:$0xff]   ;;  %v6098_v18 = vld [vmem:[%s6835_s7 + $0x38] sm:$0xff]   ;;  %v6105_v19 = vld [vmem:[%s6835_s7 + $0x70] sm:$0xff]   ;;  %1461 = vmatpush1.bf16.msra.mxu0 %v6111_v22  ;;  %s6475_s23 = scalar_lea.vmem %s5174_s29, 128 }
  0x9b   : > { %5870 = vmatprep.mubr.msk.bf16.mxu1 %vm785_vm1, %v6101_v9  ;;  %5883 = vmatpush3.bf16.msra.mxu1 %v6107_v13  ;;  %v6106_v20 = vld [vmem:[%s6835_s7 + $0x78] sm:$0xff]   ;;  %s5806_s7 = sshll.u32 %s6563_s21, 7  ;;  %p6476_p0 = scmp.ne.s32.totalorder %s5174_s29, %s6475_s23 }
  0x9c   : > { %5884 = vmatprep.subr.bf16.mxu1 %v6108_v15  ;;  %1462 = vmatprep.subr.bf16.mxu0 %v6116_v24  ;;  %s5171_s16 = scalar_lea.hbm %s7444_s15, %s5806_s7 }
  0x9d   : > { %p6477_p11 = pnand %p6476_p0, %p7477_p10 }
  0x9e   : > { %1463 = vmatpush1.bf16.msra.mxu0 %v6114_v25 }
  0x9f   : > { %5885 = vmatpush3.bf16.msra.mxu1 %v6108_v15  ;;  %1464 = vmatprep.subr.bf16.mxu0 %v6119_v26  ;;  %p6478_p1 = pneg %p6477_p11 }
  0xa0   : > { %5855 = vmatmul.mubr.msk.bf16.gmra.mxu0 %vm785_vm1, %v6094_v5  ;;  %5886 = vmatprep.subr.bf16.mxu1 %v6109_v16 }
  0xa1   : > { %5858 = vmatprep.mubr.msk.bf16.mxu0 %vm785_vm1, %v6095_v6 }
  0xa2   : > { %5871 = vmatmul.mubr.msk.bf16.gmra.mxu1 %vm785_vm1, %v6102_v11  ;;  %1465 = vmatpush1.bf16.msra.mxu0 %v6117_v27 }
  0xa3   : > { %5874 = vmatprep.mubr.msk.bf16.mxu1 %vm785_vm1, %v6103_v12  ;;  %5887 = vmatpush3.bf16.msra.mxu1 %v6109_v16 }
  0xa4   : > { %5888 = vmatprep.subr.bf16.mxu1 %v6110_v21 }
  0xa7   : > { %5889 = vmatpush3.bf16.msra.mxu1 %v6110_v21 }
  0xa8   : > { %5859 = vmatmul.mubr.msk.bf16.gmra.mxu0 %vm785_vm1, %v6096_v10 }
  0xa9   : > { %5862 = vmatprep.mubr.msk.bf16.mxu0 %vm785_vm1, %v6097_v14 }
  0xaa   : > { %5875 = vmatmul.mubr.msk.bf16.gmra.mxu1 %vm785_vm1, %v6104_v17 }
  0xab   : > { %5878 = vmatprep.mubr.msk.bf16.mxu1 %vm785_vm1, %v6105_v19 }
  0xb0   : > { %5863 = vmatmul.mubr.msk.bf16.gmra.mxu0 %vm785_vm1, %v6098_v18 }
  0xb2   : > { %5879 = vmatmul.mubr.msk.bf16.gmra.mxu1 %vm785_vm1, %v6106_v20 }
 0x158   : > { %v5852_v28 = vpop.f32.mrf.mxu0 }
 0x159   : > { %v881_v34 = vadd.f32 %v5852_v28, %v6884_v30 }
 0x15a   : > { %v872_v29 = vpop.f32.mrf.mxu0  ;;  %v6890_v37 = vpop.f32.mrf.mxu1 }
 0x15b   : > { %v873_v32 = vadd.f32 %v6884_v30, %v872_v29  ;;  %v1001_v43 = vmax.f32 %v881_v34, 0.0 }
 0x15c   : > { %v5853_v31 = vpop.f32.mrf.mxu0  ;;  %v936_v42 = vpop.f32.mrf.mxu1 }
 0x15d   : > { %v884_v33 = vadd.f32 %v5853_v31, %v6884_v30  ;;  %v999_v40 = vmax.f32 %v873_v32, 0.0  ;;  %v937_v18 = vadd.f32 %v6884_v30, %v936_v42 }
 0x15e   : > { %v875_v35 = vpop.f32.mrf.mxu0  ;;  %v5869_v48 = vpop.f32.mrf.mxu1 }
 0x15f   : > { %v876_v36 = vadd.f32 %v6884_v30, %v875_v35  ;;  %v1002_v38 = vmax.f32 %v884_v33, 0.0  ;;  %v1015_v27 = vmax.f32 %v937_v18, 0.0  ;;  %v6939_v18 = vld [vmem:[#allocation5] ss:$0 sm:$0xff] }
 0x160   : > { %v5856_v39 = vpop.f32.mrf.mxu0  ;;  %v939_v52 = vpop.f32.mrf.mxu1 }
 0x161   : > { %v1000_v41 = vmax.f32 %v876_v36, 0.0  ;;  %v897_v44 = vadd.f32 %v5856_v39, %v6884_v30  ;;  %v1032_v49 = vpack.c.bf16 %v1002_v38, %v1001_v43  ;;  %v940_v22 = vadd.f32 %v6884_v30, %v939_v52 }
 0x162   : > { %v888_v45 = vpop.f32.mrf.mxu0  ;;  %v5872_v58 = vpop.f32.mrf.mxu1  ;;  %v945_v36 = vadd.f32 %v6890_v37, %v6884_v30  ;;  %v948_v38 = vadd.f32 %v5869_v48, %v6884_v30 }
 0x163   : > { %v1031_v46 = vpack.c.bf16 %v1000_v41, %v999_v40  ;;  %v889_v47 = vadd.f32 %v6884_v30, %v888_v45  ;;  %v1005_v53 = vmax.f32 %v897_v44, 0.0  ;;  %v1016_v33 = vmax.f32 %v940_v22, 0.0 }
 0x164   : > { %v5857_v50 = vpop.f32.mrf.mxu0  ;;  %v952_v61 = vpop.f32.mrf.mxu1  ;;  %v1017_v45 = vmax.f32 %v945_v36, 0.0 }
 0x165   : > { %v900_v51 = vadd.f32 %v5857_v50, %v6884_v30  ;;  %5890 = vmatprep.mubr.msk.bf16.mxu1 %vm1086_vm2, %v1031_v46  ;;  %v1003_v55 = vmax.f32 %v889_v47, 0.0  ;;  %v1039_v41 = vpack.c.bf16 %v1016_v33, %v1015_v27  ;;  %v953_v42 = vadd.f32 %v6884_v30, %v952_v61 }
 0x166   : > { %v891_v54 = vpop.f32.mrf.mxu0  ;;  %5891 = vmatmul.mubr.msk.bf16.vlgmr.msra.gmra.mxu1 %vm1086_vm2, %v1032_v49  ;;  %v5873_v3 = vpop.f32.mrf.mxu1  ;;  %v1018_v46 = vmax.f32 %v948_v38, 0.0  ;;  %v961_v50 = vadd.f32 %v5872_v58, %v6884_v30 }
 0x167   : > { %v1006_v56 = vmax.f32 %v900_v51, 0.0  ;;  %v892_v57 = vadd.f32 %v6884_v30, %v891_v54  ;;  %v1019_v47 = vmax.f32 %v953_v42, 0.0  ;;  %v964_v51 = vadd.f32 %v5873_v3, %v6884_v30 }
 0x168   : > { %v5860_v59 = vpop.f32.mrf.mxu0  ;;  %v955_v6 = vpop.f32.mrf.mxu1  ;;  %v1040_v48 = vpack.c.bf16 %v1018_v46, %v1017_v45 }
 0x169   : > { %v1004_v60 = vmax.f32 %v892_v57, 0.0  ;;  %v1034_v62 = vpack.c.bf16 %v1006_v56, %v1005_v53  ;;  %v913_v63 = vadd.f32 %v5860_v59, %v6884_v30  ;;  %v956_v43 = vadd.f32 %v6884_v30, %v955_v6 }
 0x16a   : > { %v904_v0 = vpop.f32.mrf.mxu0  ;;  %v5876_v12 = vpop.f32.mrf.mxu1  ;;  %v1021_v56 = vmax.f32 %v961_v50, 0.0  ;;  %v1022_v57 = vmax.f32 %v964_v51, 0.0 }
 0x16b   : > { %v1033_v1 = vpack.c.bf16 %v1004_v60, %v1003_v55  ;;  %v905_v2 = vadd.f32 %v6884_v30, %v904_v0  ;;  %v1009_v7 = vmax.f32 %v913_v63, 0.0  ;;  %v1020_v37 = vmax.f32 %v956_v43, 0.0 }
 0x16c   : > { %v5861_v4 = vpop.f32.mrf.mxu0  ;;  %v968_v19 = vpop.f32.mrf.mxu1  ;;  %v977_v58 = vadd.f32 %v5876_v12, %v6884_v30 }
 0x16d   : > { %5894 = vmatprep.mubr.msk.bf16.mxu1 %vm1086_vm2, %v1033_v1  ;;  %v916_v5 = vadd.f32 %v5861_v4, %v6884_v30  ;;  %v1007_v9 = vmax.f32 %v905_v2, 0.0  ;;  %v1041_v52 = vpack.c.bf16 %v1020_v37, %v1019_v47  ;;  %v969_v53 = vadd.f32 %v6884_v30, %v968_v19 }
 0x16e   : > { %5895 = vmatmul.mubr.msk.bf16.gmra.mxu1 %vm1086_vm2, %v1034_v62  ;;  %v907_v8 = vpop.f32.mrf.mxu0  ;;  %v5877_v28 = vpop.f32.mrf.mxu1  ;;  %v1042_v62 = vpack.c.bf16 %v1022_v57, %v1021_v56  ;;  %v1025_v3 = vmax.f32 %v977_v58, 0.0 }
 0x16f   : > { %v1010_v10 = vmax.f32 %v916_v5, 0.0  ;;  %v908_v11 = vadd.f32 %v6884_v30, %v907_v8  ;;  %v1023_v59 = vmax.f32 %v969_v53, 0.0  ;;  %v980_v63 = vadd.f32 %v5877_v28, %v6884_v30 }
 0x170   : > { %v5864_v13 = vpop.f32.mrf.mxu0  ;;  %v971_v39 = vpop.f32.mrf.mxu1 }
 0x171   : > { %v1008_v14 = vmax.f32 %v908_v11, 0.0  ;;  %v1036_v15 = vpack.c.bf16 %v1010_v10, %v1009_v7  ;;  %v929_v16 = vadd.f32 %v5864_v13, %v6884_v30  ;;  %v972_v54 = vadd.f32 %v6884_v30, %v971_v39 }
 0x172   : > { %v920_v17 = vpop.f32.mrf.mxu0  ;;  %v5880_v44 = vpop.f32.mrf.mxu1  ;;  %v1026_v4 = vmax.f32 %v980_v63, 0.0 }
 0x173   : > { %v1035_v20 = vpack.c.bf16 %v1008_v14, %v1007_v9  ;;  %v921_v21 = vadd.f32 %v6884_v30, %v920_v17  ;;  %v1013_v25 = vmax.f32 %v929_v16, 0.0  ;;  %v1024_v60 = vmax.f32 %v972_v54, 0.0  ;;  %v6122_v14 = vld [vmem:[#allocation7 + $0x4] ss:$8 sps:$4 sm:$0xff]  }
 0x174   : > { %v5865_v23 = vpop.f32.mrf.mxu0  ;;  %v984_v49 = vpop.f32.mrf.mxu1  ;;  %v1044_v7 = vpack.c.bf16 %v1026_v4, %v1025_v3  ;;  %v993_v8 = vadd.f32 %v5880_v44, %v6884_v30  ;;  %1466 = vmatprep.subr.bf16.mxu0 %v6122_v14  ;;  %v6587_v16 = vmov 0  }
 0x175   : > { %5898 = vmatprep.mubr.msk.bf16.mxu1 %vm1086_vm2, %v1035_v20  ;;  %v932_v24 = vadd.f32 %v5865_v23, %v6884_v30  ;;  %v1011_v29 = vmax.f32 %v921_v21, 0.0  ;;  %v1043_v0 = vpack.c.bf16 %v1024_v60, %v1023_v59  ;;  %v985_v1 = vadd.f32 %v6884_v30, %v984_v49  ;;  %1484 = vmatprep.mubr.bf16.mxu0 %v6587_v16 }
 0x176   : > { %5899 = vmatmul.mubr.msk.bf16.gmra.mxu1 %vm1086_vm2, %v1036_v15  ;;  %v923_v26 = vpop.f32.mrf.mxu0  ;;  %v5881_v55 = vpop.f32.mrf.mxu1  ;;  %v1029_v11 = vmax.f32 %v993_v8, 0.0  ;;  %v6120_v15 = vld [vmem:[#allocation7] ss:$8 sps:$4 sm:$0xff]   ;;  %6072 = vset.pattern.permute.xlu0 %v6587_v16 }
 0x177   : > { %v1014_v31 = vmax.f32 %v932_v24, 0.0  ;;  %v924_v32 = vadd.f32 %v6884_v30, %v923_v26  ;;  %v1027_v5 = vmax.f32 %v985_v1, 0.0  ;;  %v996_v9 = vadd.f32 %v5881_v55, %v6884_v30  ;;  %1467 = vmatpush1.bf16.msra.mxu0 %v6120_v15 }
 0x178   : > { %v987_v61 = vpop.f32.mrf.mxu1 }
 0x179   : > { %v1012_v34 = vmax.f32 %v924_v32, 0.0  ;;  %v1038_v35 = vpack.c.bf16 %v1014_v31, %v1013_v25  ;;  %v988_v2 = vadd.f32 %v6884_v30, %v987_v61  ;;  %v1030_v12 = vmax.f32 %v996_v9, 0.0 }
 0x17b   : > { %v1037_v40 = vpack.c.bf16 %v1012_v34, %v1011_v29  ;;  %v1028_v6 = vmax.f32 %v988_v2, 0.0  ;;  %v1046_v13 = vpack.c.bf16 %v1030_v12, %v1029_v11 }
 0x17d   : > { %5902 = vmatprep.mubr.msk.bf16.mxu1 %vm1086_vm2, %v1037_v40  ;;  %v1045_v10 = vpack.c.bf16 %v1028_v6, %v1027_v5 }
 0x17e   : > { %5903 = vmatmul.mubr.msk.bf16.gmra.mxu1 %vm1086_vm2, %v1038_v35 }
 0x17f   : > { %5906 = vmatprep.mubr.msk.bf16.mxu1 %vm1086_vm2, %v1039_v41 }
 0x186   : > { %5907 = vmatmul.mubr.msk.bf16.gmra.mxu1 %vm1086_vm2, %v1040_v48 }
 0x187   : > { %5910 = vmatprep.mubr.msk.bf16.mxu1 %vm1086_vm2, %v1041_v52 }
 0x18e   : > { %5911 = vmatmul.mubr.msk.bf16.gmra.mxu1 %vm1086_vm2, %v1042_v62 }
 0x18f   : > { %5914 = vmatprep.mubr.msk.bf16.mxu1 %vm1086_vm2, %v1043_v0 }
 0x196   : > { %5915 = vmatmul.mubr.msk.bf16.gmra.mxu1 %vm1086_vm2, %v1044_v7 }
 0x197   : > { %5918 = vmatprep.mubr.msk.bf16.mxu1 %vm1086_vm2, %v1045_v10 }
 0x19e   : > { %5919 = vmatmul.mubr.msk.bf16.gmra.mxu1 %vm1086_vm2, %v1046_v13 }
 0x226   : > { %v5892_v30 = vpop.f32.mrf.mxu1 }
 0x227   : > { %v1178_v31 = vadd.f32 %v5892_v30, %v6939_v18 }
 0x228   : > { %v1169_v17 = vpop.f32.mrf.mxu1 }
 0x229   : > { %v1170_v20 = vadd.f32 %v6939_v18, %v1169_v17  ;;  %v1298_v34 = vmax.f32 %v1178_v31, 0.0 }
 0x22a   : > { %v5893_v19 = vpop.f32.mrf.mxu1 }
 0x22b   : > { %v1296_v24 = vmax.f32 %v1170_v20, 0.0  ;;  %v1181_v27 = vadd.f32 %v5893_v19, %v6939_v18 }
 0x22c   : > { %v1172_v21 = vpop.f32.mrf.mxu1 }
 0x22d   : > { %v1173_v22 = vadd.f32 %v6939_v18, %v1172_v21  ;;  %v1299_v32 = vmax.f32 %v1181_v27, 0.0 }
 0x22e   : > { %v5896_v23 = vpop.f32.mrf.mxu1 }
 0x22f   : > { %v1297_v25 = vmax.f32 %v1173_v22, 0.0  ;;  %v1329_v35 = vpack.c.bf16 %v1299_v32, %v1298_v34  ;;  %v1194_v46 = vadd.f32 %v5896_v23, %v6939_v18 }
 0x230   : > { %v1185_v26 = vpop.f32.mrf.mxu1 }
 0x231   : > { %v1328_v28 = vpack.c.bf16 %v1297_v25, %v1296_v24  ;;  %v1186_v39 = vadd.f32 %v6939_v18, %v1185_v26  ;;  %v1302_v49 = vmax.f32 %v1194_v46, 0.0 }
 0x232   : > { %v5897_v29 = vpop.f32.mrf.mxu1 }
 0x233   : > { %5431 = vmatmul.mubr.msk.bf16.vlgmr.msra.gmra.mxu0 %vm1086_vm2, %v1328_v28  ;;  %v1300_v42 = vmax.f32 %v1186_v39, 0.0  ;;  %v1197_v43 = vadd.f32 %v5897_v29, %v6939_v18 }
 0x234   : > { %1494 = vmatprep.mubr.bf16.mxu0 %v6587_v16  ;;  %v1188_v33 = vpop.f32.mrf.mxu1 }
 0x235   : > { %v1189_v36 = vadd.f32 %v6939_v18, %v1188_v33  ;;  %v1303_v47 = vmax.f32 %v1197_v43, 0.0 }
 0x236   : > { %v5900_v38 = vpop.f32.mrf.mxu1 }
 0x237   : > { %v1301_v40 = vmax.f32 %v1189_v36, 0.0  ;;  %v1331_v48 = vpack.c.bf16 %v1303_v47, %v1302_v49  ;;  %v1210_v56 = vadd.f32 %v5900_v38, %v6939_v18 }
 0x238   : > { %v1201_v41 = vpop.f32.mrf.mxu1 }
 0x239   : > { %v1330_v44 = vpack.c.bf16 %v1301_v40, %v1300_v42  ;;  %v1202_v50 = vadd.f32 %v6939_v18, %v1201_v41  ;;  %v1306_v61 = vmax.f32 %v1210_v56, 0.0 }
 0x23a   : > { %v5901_v45 = vpop.f32.mrf.mxu1 }
 0x23b   : > { %5432 = vmatmul.mubr.msk.bf16.gmra.mxu0 %vm1086_vm2, %v1329_v35  ;;  %v1304_v53 = vmax.f32 %v1202_v50, 0.0  ;;  %v1213_v57 = vadd.f32 %v5901_v45, %v6939_v18 }
 0x23c   : > { %1504 = vmatprep.mubr.bf16.mxu0 %v6587_v16  ;;  %v1204_v37 = vpop.f32.mrf.mxu1 }
 0x23d   : > { %v1205_v51 = vadd.f32 %v6939_v18, %v1204_v37  ;;  %v1307_v62 = vmax.f32 %v1213_v57, 0.0 }
 0x23e   : > { %v5904_v52 = vpop.f32.mrf.mxu1 }
 0x23f   : > { %v1305_v54 = vmax.f32 %v1205_v51, 0.0  ;;  %v1333_v63 = vpack.c.bf16 %v1307_v62, %v1306_v61  ;;  %v1226_v6 = vadd.f32 %v5904_v52, %v6939_v18 }
 0x240   : > { %v1217_v55 = vpop.f32.mrf.mxu1 }
 0x241   : > { %v1332_v59 = vpack.c.bf16 %v1305_v54, %v1304_v53  ;;  %v1218_v0 = vadd.f32 %v6939_v18, %v1217_v55  ;;  %v1310_v10 = vmax.f32 %v1226_v6, 0.0  ;;  %v6131_v6 = vld [vmem:[%s7438_s9 + $0x54] ss:$8 sps:$4 sm:$0xff]  }
 0x242   : > { %v5905_v60 = vpop.f32.mrf.mxu1 }
 0x243   : > { %5433 = vmatmul.mubr.msk.bf16.gmra.mxu0 %vm1086_vm2, %v1330_v44  ;;  %v1308_v3 = vmax.f32 %v1218_v0, 0.0  ;;  %v1229_v7 = vadd.f32 %v5905_v60, %v6939_v18 }
 0x244   : > { %1514 = vmatprep.mubr.bf16.mxu0 %v6587_v16  ;;  %v1220_v58 = vpop.f32.mrf.mxu1 }
 0x245   : > { %v1221_v1 = vadd.f32 %v6939_v18, %v1220_v58  ;;  %v1311_v11 = vmax.f32 %v1229_v7, 0.0  ;;  %v6129_v7 = vld [vmem:[%s7438_s9 + $0x50] ss:$8 sps:$4 sm:$0xff]  }
 0x246   : > { %v5908_v2 = vpop.f32.mrf.mxu1 }
 0x247   : > { %v1309_v4 = vmax.f32 %v1221_v1, 0.0  ;;  %v1335_v13 = vpack.c.bf16 %v1311_v11, %v1310_v10  ;;  %v1242_v21 = vadd.f32 %v5908_v2, %v6939_v18  ;;  %v6137_v10 = vld [vmem:[%s7438_s9 + $0x34] ss:$8 sps:$4 sm:$0xff]   ;;  %v6135_v11 = vld [vmem:[%s7438_s9 + $0x30] ss:$8 sps:$4 sm:$0xff]  }
 0x248   : > { %v1233_v5 = vpop.f32.mrf.mxu1 }
 0x249   : > { %v1334_v8 = vpack.c.bf16 %v1309_v4, %v1308_v3  ;;  %v1234_v14 = vadd.f32 %v6939_v18, %v1233_v5  ;;  %v1314_v25 = vmax.f32 %v1242_v21, 0.0  ;;  %v6125_v4 = vld [vmem:[%s7438_s9 + $0x74] ss:$8 sps:$4 sm:$0xff]   ;;  %v6123_v5 = vld [vmem:[%s7438_s9 + $0x70] ss:$8 sps:$4 sm:$0xff]  }
 0x24a   : > { %v5909_v9 = vpop.f32.mrf.mxu1  ;;  %2463 = vmatprep.subr.bf16.mxu1 %v6125_v4  ;;  %v1352_v21 = vld [vmem:[#allocation8] sm:$0x3]  ;;  %v6159_v4 = vld [vmem:[%s7438_s9 + $0xb0] ss:$8 sps:$4 sm:$0xff]  }
 0x24b   : > { %5434 = vmatmul.mubr.msk.bf16.gmra.mxu0 %vm1086_vm2, %v1331_v48  ;;  %v1312_v17 = vmax.f32 %v1234_v14, 0.0  ;;  %v1245_v22 = vadd.f32 %v5909_v9, %v6939_v18  ;;  %2464 = vmatpush1.bf16.msra.mxu1 %v6123_v5  ;;  %v6132_v9 = vld [vmem:[%s7438_s9 + $0x40] ss:$8 sps:$4 sm:$0xff]  }
 0x24c   : > { %1524 = vmatprep.mubr.bf16.mxu0 %v6587_v16  ;;  %v1236_v12 = vpop.f32.mrf.mxu1  ;;  %v6138_v14 = vld [vmem:[%s7438_s9 + $0x20] ss:$8 sps:$4 sm:$0xff]  }
 0x24d   : > { %v1237_v15 = vadd.f32 %v6939_v18, %v1236_v12  ;;  %v1315_v26 = vmax.f32 %v1245_v22, 0.0  ;;  %v1354_v12 = vlaneseq  ;;  %v6144_v22 = vld [vmem:[%s7438_s9] ss:$8 sps:$4 sm:$0xff]  }
 0x24e   : > { %v5912_v30 = vpop.f32.mrf.mxu1 }
 0x24f   : > { %v1313_v19 = vmax.f32 %v1237_v15, 0.0  ;;  %v1337_v28 = vpack.c.bf16 %v1315_v26, %v1314_v25  ;;  %v1258_v36 = vadd.f32 %v5912_v30, %v6939_v18  ;;  %v7040_v15 = vshrl.u32 %v1354_v12, 7  ;;  %v6143_v30 = vld [vmem:[%s7438_s9 + $0x14] ss:$8 sps:$4 sm:$0xff]  }
 0x250   : > { %v1249_v20 = vpop.f32.mrf.mxu1  ;;  %v6149_v25 = vld [vmem:[%s7438_s9 + $0xf4] ss:$8 sps:$4 sm:$0xff]  }
 0x251   : > { %v1336_v23 = vpack.c.bf16 %v1313_v19, %v1312_v17  ;;  %v1250_v29 = vadd.f32 %v6939_v18, %v1249_v20  ;;  %v1318_v41 = vmax.f32 %v1258_v36, 0.0  ;;  %v6141_v17 = vld [vmem:[%s7438_s9 + $0x10] ss:$8 sps:$4 sm:$0xff]   ;;  %v7049_v19 = vsub.s32 0, %v7040_v15  ;;  %v6146_v20 = vld [vmem:[%s7438_s9 + $0x4] ss:$8 sps:$4 sm:$0xff]  }
 0x252   : > { %v5913_v24 = vpop.f32.mrf.mxu1 }
 0x253   : > { %5435 = vmatmul.mubr.msk.bf16.gmra.mxu0 %vm1086_vm2, %v1332_v59  ;;  %v1316_v33 = vmax.f32 %v1250_v29, 0.0  ;;  %v1261_v38 = vadd.f32 %v5913_v24, %v6939_v18  ;;  %v7061_v24 = vrot.slane %v1352_v21, %v7049_v19 }
 0x254   : > { %1534 = vmatprep.mubr.bf16.mxu0 %v6587_v16  ;;  %v1252_v27 = vpop.f32.mrf.mxu1 }
 0x255   : > { %v1253_v31 = vadd.f32 %v6939_v18, %v1252_v27  ;;  %v1319_v42 = vmax.f32 %v1261_v38, 0.0  ;;  %v6147_v27 = vld [vmem:[%s7438_s9 + $0xf0] ss:$8 sps:$4 sm:$0xff]  }
 0x256   : > { %v5916_v32 = vpop.f32.mrf.mxu1 }
 0x257   : > { %v1317_v34 = vmax.f32 %v1253_v31, 0.0  ;;  %v1339_v44 = vpack.c.bf16 %v1319_v42, %v1318_v41  ;;  %v1274_v50 = vadd.f32 %v5916_v32, %v6939_v18  ;;  %v6152_v32 = vld [vmem:[%s7438_s9 + $0xe4] ss:$8 sps:$4 sm:$0xff]   ;;  %v6155_v42 = vld [vmem:[%s7438_s9 + $0xd4] ss:$8 sps:$4 sm:$0xff]  }
 0x258   : > { %v1265_v35 = vpop.f32.mrf.mxu1 }
 0x259   : > { %v1338_v39 = vpack.c.bf16 %v1317_v34, %v1316_v33  ;;  %v1266_v45 = vadd.f32 %v6939_v18, %v1265_v35  ;;  %v1322_v54 = vmax.f32 %v1274_v50, 0.0  ;;  %v6150_v34 = vld [vmem:[%s7438_s9 + $0xe0] ss:$8 sps:$4 sm:$0xff]  }
 0x25a   : > { %v5917_v40 = vpop.f32.mrf.mxu1 }
 0x25b   : > { %5436 = vmatmul.mubr.msk.bf16.gmra.mxu0 %vm1086_vm2, %v1333_v63  ;;  %v1320_v37 = vmax.f32 %v1266_v45, 0.0  ;;  %v1277_v51 = vadd.f32 %v5917_v40, %v6939_v18 }
 0x25c   : > { %1544 = vmatprep.mubr.bf16.mxu0 %v6587_v16  ;;  %v1268_v43 = vpop.f32.mrf.mxu1 }
 0x25d   : > { %v1269_v46 = vadd.f32 %v6939_v18, %v1268_v43  ;;  %v1323_v55 = vmax.f32 %v1277_v51, 0.0 }
 0x25e   : > { %v5920_v47 = vpop.f32.mrf.mxu1 }
 0x25f   : > { %v1321_v49 = vmax.f32 %v1269_v46, 0.0  ;;  %v1341_v57 = vpack.c.bf16 %v1323_v55, %v1322_v54  ;;  %v1290_v58 = vadd.f32 %v5920_v47, %v6939_v18  ;;  %v6156_v54 = vld [vmem:[%s7438_s9 + $0xc0] ss:$8 sps:$4 sm:$0xff]  }
 0x260   : > { %v1281_v48 = vpop.f32.mrf.mxu1 }
 0x261   : > { %v1340_v52 = vpack.c.bf16 %v1321_v49, %v1320_v37  ;;  %v1282_v59 = vadd.f32 %v6939_v18, %v1281_v48  ;;  %v1326_v1 = vmax.f32 %v1290_v58, 0.0 }
 0x262   : > { %v5921_v53 = vpop.f32.mrf.mxu1 }
 0x263   : > { %5437 = vmatmul.mubr.msk.bf16.gmra.mxu0 %vm1086_vm2, %v1334_v8  ;;  %v1324_v61 = vmax.f32 %v1282_v59, 0.0  ;;  %v1293_v63 = vadd.f32 %v5921_v53, %v6939_v18  ;;  %v6134_v8 = vld [vmem:[%s7438_s9 + $0x44] ss:$8 sps:$4 sm:$0xff]  }
 0x264   : > { %1554 = vmatprep.mubr.bf16.mxu0 %v6587_v16  ;;  %v1284_v56 = vpop.f32.mrf.mxu1 }
 0x265   : > { %v1285_v60 = vadd.f32 %v6939_v18, %v1284_v56  ;;  %v1327_v2 = vmax.f32 %v1293_v63, 0.0  ;;  %v6128_v18 = vld [vmem:[%s7438_s9 + $0x64] ss:$8 sps:$4 sm:$0xff]  }
 0x266   : > { %2465 = vmatprep.subr.bf16.mxu1 %v6128_v18 }
 0x267   : > { %v1325_v62 = vmax.f32 %v1285_v60, 0.0  ;;  %v1343_v3 = vpack.c.bf16 %v1327_v2, %v1326_v1  ;;  %v6161_v2 = vld [vmem:[%s7438_s9 + $0xb4] ss:$8 sps:$4 sm:$0xff]  }
 0x269   : > { %v1342_v0 = vpack.c.bf16 %v1325_v62, %v1324_v61 }
 0x26b   : > { %5438 = vmatmul.mubr.msk.bf16.gmra.mxu0 %vm1086_vm2, %v1335_v13  ;;  %v6140_v13 = vld [vmem:[%s7438_s9 + $0x24] ss:$8 sps:$4 sm:$0xff]  }
 0x26c   : > { %1564 = vmatprep.mubr.bf16.mxu0 %v6587_v16 }
 0x273   : > { %5439 = vmatmul.mubr.msk.bf16.gmra.mxu0 %vm1086_vm2, %v1336_v23  ;;  %v7058_v23 = vsub.s32 1, %v7040_v15 }
 0x274   : > { %1574 = vmatprep.mubr.bf16.mxu0 %v6587_v16 }
 0x27b   : > { %5440 = vmatmul.mubr.msk.bf16.gmra.mxu0 %vm1086_vm2, %v1337_v28  ;;  %v7070_v28 = vrot.slane %v1352_v21, %v7058_v23 }
 0x27c   : > { %1584 = vmatprep.mubr.bf16.mxu0 %v6587_v16 }
 0x283   : > { %5441 = vmatmul.mubr.msk.bf16.gmra.mxu0 %vm1086_vm2, %v1338_v39 }
 0x284   : > { %1594 = vmatprep.mubr.bf16.mxu0 %v6587_v16 }
 0x28b   : > { %5442 = vmatmul.mubr.msk.bf16.gmra.mxu0 %vm1086_vm2, %v1339_v44  ;;  %v6153_v44 = vld [vmem:[%s7438_s9 + $0xd0] ss:$8 sps:$4 sm:$0xff]  }
 0x28c   : > { %1604 = vmatprep.mubr.bf16.mxu0 %v6587_v16 }
 0x293   : > { %5443 = vmatmul.mubr.msk.bf16.gmra.mxu0 %vm1086_vm2, %v1340_v52  ;;  %v6158_v52 = vld [vmem:[%s7438_s9 + $0xc4] ss:$8 sps:$4 sm:$0xff]  }
 0x294   : > { %1614 = vmatprep.mubr.bf16.mxu0 %v6587_v16 }
 0x29b   : > { %5444 = vmatmul.mubr.msk.bf16.gmra.mxu0 %vm1086_vm2, %v1341_v57 }
 0x29c   : > { %1624 = vmatprep.mubr.bf16.mxu0 %v6587_v16 }
 0x2a3   : > { %5445 = vmatmul.mubr.msk.bf16.gmra.mxu0 %vm1086_vm2, %v1342_v0 }
 0x2a4   : > { %1634 = vmatprep.mubr.bf16.mxu0 %v6587_v16  ;;  %v6126_v16 = vld [vmem:[%s7438_s9 + $0x60] ss:$8 sps:$4 sm:$0xff]  }
 0x2a5   : > { %2466 = vmatpush1.bf16.msra.mxu1 %v6126_v16 }
 0x2a6   : > { %2467 = vmatprep.subr.bf16.mxu1 %v6131_v6 }
 0x2a9   : > { %2468 = vmatpush1.bf16.msra.mxu1 %v6129_v7 }
 0x2aa   : > { %2469 = vmatprep.subr.bf16.mxu1 %v6134_v8 }
 0x2ab   : > { %5446 = vmatmul.mubr.msk.bf16.gmra.mxu0 %vm1086_vm2, %v1343_v3 }
 0x2ad   : > { %2470 = vmatpush1.bf16.msra.mxu1 %v6132_v9 }
 0x2ae   : > { %2471 = vmatprep.subr.bf16.mxu1 %v6137_v10 }
 0x2b1   : > { %2472 = vmatpush1.bf16.msra.mxu1 %v6135_v11 }
 0x2b2   : > { %2473 = vmatprep.subr.bf16.mxu1 %v6140_v13 }
 0x2b5   : > { %2474 = vmatpush1.bf16.msra.mxu1 %v6138_v14  ;;  %v6164_v14 = vld [vmem:[%s7438_s9 + $0xa4] ss:$8 sps:$4 sm:$0xff]  }
 0x2b6   : > { %2475 = vmatprep.subr.bf16.mxu1 %v6143_v30 }
 0x2b9   : > { %2476 = vmatpush1.bf16.msra.mxu1 %v6141_v17 }
 0x2ba   : > { %2477 = vmatprep.subr.bf16.mxu1 %v6146_v20  ;;  %v6162_v20 = vld [vmem:[%s7438_s9 + $0xa0] ss:$8 sps:$4 sm:$0xff]  }
 0x2bd   : > { %2478 = vmatpush1.bf16.msra.mxu1 %v6144_v22 }
 0x2be   : > { %2479 = vmatprep.subr.bf16.mxu1 %v6149_v25 }
 0x2c1   : > { %2480 = vmatpush2.bf16.msra.mxu1 %v6147_v27 }
 0x2c2   : > { %2481 = vmatprep.subr.bf16.mxu1 %v6152_v32 }
 0x2c5   : > { %2482 = vmatpush2.bf16.msra.mxu1 %v6150_v34 }
 0x2c6   : > { %2483 = vmatprep.subr.bf16.mxu1 %v6155_v42 }
 0x2c9   : > { %2484 = vmatpush2.bf16.msra.mxu1 %v6153_v44  ;;  %v6170_v44 = vld [vmem:[%s7438_s9 + $0x84] ss:$8 sps:$4 sm:$0xff]  }
 0x2ca   : > { %2485 = vmatprep.subr.bf16.mxu1 %v6158_v52 }
 0x2cd   : > { %2486 = vmatpush2.bf16.msra.mxu1 %v6156_v54 }
 0x2ce   : > { %2487 = vmatprep.subr.bf16.mxu1 %v6161_v2 }
 0x2d1   : > { %2488 = vmatpush2.bf16.msra.mxu1 %v6159_v4 }
 0x2d2   : > { %2489 = vmatprep.subr.bf16.mxu1 %v6164_v14 }
 0x2d5   : > { %2490 = vmatpush2.bf16.msra.mxu1 %v6162_v20 }
 0x2f3   : > { %v1486_v26 = vpop.f32.mrf.mxu0 }
 0x2f4   : > { %v1487_v31 = vadd.f32 %v1486_v26, %v7061_v24 }
 0x2f5   : > { %v1488_v29 = vpop.f32.mrf.mxu0 }
 0x2f6   : > { %v1489_v35 = vadd.f32 %v1488_v29, %v7070_v28  ;;  %v1645_v39 = vmax.f32 %v1487_v31, 0.0 }
 0x2f7   : > { %v1490_v33 = vpop.f32.mrf.mxu0 }
 0x2f8   : > { %v1491_v36 = vadd.f32 %v1490_v33, %v7061_v24  ;;  %v1646_v45 = vmax.f32 %v1489_v35, 0.0 }
 0x2f9   : > { %v1492_v38 = vpop.f32.mrf.mxu0 }
 0x2fa   : > { %v1647_v40 = vmax.f32 %v1491_v36, 0.0  ;;  %v1493_v41 = vadd.f32 %v1492_v38, %v7070_v28 }
 0x2fb   : > { %v1496_v43 = vpop.f32.mrf.mxu0 }
 0x2fc   : > { %v1709_v46 = vpack.c.bf16 %v1647_v40, %v1645_v39  ;;  %v1648_v47 = vmax.f32 %v1493_v41, 0.0  ;;  %v1497_v37 = vadd.f32 %v1496_v43, %v7061_v24  ;;  %v6165_v39 = vld [vmem:[%s7438_s9 + $0x90] ss:$8 sps:$4 sm:$0xff]   ;;  %v6167_v43 = vld [vmem:[%s7438_s9 + $0x94] ss:$8 sps:$4 sm:$0xff]  }
 0x2fd   : > { %v1498_v49 = vpop.f32.mrf.mxu0  ;;  %2491 = vmatprep.subr.bf16.mxu1 %v6167_v43 }
 0x2fe   : > { %v1741_v48 = vunpack.i.l.bf16 %v1709_v46  ;;  %v1742_v50 = vunpack.i.h.bf16 %v1709_v46  ;;  %v1710_v51 = vpack.c.bf16 %v1648_v47, %v1646_v45  ;;  %v1649_v60 = vmax.f32 %v1497_v37, 0.0  ;;  %2492 = vmatpush2.bf16.msra.mxu1 %v6165_v39 }
 0x2ff   : > { %v1500_v53 = vpop.f32.mrf.mxu0  ;;  %v1499_v61 = vadd.f32 %v1498_v49, %v7070_v28  ;;  %2493 = vmatprep.subr.bf16.mxu1 %v6170_v44 }
 0x300   : > { %v1743_v55 = vmax.f32 %v1741_v48, %v1742_v50  ;;  %v1751_v56 = vunpack.i.l.bf16 %v1710_v51  ;;  %v1752_v57 = vunpack.i.h.bf16 %v1710_v51  ;;  %v1501_v59 = vadd.f32 %v1500_v53, %v7061_v24 }
 0x301   : > { %v1502_v62 = vpop.f32.mrf.mxu0  ;;  %v1650_v7 = vmax.f32 %v1499_v61, 0.0 }
 0x302   : > { %v1744_v58 = vrot.slane %v1743_v55, 4  ;;  %v1753_v63 = vmax.f32 %v1751_v56, %v1752_v57  ;;  %v1651_v0 = vmax.f32 %v1501_v59, 0.0  ;;  %v1503_v1 = vadd.f32 %v1502_v62, %v7070_v28  ;;  %v6168_v56 = vld [vmem:[%s7438_s9 + $0x80] ss:$8 sps:$4 sm:$0xff]  }
 0x303   : > { %v1506_v3 = vpop.f32.mrf.mxu0  ;;  %2494 = vmatpush2.bf16.msra.mxu1 %v6168_v56 }
 0x304   : > { %v1745_v5 = vmax.f32 %v1743_v55, %v1744_v58  ;;  %v1754_v18 = vrot.slane %v1753_v63, 4  ;;  %v1711_v16 = vpack.c.bf16 %v1651_v0, %v1649_v60  ;;  %v1652_v6 = vmax.f32 %v1503_v1, 0.0 }
 0x305   : > { %v1507_v8 = vadd.f32 %v1506_v3, %v7061_v24  ;;  %v1508_v9 = vpop.f32.mrf.mxu0 }
 0x306   : > { %v1746_v10 = vrot.slane %v1745_v5, 2  ;;  %v1755_v11 = vmax.f32 %v1753_v63, %v1754_v18  ;;  %v1761_v12 = vunpack.i.l.bf16 %v1711_v16  ;;  %v1762_v13 = vunpack.i.h.bf16 %v1711_v16 }
 0x307   : > { %v1712_v30 = vpack.c.bf16 %v1652_v6, %v1650_v7  ;;  %v1510_v17 = vpop.f32.mrf.mxu0  ;;  %v1653_v31 = vmax.f32 %v1507_v8, 0.0  ;;  %v1509_v32 = vadd.f32 %v1508_v9, %v7070_v28 }
 0x308   : > { %v1747_v21 = vmax.f32 %v1745_v5, %v1746_v10  ;;  %v1756_v22 = vrot.slane %v1755_v11, 2  ;;  %v1763_v25 = vmax.f32 %v1761_v12, %v1762_v13  ;;  %v1511_v26 = vadd.f32 %v1510_v17, %v7061_v24  ;;  %v6171_v12 = vld [vmem:[#allocation13 + $0xe8] ss:$16 sps:$4 sm:$0xff]   ;;  %v6173_v13 = vld [vmem:[#allocation13 + $0xec] ss:$16 sps:$4 sm:$0xff]  }
 0x309   : > { %v1771_v27 = vunpack.i.l.bf16 %v1712_v30  ;;  %v1772_v29 = vunpack.i.h.bf16 %v1712_v30  ;;  %v1512_v33 = vpop.f32.mrf.mxu0  ;;  %v1654_v48 = vmax.f32 %v1509_v32, 0.0  ;;  %2981 = vmatprep.subr.bf16.mxu0 %v6173_v13 }
 0x30a   : > { %v1748_v34 = vrot.slane %v1747_v21, 1  ;;  %v1757_v35 = vmax.f32 %v1755_v11, %v1756_v22  ;;  %v1764_v36 = vrot.slane %v1763_v25, 4  ;;  %v1655_v38 = vmax.f32 %v1511_v26, 0.0  ;;  %2982 = vmatpush1.bf16.msra.mxu0 %v6171_v12 }
 0x30b   : > { %v1773_v40 = vmax.f32 %v1771_v27, %v1772_v29  ;;  %v1513_v41 = vadd.f32 %v1512_v33, %v7070_v28  ;;  %v1516_v42 = vpop.f32.mrf.mxu0 }
 0x30c   : > { %v1749_v45 = vmax.f32 %v1747_v21, %v1748_v34  ;;  %v1758_v46 = vrot.slane %v1757_v35, 1  ;;  %v1765_v47 = vmax.f32 %v1763_v25, %v1764_v36  ;;  %v1713_v37 = vpack.c.bf16 %v1655_v38, %v1653_v31  ;;  %v6176_v21 = vld [vmem:[#allocation13 + $0xcc] ss:$16 sps:$4 sm:$0xff]  }
 0x30d   : > { %v1774_v49 = vrot.slane %v1773_v40, 4  ;;  %v1656_v50 = vmax.f32 %v1513_v41, 0.0  ;;  %v1518_v51 = vpop.f32.mrf.mxu0  ;;  %v1517_v55 = vadd.f32 %v1516_v42, %v7061_v24  ;;  %2983 = vmatprep.subr.bf16.mxu0 %v6176_v21  ;;  %v6179_v42 = vld [vmem:[#allocation13 + $0xac] ss:$16 sps:$4 sm:$0xff]  }
 0x30e   : > { %v1759_v52 = vmax.f32 %v1757_v35, %v1758_v46  ;;  %v1766_v53 = vrot.slane %v1765_v47, 2  ;;  %v1781_v54 = vunpack.i.l.bf16 %v1713_v37  ;;  %v1782_v59 = vunpack.i.h.bf16 %v1713_v37  ;;  %v6174_v35 = vld [vmem:[#allocation13 + $0xc8] ss:$16 sps:$4 sm:$0xff]  }
 0x30f   : > { %v1775_v57 = vmax.f32 %v1773_v40, %v1774_v49  ;;  %v1714_v60 = vpack.c.bf16 %v1656_v50, %v1654_v48  ;;  %v1520_v61 = vpop.f32.mrf.mxu0  ;;  %v1750_v62 = vpack.i.bf16 %v1749_v45, %v1749_v45  ;;  %v1519_v63 = vadd.f32 %v1518_v51, %v7070_v28  ;;  %2984 = vmatpush1.bf16.msra.mxu0 %v6174_v35  ;;  %v6183_v35 = vld [vmem:[#allocation13 + $0x68] ss:$16 sps:$4 sm:$0xff]  }
 0x310   : > { %v1767_v58 = vmax.f32 %v1765_v47, %v1766_v53  ;;  %v1783_v1 = vmax.f32 %v1781_v54, %v1782_v59  ;;  %v1760_v5 = vpack.i.bf16 %v1759_v52, %v1759_v52  ;;  %v1657_v16 = vmax.f32 %v1517_v55, 0.0  ;;  %v6177_v55 = vld [vmem:[#allocation13 + $0xa8] ss:$16 sps:$4 sm:$0xff]   ;;  %2985 = vmatprep.subr.bf16.mxu0 %v6179_v42  ;;  %v6188_v42 = vld [vmem:[#allocation13 + $0x4c] ss:$16 sps:$4 sm:$0xff]  }
 0x311   : > { %v1776_v0 = vrot.slane %v1775_v57, 2  ;;  %v1791_v2 = vunpack.i.l.bf16 %v1714_v60  ;;  %v1792_v3 = vunpack.i.h.bf16 %v1714_v60  ;;  %v1522_v4 = vpop.f32.mrf.mxu0  ;;  %v1521_v6 = vadd.f32 %v1520_v61, %v7061_v24 }
 0x312   : > { %v1768_v18 = vrot.slane %v1767_v58, 1  ;;  %v1784_v8 = vrot.slane %v1783_v1, 4  ;;  %v1523_v10 = vadd.f32 %v1522_v4, %v7070_v28  ;;  %v2232_v14 = vunpack.c.l.b16 %v1750_v62  ;;  %v6182_v62 = vld [vmem:[#allocation13 + $0x8c] ss:$16 sps:$4 sm:$0xff]  }
 0x313   : > { %v1777_v7 = vmax.f32 %v1775_v57, %v1776_v0  ;;  %v1793_v9 = vmax.f32 %v1791_v2, %v1792_v3  ;;  %v1526_v11 = vpop.f32.mrf.mxu0  ;;  %v1658_v17 = vmax.f32 %v1519_v63, 0.0  ;;  %v1659_v20 = vmax.f32 %v1521_v6, 0.0  ;;  %2986 = vmatpush1.bf16.msra.mxu0 %v6177_v55 }
 0x314   : > { %v1769_v30 = vmax.f32 %v1767_v58, %v1768_v18  ;;  %v1785_v25 = vmax.f32 %v1783_v1, %v1784_v8  ;;  %v1660_v27 = vmax.f32 %v1523_v10, 0.0  ;;  %v2233_v31 = vunpack.c.l.b16 %v1760_v5  ;;  %v6197_v58 = vld [vmem:[#allocation13 + $0xe4] ss:$16 sps:$4 sm:$0xff]   ;;  %2987 = vmatprep.subr.bf16.mxu0 %v6182_v62 }
 0x315   : > { %v1778_v22 = vrot.slane %v1777_v7, 1  ;;  %v1794_v26 = vrot.slane %v1793_v9, 4  ;;  %v1528_v29 = vpop.f32.mrf.mxu0  ;;  %v1715_v33 = vpack.c.bf16 %v1659_v20, %v1657_v16  ;;  %v1527_v34 = vadd.f32 %v1526_v11, %v7061_v24  ;;  %2938 = vmatprep.subr.bf16.mxu1 %v6197_v58 }
 0x316   : > { %v1770_v32 = vpack.i.bf16 %v1769_v30, %v1769_v30  ;;  %v1786_v38 = vrot.slane %v1785_v25, 2  ;;  %v1716_v40 = vpack.c.bf16 %v1660_v27, %v1658_v17  ;;  %v1529_v46 = vadd.f32 %v1528_v29, %v7070_v28 }
 0x317   : > { %v1779_v36 = vmax.f32 %v1777_v7, %v1778_v22  ;;  %v1795_v39 = vmax.f32 %v1793_v9, %v1794_v26  ;;  %v1530_v41 = vpop.f32.mrf.mxu0  ;;  %v1801_v44 = vunpack.i.l.bf16 %v1715_v33  ;;  %v1802_v45 = vunpack.i.h.bf16 %v1715_v33  ;;  %v6180_v9 = vld [vmem:[#allocation13 + $0x88] ss:$16 sps:$4 sm:$0xff]  }
 0x318   : > { %v2234_v43 = vunpack.c.l.b16 %v1770_v32  ;;  %v1787_v37 = vmax.f32 %v1785_v25, %v1786_v38  ;;  %v1811_v48 = vunpack.i.l.bf16 %v1716_v40  ;;  %v1812_v53 = vunpack.i.h.bf16 %v1716_v40  ;;  %2988 = vmatpush1.bf16.msra.mxu0 %v6180_v9  ;;  %v6194_v9 = vld [vmem:[#allocation13 + $0xc] ss:$16 sps:$4 sm:$0xff]  }
 0x319   : > { %v1780_v47 = vpack.i.bf16 %v1779_v36, %v1779_v36  ;;  %v1796_v49 = vrot.slane %v1795_v39, 2  ;;  %v1532_v50 = vpop.f32.mrf.mxu0  ;;  %v1803_v52 = vmax.f32 %v1801_v44, %v1802_v45  ;;  %v1531_v54 = vadd.f32 %v1530_v41, %v7061_v24 }
 0x31a   : > { %v2265_v51 = vsel %vm2264_vm3, %v2234_v43, %v2232_v14  ;;  %v1788_v57 = vrot.slane %v1787_v37, 1  ;;  %v1533_v60 = vadd.f32 %v1532_v50, %v7070_v28  ;;  %v1813_v63 = vmax.f32 %v1811_v48, %v1812_v53  ;;  %v6185_v14 = vld [vmem:[#allocation13 + $0x6c] ss:$16 sps:$4 sm:$0xff]  }
 0x31b   : > { %v2235_v56 = vunpack.c.l.b16 %v1780_v47  ;;  %v1797_v59 = vmax.f32 %v1795_v39, %v1796_v49  ;;  %v1536_v61 = vpop.f32.mrf.mxu0  ;;  %v1661_v0 = vmax.f32 %v1527_v34, 0.0  ;;  %v1662_v1 = vmax.f32 %v1529_v46, 0.0  ;;  %2989 = vmatprep.subr.bf16.mxu0 %v6185_v14 }
 0x31c   : > { %v1663_v2 = vmax.f32 %v1531_v54, 0.0  ;;  %v1789_v3 = vmax.f32 %v1787_v37, %v1788_v57  ;;  %v1664_v5 = vmax.f32 %v1533_v60, 0.0  ;;  %v1804_v6 = vrot.slane %v1803_v52, 4  ;;  %2990 = vmatpush1.bf16.msra.mxu0 %v6183_v35  ;;  %v6186_v54 = vld [vmem:[#allocation13 + $0x48] ss:$16 sps:$4 sm:$0xff]  }
 0x31d   : > { %v1798_v4 = vrot.slane %v1797_v59, 1  ;;  %v1538_v18 = vpop.f32.mrf.mxu0  ;;  %v2278_v16 = vsel %vm2264_vm3, %v2235_v56, %v2233_v31  ;;  %v1814_v7 = vrot.slane %v1813_v63, 4  ;;  %v1537_v21 = vadd.f32 %v1536_v61, %v7061_v24  ;;  %2991 = vmatprep.subr.bf16.mxu0 %v6188_v42 }
 0x31e   : > { %v1717_v8 = vpack.c.bf16 %v1663_v2, %v1661_v0  ;;  %v1790_v10 = vpack.i.bf16 %v1789_v3, %v1789_v3  ;;  %v1718_v12 = vpack.c.bf16 %v1664_v5, %v1662_v1  ;;  %v1805_v31 = vmax.f32 %v1803_v52, %v1804_v6  ;;  %v6189_v5 = vld [vmem:[#allocation13 + $0x28] ss:$16 sps:$4 sm:$0xff]  }
 0x31f   : > { %v1799_v11 = vmax.f32 %v1797_v59, %v1798_v4  ;;  %v1540_v13 = vpop.f32.mrf.mxu0  ;;  %v1815_v30 = vmax.f32 %v1813_v63, %v1814_v7  ;;  %v1539_v34 = vadd.f32 %v1538_v18, %v7070_v28  ;;  %v1665_v47 = vmax.f32 %v1537_v21, 0.0  ;;  %v6191_v59 = vld [vmem:[#allocation13 + $0x2c] ss:$16 sps:$4 sm:$0xff]  }
 0x320   : > { %v1821_v17 = vunpack.i.l.bf16 %v1717_v8  ;;  %v1822_v20 = vunpack.i.h.bf16 %v1717_v8  ;;  %v2236_v22 = vunpack.c.l.b16 %v1790_v10  ;;  %v1831_v26 = vunpack.i.l.bf16 %v1718_v12  ;;  %2992 = vmatpush1.bf16.msra.mxu0 %v6186_v54 }
 0x321   : > { %v1800_v25 = vpack.i.bf16 %v1799_v11, %v1799_v11  ;;  %v1832_v27 = vunpack.i.h.bf16 %v1718_v12  ;;  %v1542_v29 = vpop.f32.mrf.mxu0  ;;  %v1816_v32 = vrot.slane %v1815_v30, 2  ;;  %v1541_v40 = vadd.f32 %v1540_v13, %v7061_v24  ;;  %2993 = vmatprep.subr.bf16.mxu0 %v6191_v59 }
 0x322   : > { %v1823_v33 = vmax.f32 %v1821_v17, %v1822_v20  ;;  %v7139_v36 = vsel %vm2266_vm4, %v2236_v22, %v2265_v51  ;;  %v1543_v45 = vadd.f32 %v1542_v29, %v7070_v28  ;;  %v1666_v52 = vmax.f32 %v1539_v34, 0.0  ;;  %v6200_v34 = vld [vmem:[#allocation13 + $0x1ec] ss:$16 sps:$4 sm:$0xff]  }
 0x323   : > { %v2237_v38 = vunpack.c.l.b16 %v1800_v25  ;;  %v1833_v39 = vmax.f32 %v1831_v26, %v1832_v27  ;;  %v1546_v41 = vpop.f32.mrf.mxu0  ;;  %v1817_v43 = vmax.f32 %v1815_v30, %v1816_v32  ;;  %v1667_v37 = vmax.f32 %v1541_v40, 0.0  ;;  %v6192_v26 = vld [vmem:[#allocation13 + $0x8] ss:$16 sps:$4 sm:$0xff]  }
 0x324   : > { %v1824_v44 = vrot.slane %v1823_v33, 4  ;;  %v1668_v53 = vmax.f32 %v1543_v45, 0.0  ;;  %v1806_v55 = vrot.slane %v1805_v31, 2  ;;  %v1547_v0 = vadd.f32 %v1546_v41, %v7061_v24  ;;  %2994 = vmatpush1.bf16.msra.mxu0 %v6189_v5 }
 0x325   : > { %v1834_v46 = vrot.slane %v1833_v39, 4  ;;  %v1548_v49 = vpop.f32.mrf.mxu0  ;;  %v7144_v48 = vsel %vm2266_vm4, %v2237_v38, %v2278_v16  ;;  %v1818_v50 = vrot.slane %v1817_v43, 1  ;;  %v1719_v56 = vpack.c.bf16 %v1667_v37, %v1665_v47  ;;  %2995 = vmatprep.subr.bf16.mxu0 %v6194_v9  ;;  %v6198_v47 = vld [vmem:[#allocation13 + $0x1e8] ss:$16 sps:$4 sm:$0xff]  }
 0x326   : > { %v1825_v51 = vmax.f32 %v1823_v33, %v1824_v44  ;;  %v1720_v61 = vpack.c.bf16 %v1668_v53, %v1666_v52  ;;  %v1549_v4 = vadd.f32 %v1548_v49, %v7070_v28  ;;  %v1807_v18 = vmax.f32 %v1805_v31, %v1806_v55  ;;  %v6209_v53 = vld [vmem:[#allocation13 + $0x1cc] ss:$16 sps:$4 sm:$0xff]  }
 0x327   : > { %v1550_v57 = vpop.f32.mrf.mxu0  ;;  %v1835_v60 = vmax.f32 %v1833_v39, %v1834_v46  ;;  %v1819_v62 = vmax.f32 %v1817_v43, %v1818_v50  ;;  %v1841_v58 = vunpack.i.l.bf16 %v1719_v56  ;;  %v1842_v63 = vunpack.i.h.bf16 %v1719_v56 }
 0x328   : > { %v1826_v2 = vrot.slane %v1825_v51, 2  ;;  %v1851_v3 = vunpack.i.l.bf16 %v1720_v61  ;;  %v1852_v6 = vunpack.i.h.bf16 %v1720_v61  ;;  %v1551_v7 = vadd.f32 %v1550_v57, %v7061_v24  ;;  %2996 = vmatpush1.bf16.msra.mxu0 %v6192_v26  ;;  %v6227_v26 = vld [vmem:[#allocation13 + $0x18c] ss:$16 sps:$4 sm:$0xff]  }
 0x329   : > { %v1552_v1 = vpop.f32.mrf.mxu0  ;;  %v1843_v16 = vmax.f32 %v1841_v58, %v1842_v63  ;;  %v1836_v10 = vrot.slane %v1835_v60, 2  ;;  %v1820_v12 = vpack.i.bf16 %v1819_v62, %v1819_v62  ;;  %v1669_v14 = vmax.f32 %v1547_v0, 0.0  ;;  %2997 = vmatprep.subr.bf16.mxu0 %v6200_v34 }
 0x32a   : > { %v1553_v11 = vadd.f32 %v1552_v1, %v7070_v28  ;;  %v1853_v13 = vmax.f32 %v1851_v3, %v1852_v6  ;;  %v1671_v30 = vmax.f32 %v1551_v7, 0.0  ;;  %v1827_v20 = vmax.f32 %v1825_v51, %v1826_v2  ;;  %v6207_v2 = vld [vmem:[#allocation13 + $0x1c8] ss:$16 sps:$4 sm:$0xff]   ;;  %v6218_v6 = vld [vmem:[#allocation13 + $0x1ac] ss:$16 sps:$4 sm:$0xff]  }
 0x32b   : > { %v1556_v8 = vpop.f32.mrf.mxu0  ;;  %v1844_v21 = vrot.slane %v1843_v16, 4  ;;  %v1670_v22 = vmax.f32 %v1549_v4, 0.0  ;;  %v1808_v27 = vrot.slane %v1807_v18, 1  ;;  %v1837_v35 = vmax.f32 %v1835_v60, %v1836_v10 }
 0x32c   : > { %v1672_v25 = vmax.f32 %v1553_v11, 0.0  ;;  %v1854_v29 = vrot.slane %v1853_v13, 4  ;;  %v1721_v31 = vpack.c.bf16 %v1671_v30, %v1669_v14  ;;  %v1557_v32 = vadd.f32 %v1556_v8, %v7061_v24  ;;  %2998 = vmatpush2.bf16.msra.mxu0 %v6198_v47 }
 0x32d   : > { %v1558_v17 = vpop.f32.mrf.mxu0  ;;  %v2239_v40 = vunpack.c.l.b16 %v1820_v12  ;;  %v1828_v43 = vrot.slane %v1827_v20, 1  ;;  %v1845_v44 = vmax.f32 %v1843_v16, %v1844_v21  ;;  %v1809_v37 = vmax.f32 %v1807_v18, %v1808_v27  ;;  %2999 = vmatprep.subr.bf16.mxu0 %v6209_v53 }
 0x32e   : > { %v1722_v38 = vpack.c.bf16 %v1672_v25, %v1670_v22  ;;  %v1861_v41 = vunpack.i.l.bf16 %v1721_v31  ;;  %v1862_v45 = vunpack.i.h.bf16 %v1721_v31  ;;  %v1559_v46 = vadd.f32 %v1558_v17, %v7070_v28  ;;  %v6216_v17 = vld [vmem:[#allocation13 + $0x1a8] ss:$16 sps:$4 sm:$0xff]  }
 0x32f   : > { %v1560_v33 = vpop.f32.mrf.mxu0  ;;  %v1855_v49 = vmax.f32 %v1853_v13, %v1854_v29  ;;  %v1673_v50 = vmax.f32 %v1557_v32, 0.0  ;;  %v1838_v54 = vrot.slane %v1837_v35, 1  ;;  %v7156_v62 = vsel %vm2268_vm5, %v2239_v40, %v7144_v48 }
 0x330   : > { %v1561_v39 = vadd.f32 %v1560_v33, %v7061_v24  ;;  %v1871_v55 = vunpack.i.l.bf16 %v1722_v38  ;;  %v1872_v56 = vunpack.i.h.bf16 %v1722_v38  ;;  %v1863_v59 = vmax.f32 %v1861_v41, %v1862_v45  ;;  %3000 = vmatpush2.bf16.msra.mxu0 %v6207_v2 }
 0x331   : > { %v1562_v42 = vpop.f32.mrf.mxu0  ;;  %v1829_v58 = vmax.f32 %v1827_v20, %v1828_v43  ;;  %v1846_v63 = vrot.slane %v1845_v44, 2  ;;  %v1674_v0 = vmax.f32 %v1559_v46, 0.0  ;;  %v1810_v3 = vpack.i.bf16 %v1809_v37, %v1809_v37  ;;  %3001 = vmatprep.subr.bf16.mxu0 %v6218_v6 }
 0x332   : > { %v1675_v51 = vmax.f32 %v1561_v39, 0.0  ;;  %v1563_v57 = vadd.f32 %v1562_v42, %v7070_v28  ;;  %v1856_v4 = vrot.slane %v1855_v49, 2  ;;  %v7158_v7 = vmax.f32 %v1837_v35, %v1838_v54 }
 0x333   : > { %v1566_v52 = vpop.f32.mrf.mxu0  ;;  %v1873_v8 = vmax.f32 %v1871_v55, %v1872_v56  ;;  %v1864_v10 = vrot.slane %v1863_v59, 4  ;;  %v1830_v13 = vpack.i.bf16 %v1829_v58, %v1829_v58  ;;  %v1847_v14 = vmax.f32 %v1845_v44, %v1846_v63  ;;  %v6225_v44 = vld [vmem:[#allocation13 + $0x188] ss:$16 sps:$4 sm:$0xff]  }
 0x334   : > { %v1723_v60 = vpack.c.bf16 %v1675_v51, %v1673_v50  ;;  %v1676_v1 = vmax.f32 %v1563_v57, 0.0  ;;  %v1567_v48 = vadd.f32 %v1566_v52, %v7061_v24  ;;  %v7162_v20 = vunpack.c.l.b16 %v1810_v3  ;;  %3002 = vmatpush2.bf16.msra.mxu0 %v6216_v17  ;;  %v6236_v50 = vld [vmem:[#allocation13 + $0x16c] ss:$16 sps:$4 sm:$0xff]  }
 0x335   : > { %v1568_v61 = vpop.f32.mrf.mxu0  ;;  %v1857_v21 = vmax.f32 %v1855_v49, %v1856_v4  ;;  %v1840_v27 = vpack.i.bf16 %v7158_v7, %v7158_v7  ;;  %v1874_v29 = vrot.slane %v1873_v8, 4  ;;  %v1865_v33 = vmax.f32 %v1863_v59, %v1864_v10  ;;  %3003 = vmatprep.subr.bf16.mxu0 %v6227_v26 }
 0x336   : > { %v1881_v5 = vunpack.i.l.bf16 %v1723_v60  ;;  %v1882_v18 = vunpack.i.h.bf16 %v1723_v60  ;;  %v1724_v9 = vpack.c.bf16 %v1676_v1, %v1674_v0  ;;  %v1569_v22 = vadd.f32 %v1568_v61, %v7070_v28  ;;  %v6234_v1 = vld [vmem:[#allocation13 + $0x168] ss:$16 sps:$4 sm:$0xff]  }
 0x337   : > { %v1570_v16 = vpop.f32.mrf.mxu0  ;;  %v1677_v31 = vmax.f32 %v1567_v48, 0.0  ;;  %v7168_v40 = vunpack.c.l.b16 %v1830_v13  ;;  %v1848_v41 = vrot.slane %v1847_v14, 1  ;;  %v1858_v45 = vrot.slane %v1857_v21, 1 }
 0x338   : > { %v1571_v11 = vadd.f32 %v1570_v16, %v7061_v24  ;;  %v1883_v30 = vmax.f32 %v1881_v5, %v1882_v18  ;;  %v1891_v34 = vunpack.i.l.bf16 %v1724_v9  ;;  %v1892_v35 = vunpack.i.h.bf16 %v1724_v9  ;;  %3004 = vmatpush2.bf16.msra.mxu0 %v6225_v44 }
 0x339   : > { %v1572_v12 = vpop.f32.mrf.mxu0  ;;  %v1678_v46 = vmax.f32 %v1569_v22, 0.0  ;;  %v1875_v51 = vmax.f32 %v1873_v8, %v1874_v29  ;;  %v1866_v55 = vrot.slane %v1865_v33, 2  ;;  %v1849_v61 = vmax.f32 %v1847_v14, %v1848_v41  ;;  %3005 = vmatprep.subr.bf16.mxu0 %v6236_v50 }
 0x33a   : > { %v1679_v32 = vmax.f32 %v1571_v11, 0.0  ;;  %v1573_v38 = vadd.f32 %v1572_v12, %v7070_v28  ;;  %v1884_v42 = vrot.slane %v1883_v30, 4  ;;  %v1893_v56 = vmax.f32 %v1891_v34, %v1892_v35 }
 0x33b   : > { %v1576_v25 = vpop.f32.mrf.mxu0  ;;  %v1859_v16 = vmax.f32 %v1857_v21, %v1858_v45  ;;  %v1876_v6 = vrot.slane %v1875_v51, 2  ;;  %v1867_v48 = vmax.f32 %v1865_v33, %v1866_v55  ;;  %v1850_v14 = vpack.i.bf16 %v1849_v61, %v1849_v61 }
 0x33c   : > { %v1725_v43 = vpack.c.bf16 %v1679_v32, %v1677_v31  ;;  %v1680_v47 = vmax.f32 %v1573_v38, 0.0  ;;  %v1577_v37 = vadd.f32 %v1576_v25, %v7061_v24  ;;  %v1885_v58 = vmax.f32 %v1883_v30, %v1884_v42  ;;  %3006 = vmatpush2.bf16.msra.mxu0 %v6234_v1 }
 0x33d   : > { %v1578_v39 = vpop.f32.mrf.mxu0  ;;  %v1894_v10 = vrot.slane %v1893_v56, 4  ;;  %v1860_v21 = vpack.i.bf16 %v1859_v16, %v1859_v16  ;;  %v1868_v38 = vrot.slane %v1867_v48, 1 }
 0x33e   : > { %v1901_v52 = vunpack.i.l.bf16 %v1725_v43  ;;  %v1902_v53 = vunpack.i.h.bf16 %v1725_v43  ;;  %v1579_v54 = vadd.f32 %v1578_v39, %v7070_v28  ;;  %v1726_v57 = vpack.c.bf16 %v1680_v47, %v1678_v46 }
 0x33f   : > { %v1580_v49 = vpop.f32.mrf.mxu0  ;;  %v1681_v4 = vmax.f32 %v1577_v37, 0.0  ;;  %v1886_v30 = vrot.slane %v1885_v58, 2  ;;  %v1877_v39 = vmax.f32 %v1875_v51, %v1876_v6  ;;  %v1895_v41 = vmax.f32 %v1893_v56, %v1894_v10 }
 0x340   : > { %v1581_v59 = vadd.f32 %v1580_v49, %v7061_v24  ;;  %v1903_v63 = vmax.f32 %v1901_v52, %v1902_v53  ;;  %v1911_v2 = vunpack.i.l.bf16 %v1726_v57  ;;  %v1912_v3 = vunpack.i.h.bf16 %v1726_v57 }
 0x341   : > { %v1582_v60 = vpop.f32.mrf.mxu0  ;;  %v1682_v8 = vmax.f32 %v1579_v54, 0.0  ;;  %v1887_v37 = vmax.f32 %v1885_v58, %v1886_v30  ;;  %v7181_v51 = vunpack.c.l.b16 %v1840_v27  ;;  %v7183_v56 = vunpack.c.l.b16 %v1850_v14 }
 0x342   : > { %v1583_v0 = vadd.f32 %v1582_v60, %v7070_v28  ;;  %v1683_v5 = vmax.f32 %v1581_v59, 0.0  ;;  %v1913_v11 = vmax.f32 %v1911_v2, %v1912_v3  ;;  %v1904_v17 = vrot.slane %v1903_v63, 4 }
 0x343   : > { %v1586_v18 = vpop.f32.mrf.mxu0  ;;  %v7185_v60 = vmax.f32 %v1867_v48, %v1868_v38  ;;  %v1878_v3 = vrot.slane %v1877_v39, 1  ;;  %v7187_v16 = vunpack.c.l.b16 %v1860_v21  ;;  %v1888_v6 = vrot.slane %v1887_v37, 1 }
 0x344   : > { %v1684_v9 = vmax.f32 %v1583_v0, 0.0  ;;  %v1727_v12 = vpack.c.bf16 %v1683_v5, %v1681_v4  ;;  %v1914_v25 = vrot.slane %v1913_v11, 4  ;;  %v1587_v31 = vadd.f32 %v1586_v18, %v7061_v24 }
 0x345   : > { %v1588_v13 = vpop.f32.mrf.mxu0  ;;  %v1905_v44 = vmax.f32 %v1903_v63, %v1904_v17  ;;  %v1896_v7 = vrot.slane %v1895_v41, 2 }
 0x346   : > { %v1728_v22 = vpack.c.bf16 %v1684_v9, %v1682_v8  ;;  %v1921_v26 = vunpack.i.l.bf16 %v1727_v12  ;;  %v1922_v29 = vunpack.i.h.bf16 %v1727_v12  ;;  %v1589_v33 = vadd.f32 %v1588_v13, %v7070_v28 }
 0x347   : > { %v1590_v32 = vpop.f32.mrf.mxu0  ;;  %v1915_v49 = vmax.f32 %v1913_v11, %v1914_v25  ;;  %v1685_v52 = vmax.f32 %v1587_v31, 0.0  ;;  %v1906_v58 = vrot.slane %v1905_v44, 2  ;;  %v1870_v13 = vpack.i.bf16 %v7185_v60, %v7185_v60 }
 0x348   : > { %v1931_v34 = vunpack.i.l.bf16 %v1728_v22  ;;  %v1932_v35 = vunpack.i.h.bf16 %v1728_v22  ;;  %v1923_v42 = vmax.f32 %v1921_v26, %v1922_v29  ;;  %v1591_v46 = vadd.f32 %v1590_v32, %v7061_v24 }
 0x349   : > { %v1592_v43 = vpop.f32.mrf.mxu0  ;;  %v1686_v55 = vmax.f32 %v1589_v33, 0.0  ;;  %v1916_v4 = vrot.slane %v1915_v49, 2  ;;  %v1907_v14 = vmax.f32 %v1905_v44, %v1906_v58  ;;  %v1889_v32 = vmax.f32 %v1887_v37, %v1888_v6 }
 0x34a   : > { %v1933_v45 = vmax.f32 %v1931_v34, %v1932_v35  ;;  %v1593_v47 = vadd.f32 %v1592_v43, %v7070_v28  ;;  %v1924_v50 = vrot.slane %v1923_v42, 4  ;;  %v1687_v57 = vmax.f32 %v1591_v46, 0.0 }
 0x34b   : > { %v1596_v53 = vpop.f32.mrf.mxu0  ;;  %v1917_v22 = vmax.f32 %v1915_v49, %v1916_v4  ;;  %v1897_v21 = vmax.f32 %v1895_v41, %v1896_v7  ;;  %v1908_v49 = vrot.slane %v1907_v14, 1  ;;  %v1890_v60 = vpack.i.bf16 %v1889_v32, %v1889_v32 }
 0x34c   : > { %v1934_v54 = vrot.slane %v1933_v45, 4  ;;  %v1688_v59 = vmax.f32 %v1593_v47, 0.0  ;;  %v1925_v61 = vmax.f32 %v1923_v42, %v1924_v50  ;;  %v1729_v1 = vpack.c.bf16 %v1687_v57, %v1685_v52 }
 0x34d   : > { %v1598_v63 = vpop.f32.mrf.mxu0  ;;  %v1597_v11 = vadd.f32 %v1596_v53, %v7061_v24  ;;  %v7195_v50 = vmax.f32 %v1877_v39, %v1878_v3  ;;  %v1918_v52 = vrot.slane %v1917_v22, 1  ;;  %v1909_v4 = vmax.f32 %v1907_v14, %v1908_v49 }
 0x34e   : > { %v1935_v0 = vmax.f32 %v1933_v45, %v1934_v54  ;;  %v1730_v2 = vpack.c.bf16 %v1688_v59, %v1686_v55  ;;  %v1926_v5 = vrot.slane %v1925_v61, 2  ;;  %v1941_v27 = vunpack.i.l.bf16 %v1729_v1 }
 0x34f   : > { %v1600_v18 = vpop.f32.mrf.mxu0  ;;  %v1942_v8 = vunpack.i.h.bf16 %v1729_v1  ;;  %v1599_v17 = vadd.f32 %v1598_v63, %v7070_v28  ;;  %v1689_v42 = vmax.f32 %v1597_v11, 0.0  ;;  %v7203_v11 = vunpack.c.l.b16 %v1890_v60 }
 0x350   : > { %v1936_v9 = vrot.slane %v1935_v0, 2  ;;  %v1951_v10 = vunpack.i.l.bf16 %v1730_v2  ;;  %v1952_v48 = vunpack.i.h.bf16 %v1730_v2  ;;  %v1927_v25 = vmax.f32 %v1925_v61, %v1926_v5 }
 0x351   : > { %v1602_v12 = vpop.f32.mrf.mxu0  ;;  %v1943_v30 = vmax.f32 %v1941_v27, %v1942_v8  ;;  %v1601_v29 = vadd.f32 %v1600_v18, %v7061_v24  ;;  %v1690_v46 = vmax.f32 %v1599_v17, 0.0  ;;  %v1919_v5 = vmax.f32 %v1917_v22, %v1918_v52 }
 0x352   : > { %v1953_v26 = vmax.f32 %v1951_v10, %v1952_v48  ;;  %v1603_v35 = vadd.f32 %v1602_v12, %v7070_v28  ;;  %v1937_v33 = vmax.f32 %v1935_v0, %v1936_v9  ;;  %v1928_v53 = vrot.slane %v1927_v25, 1 }
 0x353   : > { %v1606_v31 = vpop.f32.mrf.mxu0  ;;  %v1944_v34 = vrot.slane %v1943_v30, 4  ;;  %v1691_v43 = vmax.f32 %v1601_v29, 0.0  ;;  %v1898_v0 = vrot.slane %v1897_v21, 1  ;;  %v7201_v48 = vunpack.c.l.b16 %v1870_v13 }
 0x354   : > { %v1954_v38 = vrot.slane %v1953_v26, 4  ;;  %v1692_v47 = vmax.f32 %v1603_v35, 0.0  ;;  %v1607_v57 = vadd.f32 %v1606_v31, %v7061_v24  ;;  %v1938_v61 = vrot.slane %v1937_v33, 1 }
 0x355   : > { %v1608_v45 = vpop.f32.mrf.mxu0  ;;  %v1945_v44 = vmax.f32 %v1943_v30, %v1944_v34  ;;  %v1731_v54 = vpack.c.bf16 %v1691_v43, %v1689_v42  ;;  %v1929_v18 = vmax.f32 %v1927_v25, %v1928_v53  ;;  %v1880_v34 = vpack.i.bf16 %v7195_v50, %v7195_v50 }
 0x356   : > { %v1955_v37 = vmax.f32 %v1953_v26, %v1954_v38  ;;  %v1732_v41 = vpack.c.bf16 %v1692_v47, %v1690_v46  ;;  %v1609_v6 = vadd.f32 %v1608_v45, %v7070_v28  ;;  %v1693_v8 = vmax.f32 %v1607_v57, 0.0 }
 0x357   : > { %v1610_v55 = vpop.f32.mrf.mxu0  ;;  %v1946_v63 = vrot.slane %v1945_v44, 2  ;;  %v1961_v1 = vunpack.i.l.bf16 %v1731_v54  ;;  %v1962_v2 = vunpack.i.h.bf16 %v1731_v54  ;;  %v1939_v12 = vmax.f32 %v1937_v33, %v1938_v61 }
 0x358   : > { %v1611_v59 = vadd.f32 %v1610_v55, %v7061_v24  ;;  %v1971_v39 = vunpack.i.l.bf16 %v1732_v41  ;;  %v1972_v3 = vunpack.i.h.bf16 %v1732_v41  ;;  %v1956_v27 = vrot.slane %v1955_v37, 2 }
 0x359   : > { %v1612_v58 = vpop.f32.mrf.mxu0  ;;  %v1947_v30 = vmax.f32 %v1945_v44, %v1946_v63  ;;  %v1963_v26 = vmax.f32 %v1961_v1, %v1962_v2  ;;  %v1930_v25 = vpack.i.bf16 %v1929_v18, %v1929_v18  ;;  %v1694_v31 = vmax.f32 %v1609_v6, 0.0 }
 0x35a   : > { %v1695_v9 = vmax.f32 %v1611_v59, 0.0  ;;  %v1613_v10 = vadd.f32 %v1612_v58, %v7070_v28  ;;  %v1973_v29 = vmax.f32 %v1971_v39, %v1972_v3  ;;  %v7207_v35 = vmax.f32 %v1897_v21, %v1898_v0 }
 0x35b   : > { %v1616_v7 = vpop.f32.mrf.mxu0  ;;  %v1910_v38 = vpack.i.bf16 %v1909_v4, %v1909_v4  ;;  %v1920_v13 = vpack.i.bf16 %v1919_v5, %v1919_v5  ;;  %v1957_v42 = vmax.f32 %v1955_v37, %v1956_v27  ;;  %v1948_v33 = vrot.slane %v1947_v30, 1 }
 0x35c   : > { %v1733_v14 = vpack.c.bf16 %v1695_v9, %v1693_v8  ;;  %v1696_v22 = vmax.f32 %v1613_v10, 0.0  ;;  %v1617_v43 = vadd.f32 %v1616_v7, %v7061_v24  ;;  %v1940_v49 = vpack.i.bf16 %v1939_v12, %v1939_v12 }
 0x35d   : > { %v1618_v17 = vpop.f32.mrf.mxu0  ;;  %v1964_v52 = vrot.slane %v1963_v26, 4  ;;  %v1974_v53 = vrot.slane %v1973_v29, 4  ;;  %v2250_v55 = vunpack.c.l.b16 %v1930_v25  ;;  %v2248_v60 = vunpack.c.l.b16 %v1910_v38 }
 0x35e   : > { %v1981_v45 = vunpack.i.l.bf16 %v1733_v14  ;;  %v1982_v44 = vunpack.i.h.bf16 %v1733_v14  ;;  %v1734_v46 = vpack.c.bf16 %v1696_v22, %v1694_v31  ;;  %v1619_v21 = vadd.f32 %v1618_v17, %v7070_v28 }
 0x35f   : > { %v1620_v32 = vpop.f32.mrf.mxu0  ;;  %v1958_v37 = vrot.slane %v1957_v42, 1  ;;  %v1697_v61 = vmax.f32 %v1617_v43, 0.0  ;;  %v1949_v58 = vmax.f32 %v1947_v30, %v1948_v33  ;;  %v7213_v3 = vunpack.c.l.b16 %v1920_v13 }
 0x360   : > { %v1621_v54 = vadd.f32 %v1620_v32, %v7061_v24  ;;  %v1991_v41 = vunpack.i.l.bf16 %v1734_v46  ;;  %v1992_v57 = vunpack.i.h.bf16 %v1734_v46  ;;  %v1983_v0 = vmax.f32 %v1981_v45, %v1982_v44 }
 0x361   : > { %v1622_v47 = vpop.f32.mrf.mxu0  ;;  %v1965_v4 = vmax.f32 %v1963_v26, %v1964_v52  ;;  %v1975_v5 = vmax.f32 %v1973_v29, %v1974_v53  ;;  %v7216_v6 = vsel %vm2264_vm3, %v2250_v55, %v2248_v60  ;;  %v7218_v7 = vunpack.c.l.b16 %v1940_v49 }
 0x362   : > { %v1699_v63 = vmax.f32 %v1621_v54, 0.0  ;;  %v1993_v1 = vmax.f32 %v1991_v41, %v1992_v57  ;;  %v1623_v2 = vadd.f32 %v1622_v47, %v7070_v28  ;;  %v1698_v27 = vmax.f32 %v1619_v21, 0.0 }
 0x363   : > { %v1626_v59 = vpop.f32.mrf.mxu0  ;;  %v1959_v10 = vmax.f32 %v1957_v42, %v1958_v37  ;;  %v1950_v14 = vpack.i.bf16 %v1949_v58, %v1949_v58  ;;  %v1984_v22 = vrot.slane %v1983_v0, 4  ;;  %v1966_v29 = vrot.slane %v1965_v4, 2 }
 0x364   : > { %v1735_v18 = vpack.c.bf16 %v1699_v63, %v1697_v61  ;;  %v1700_v8 = vmax.f32 %v1623_v2, 0.0  ;;  %v1627_v17 = vadd.f32 %v1626_v59, %v7061_v24  ;;  %v1994_v25 = vrot.slane %v1993_v1, 4 }
 0x365   : > { %v1628_v39 = vpop.f32.mrf.mxu0  ;;  %v1976_v32 = vrot.slane %v1975_v5, 2  ;;  %v1900_v42 = vpack.i.bf16 %v7207_v35, %v7207_v35  ;;  %v1960_v46 = vpack.i.bf16 %v1959_v10, %v1959_v10  ;;  %v1985_v53 = vmax.f32 %v1983_v0, %v1984_v22 }
 0x366   : > { %v2001_v12 = vunpack.i.l.bf16 %v1735_v18  ;;  %v2002_v30 = vunpack.i.h.bf16 %v1735_v18  ;;  %v1736_v31 = vpack.c.bf16 %v1700_v8, %v1698_v27  ;;  %v1629_v45 = vadd.f32 %v1628_v39, %v7070_v28 }
 0x367   : > { %v1630_v9 = vpop.f32.mrf.mxu0  ;;  %v1701_v49 = vmax.f32 %v1627_v17, 0.0  ;;  %v1995_v54 = vmax.f32 %v1993_v1, %v1994_v25  ;;  %v7226_v21 = vunpack.c.l.b16 %v1950_v14  ;;  %v1967_v59 = vmax.f32 %v1965_v4, %v1966_v29 }
 0x368   : > { %v2003_v38 = vmax.f32 %v2001_v12, %v2002_v30  ;;  %v1631_v13 = vadd.f32 %v1630_v9, %v7061_v24  ;;  %v2011_v43 = vunpack.i.l.bf16 %v1736_v31  ;;  %v2012_v33 = vunpack.i.h.bf16 %v1736_v31 }
 0x369   : > { %v1632_v26 = vpop.f32.mrf.mxu0  ;;  %v7228_v60 = vmax.f32 %v1975_v5, %v1976_v32  ;;  %v1702_v35 = vmax.f32 %v1629_v45, 0.0  ;;  %v7230_v39 = vunpack.c.l.b16 %v1960_v46  ;;  %v1986_v27 = vrot.slane %v1985_v53, 2 }
 0x36a   : > { %v2004_v47 = vrot.slane %v2003_v38, 4  ;;  %v1703_v52 = vmax.f32 %v1631_v13, 0.0  ;;  %v2013_v55 = vmax.f32 %v2011_v43, %v2012_v33  ;;  %v1633_v41 = vadd.f32 %v1632_v26, %v7070_v28 }
 0x36b   : > { %v1636_v44 = vpop.f32.mrf.mxu0  ;;  %v1996_v8 = vrot.slane %v1995_v54, 2  ;;  %v1968_v10 = vrot.slane %v1967_v59, 1  ;;  %v1978_v12 = vrot.slane %v7228_v60, 1  ;;  %v1987_v13 = vmax.f32 %v1985_v53, %v1986_v27 }
 0x36c   : > { %v1737_v37 = vpack.c.bf16 %v1703_v52, %v1701_v49  ;;  %v2005_v61 = vmax.f32 %v2003_v38, %v2004_v47  ;;  %v2014_v63 = vrot.slane %v2013_v55, 4  ;;  %v1704_v58 = vmax.f32 %v1633_v41, 0.0 }
 0x36d   : > { %v1638_v57 = vpop.f32.mrf.mxu0  ;;  %v1637_v18 = vadd.f32 %v1636_v44, %v7061_v24  ;;  %v1997_v43 = vmax.f32 %v1995_v54, %v1996_v8  ;;  %v2281_v41 = vsel %vm2270_vm6, %v7181_v51, %v7156_v62  ;;  %v1988_v50 = vrot.slane %v1987_v13, 1 }
 0x36e   : > { %v2021_v0 = vunpack.i.l.bf16 %v1737_v37  ;;  %v2022_v1 = vunpack.i.h.bf16 %v1737_v37  ;;  %v2015_v9 = vmax.f32 %v2013_v55, %v2014_v63  ;;  %v1738_v4 = vpack.c.bf16 %v1704_v58, %v1702_v35 }
 0x36f   : > { %v1640_v2 = vpop.f32.mrf.mxu0  ;;  %v2006_v14 = vrot.slane %v2005_v61, 2  ;;  %v1639_v31 = vadd.f32 %v1638_v57, %v7070_v28  ;;  %v1705_v29 = vmax.f32 %v1637_v18, 0.0  ;;  %v2247_v57 = vunpack.c.l.b16 %v1900_v42 }
 0x370   : > { %v2023_v30 = vmax.f32 %v2021_v0, %v2022_v1  ;;  %v1641_v17 = vadd.f32 %v1640_v2, %v7061_v24  ;;  %v2031_v22 = vunpack.i.l.bf16 %v1738_v4  ;;  %v2032_v25 = vunpack.i.h.bf16 %v1738_v4 }
 0x371   : > { %v1642_v5 = vpop.f32.mrf.mxu0  ;;  %v2016_v33 = vrot.slane %v2015_v9, 2  ;;  %v2245_v24 = vunpack.c.l.b16 %v1880_v34  ;;  %v2007_v49 = vmax.f32 %v2005_v61, %v2006_v14  ;;  %v1706_v55 = vmax.f32 %v1639_v31, 0.0 }
 0x372   : > { %v2024_v26 = vrot.slane %v2023_v30, 4  ;;  %v1707_v32 = vmax.f32 %v1641_v17, 0.0  ;;  %v1643_v38 = vadd.f32 %v1642_v5, %v7070_v28  ;;  %v2033_v45 = vmax.f32 %v2031_v22, %v2032_v25 }
 0x373   : > { %v2017_v37 = vmax.f32 %v2015_v9, %v2016_v33  ;;  %v2282_v58 = vsel %vm2272_vm7, %v7187_v16, %v2281_v41  ;;  %v1998_v0 = vrot.slane %v1997_v43, 1  ;;  %v1969_v51 = vmax.f32 %v1967_v59, %v1968_v10  ;;  %v5808_v33 = vld [vmem:[%s662_s26] sm:$0xff]   ;;  %s6591_s26 = smov [#allocation16]  }
 0x374   : > { %v2025_v44 = vmax.f32 %v2023_v30, %v2024_v26  ;;  %v1739_v46 = vpack.c.bf16 %v1707_v32, %v1705_v29  ;;  %v1708_v47 = vmax.f32 %v1643_v38, 0.0  ;;  %v2034_v52 = vrot.slane %v2033_v45, 4  ;;  %s6479_s2 = sshll.u32 %s6591_s26, 4  ;;  %s6480_s2 = int_to_ptr.vmem [resolvable:$false] %s6479_s2 }
 0x375   : > { %v2283_v2 = vsel %vm2274_vm8, %v2245_v24, %v2282_v58  ;;  %v2008_v27 = vrot.slane %v2007_v49, 1  ;;  %v2018_v9 = vrot.slane %v2017_v37, 1  ;;  %v1979_v30 = vmax.f32 %v7228_v60, %v1978_v12  ;;  %s6481_s21 = scalar_lea.vmem %s6480_s2, 256  ;;  %p6482_p2 = scmp.lt.s32.totalorder %s5174_s29, %s6480_s2 }
 0x376   : > { %v2026_v28 = vrot.slane %v2025_v44, 2  ;;  %v2041_v53 = vunpack.i.l.bf16 %v1739_v46  ;;  %v2042_v54 = vunpack.i.h.bf16 %v1739_v46  ;;  %v2035_v63 = vmax.f32 %v2033_v45, %v2034_v52  ;;  %p6483_p3 = scmp.lt.s32.totalorder %s6481_s21, %s6475_s23 }
 0x377   : > { %v1740_v35 = vpack.c.bf16 %v1708_v47, %v1706_v55  ;;  %v7248_v42 = vsel %vm2276_vm9, %v2247_v57, %v2283_v2  ;;  %v1989_v17 = vmax.f32 %v1987_v13, %v1988_v50  ;;  %v2269_v59 = vsel %vm2268_vm5, %v7162_v20, %v7139_v36 }
 0x378   : > { %v2027_v34 = vmax.f32 %v2025_v44, %v2026_v28  ;;  %v2043_v61 = vmax.f32 %v2041_v53, %v2042_v54  ;;  %v2036_v1 = vrot.slane %v2035_v63, 2  ;;  %v1999_v10 = vmax.f32 %v1997_v43, %v1998_v0  ;;  %p6484_p5 = por %p6483_p3, %p6482_p2 }
 0x379   : > { %v2051_v18 = vunpack.i.l.bf16 %v1740_v35  ;;  %v2052_v62 = vunpack.i.h.bf16 %v1740_v35  ;;  %v2271_v31 = vsel %vm2270_vm6, %v7168_v40, %v2269_v59  ;;  %v1970_v26 = vpack.i.bf16 %v1969_v51, %v1969_v51 }
 0x37a   : > { %v2044_v8 = vrot.slane %v2043_v61, 4  ;;  %v2028_v4 = vrot.slane %v2027_v34, 1  ;;  %v2037_v5 = vmax.f32 %v2035_v63, %v2036_v1  ;;  %v2009_v29 = vmax.f32 %v2007_v49, %v2008_v27  ;;  %p6485_p6 = pnand %p6484_p5, %p6478_p1 }
 0x37b   : > { %v2053_v16 = vmax.f32 %v2051_v18, %v2052_v62  ;;  %v2273_v38 = vsel %vm2272_vm7, %v7183_v56, %v2271_v31  ;;  %v2019_v60 = vmax.f32 %v2017_v37, %v2018_v9  ;;  %v1980_v36 = vpack.i.bf16 %v1979_v30, %v1979_v30 }
 0x37c   : > { %v2045_v14 = vmax.f32 %v2043_v61, %v2044_v8  ;;  %v2038_v22 = vrot.slane %v2037_v5, 1  ;;  %v2029_v12 = vmax.f32 %v2027_v34, %v2028_v4  ;;  %v2275_v45 = vsel %vm2274_vm8, %v7201_v48, %v2273_v38  ;;  %v6243_v4 = vld [vmem:[#allocation13 + $0x148] ss:$16 sps:$4 sm:$0xff]   ;;  %v6204_v38 = vld [vmem:[#allocation13 + $0xa0] ss:$16 sps:$4 sm:$0xff]  }
 0x37d   : > { %v2054_v25 = vrot.slane %v2053_v16, 4  ;;  %v2277_v44 = vsel %vm2276_vm9, %v7203_v11, %v2275_v45  ;;  %v1990_v40 = vpack.i.bf16 %v1989_v17, %v1989_v17  ;;  %v2000_v46 = vpack.i.bf16 %v1999_v10, %v1999_v10  ;;  %v6219_v45 = vld [vmem:[#allocation13 + $0x40] ss:$16 sps:$4 sm:$0xff]  }
 0x37e   : > { %v2046_v32 = vrot.slane %v2045_v14, 2  ;;  %v2039_v43 = vmax.f32 %v2037_v5, %v2038_v22  ;;  %v5809_v24 = vunpack.c.l.bf16 %v5808_v33  ;;  %v2010_v49 = vpack.i.bf16 %v2009_v29, %v2009_v29  ;;  %v6201_v29 = vld [vmem:[#allocation13 + $0xc0] ss:$16 sps:$4 sm:$0xff]  }
 0x37f   : > { %v2055_v13 = vmax.f32 %v2053_v16, %v2054_v25  ;;  %v5810_v56 = vunpack.c.h.bf16 %v5808_v33  ;;  %v2254_v55 = vunpack.c.l.b16 %v1970_v26  ;;  %v2020_v41 = vpack.i.bf16 %v2019_v60, %v2019_v60  ;;  %v6245_v16 = vld [vmem:[#allocation13 + $0x14c] ss:$16 sps:$4 sm:$0xff]   ;;  %v6195_v25 = vld [vmem:[#allocation13 + $0xe0] ss:$16 sps:$4 sm:$0xff]   ;;  %v6203_v26 = vld [vmem:[#allocation13 + $0xc4] ss:$16 sps:$4 sm:$0xff]  }
 0x380   : > { %v2047_v20 = vmax.f32 %v2045_v14, %v2046_v32  ;;  %v2030_v28 = vpack.i.bf16 %v2029_v12, %v2029_v12  ;;  %v6588_v54 = vmov 2   ;;  %v2040_v57 = vpack.i.bf16 %v2039_v43, %v2039_v43  ;;  %3007 = vmatprep.subr.bf16.mxu0 %v6245_v16  ;;  %v6206_v32 = vld [vmem:[#allocation13 + $0xa4] ss:$16 sps:$4 sm:$0xff]   ;;  %v6210_v60 = vld [vmem:[#allocation13 + $0x80] ss:$16 sps:$4 sm:$0xff]  }
 0x381   : > { %v2056_v47 = vrot.slane %v2055_v13, 2  ;;  %6084 = vset.pattern.permute.xlu1 %v6588_v54  ;;  %v6073_v37 = vpack.i.bf16 %v5810_v56, %v5809_v24  ;;  %v2286_v11 = vsel %vm2266_vm4, %v7226_v21, %v7216_v6  ;;  %v2255_v63 = vunpack.c.l.b16 %v1980_v36  ;;  %3008 = vmatpush2.bf16.msra.mxu0 %v6243_v4  ;;  %v6212_v33 = vld [vmem:[#allocation13 + $0x84] ss:$16 sps:$4 sm:$0xff]   ;;  %v6237_v24 = vld [vmem:[#allocation13 + $0x1c0] ss:$16 sps:$4 sm:$0xff]  }
 0x382   : > { %v2048_v52 = vrot.slane %v2047_v20, 1  ;;  %v2256_v35 = vunpack.c.l.b16 %v1990_v40  ;;  %v2257_v50 = vunpack.c.l.b16 %v2000_v46  ;;  %v2258_v34 = vunpack.c.l.b16 %v2010_v49  ;;  %v6215_v12 = vld [vmem:[#allocation13 + $0x64] ss:$16 sps:$4 sm:$0xff]   ;;  %v6231_v46 = vld [vmem:[#allocation13 + $0x1e0] ss:$16 sps:$4 sm:$0xff]  }
 0x383   : > { %v2057_v53 = vmax.f32 %v2055_v13, %v2056_v47  ;;  %v2292_v2 = vsel %vm2264_vm3, %v7218_v7, %v7213_v3  ;;  %6074 = vperm.xlu0 %6072, %v6073_v37   ;;  %6086 = vperm.xlu1 %6084, %v6073_v37   ;;  %v2260_v0 = vunpack.c.l.b16 %v2030_v28  ;;  %v2259_v18 = vunpack.c.l.b16 %v2020_v41  ;;  %v6221_v13 = vld [vmem:[#allocation13 + $0x44] ss:$16 sps:$4 sm:$0xff]   ;;  %v6249_v41 = vld [vmem:[#allocation13 + $0x160] ss:$16 sps:$4 sm:$0xff]  }
 0x384   : > { %v2049_v48 = vmax.f32 %v2047_v20, %v2048_v52  ;;  %v2261_v51 = vunpack.c.l.b16 %v2040_v57  ;;  %v2293_v6 = vsel %vm2266_vm4, %v7230_v39, %v2292_v2  ;;  %v2287_v21 = vsel %vm2268_vm5, %v2254_v55, %v2286_v11  ;;  %v6224_v36 = vld [vmem:[#allocation13 + $0x24] ss:$16 sps:$4 sm:$0xff]   ;;  %v6222_v20 = vld [vmem:[#allocation13 + $0x20] ss:$16 sps:$4 sm:$0xff]   ;;  %v6261_v11 = vld [vmem:[#allocation13 + $0x108] ss:$16 sps:$4 sm:$0xff]  }
 0x385   : > { %v2058_v58 = vrot.slane %v2057_v53, 1  ;;  %v2294_v8 = vsel %vm2268_vm5, %v2255_v63, %v2293_v6  ;;  %v2288_v9 = vsel %vm2270_vm6, %v2256_v35, %v2287_v21  ;;  %v6589_v5 = vmov 1   ;;  %v6230_v43 = vld [vmem:[#allocation13 + $0x4] ss:$16 sps:$4 sm:$0xff]   ;;  %v6240_v52 = vld [vmem:[#allocation13 + $0x1a0] ss:$16 sps:$4 sm:$0xff]  }
 0x386   : > { %v2050_v61 = vpack.i.bf16 %v2049_v48, %v2049_v48  ;;  %v2295_v3 = vsel %vm2270_vm6, %v2257_v50, %v2294_v8  ;;  %v2289_v7 = vsel %vm2272_vm7, %v2258_v34, %v2288_v9  ;;  %v6233_v40 = vld [vmem:[#allocation13 + $0x1e4] ss:$16 sps:$4 sm:$0xff]   ;;  %v6246_v55 = vld [vmem:[#allocation13 + $0x180] ss:$16 sps:$4 sm:$0xff]   ;;  %v6263_v63 = vld [vmem:[#allocation13 + $0x10c] ss:$16 sps:$4 sm:$0xff]  }
 0x387   : > { %v2059_v1 = vmax.f32 %v2057_v53, %v2058_v58  ;;  %6078 = vset.pattern.permute.xlu0 %v6589_v5  ;;  %v2296_v17 = vsel %vm2272_vm7, %v2259_v18, %v2295_v3  ;;  %v2290_v39 = vsel %vm2274_vm8, %v2260_v0, %v2289_v7  ;;  %v6239_v47 = vld [vmem:[#allocation13 + $0x1c4] ss:$16 sps:$4 sm:$0xff]   ;;  %v6252_v53 = vld [vmem:[#allocation13 + $0x128] ss:$16 sps:$4 sm:$0xff]   ;;  %v6255_v48 = vld [vmem:[#allocation13 + $0x140] ss:$16 sps:$4 sm:$0xff]  }
 0x388   : > { %v2262_v62 = vunpack.c.l.b16 %v2050_v61  ;;  %6080 = vperm.xlu0 %6078, %v6073_v37   ;;  %v2297_v14 = vsel %vm2274_vm8, %v2261_v51, %v2296_v17  ;;  %v6242_v49 = vld [vmem:[#allocation13 + $0x1a4] ss:$16 sps:$4 sm:$0xff]   ;;  %v6258_v35 = vld [vmem:[#allocation13 + $0x120] ss:$16 sps:$4 sm:$0xff]   ;;  %v2065_v6 = vld [vmem:[#allocation10] sm:$0xf] }
 0x389   : > { %v2060_v27 = vpack.i.bf16 %v2059_v1, %v2059_v1  ;;  %v6248_v56 = vld [vmem:[#allocation13 + $0x184] ss:$16 sps:$4 sm:$0xff]   ;;  %v6264_v1 = vld [vmem:[#allocation13 + $0x100] ss:$16 sps:$4 sm:$0xff]   ;;  %v2084_v8 = vsub.s32 4, %v7040_v15  ;;  %v2114_v9 = vsub.s32 5, %v7040_v15 }
 0x38a   : > { %v2291_v59 = vsel %vm2276_vm9, %v2262_v62, %v2290_v39  ;;  %v6251_v28 = vld [vmem:[#allocation13 + $0x164] ss:$16 sps:$4 sm:$0xff]   ;;  %v2148_v4 = vsub.s32 6, %v7040_v15  ;;  %v7310_v17 = vsub.s32 2, %v7040_v15 }
 0x38b   : > { %v2263_v30 = vunpack.c.l.b16 %v2060_v27  ;;  %v2299_v31 = vpack.c.b16 %v2291_v59, %v2277_v44  ;;  %v6228_v44 = vld [vmem:[#allocation13] ss:$16 sps:$4 sm:$0xff]   ;;  %v6257_v57 = vld [vmem:[#allocation13 + $0x144] ss:$16 sps:$4 sm:$0xff]   ;;  %v2066_v27 = vunpack.c.l.bf16 %v2065_v6 }
 0x38c   : > { %6090 = vset.pattern.permute.xlu0 %v6588_v54  ;;  %v6254_v54 = vld [vmem:[#allocation13 + $0x12c] ss:$16 sps:$4 sm:$0xff]   ;;  %v6260_v37 = vld [vmem:[#allocation13 + $0x124] ss:$16 sps:$4 sm:$0xff]  }
 0x38d   : > { %v2298_v10 = vsel %vm2276_vm9, %v2263_v30, %v2297_v14  ;;  %3009 = vmatprep.subr.bf16.mxu0 %v6254_v54  ;;  %v6266_v58 = vld [vmem:[#allocation13 + $0x104] ss:$16 sps:$4 sm:$0xff]   ;;  %v2085_v3 = vrot.slane %v2066_v27, %v2084_v8  ;;  %v2115_v7 = vrot.slane %v2066_v27, %v2114_v9  ;;  %v2081_v5 = vrot.slane %v2066_v27, %v7049_v19 }
 0x38e   : > { %v2300_v22 = vpack.c.b16 %v2298_v10, %v7248_v42  ;;  %v6213_v42 = vld [vmem:[#allocation13 + $0x60] ss:$16 sps:$4 sm:$0xff]   ;;  %3010 = vmatpush2.bf16.msra.mxu0 %v6252_v53  ;;  %v2111_v16 = vrot.slane %v2066_v27, %v7058_v23  ;;  %v2149_v39 = vrot.slane %v2066_v27, %v2148_v4 }
 0x38f   : > { %3011 = vmatprep.subr.bf16.mxu0 %v6263_v63  ;;  %v7284_v50 = vld [vmem:[#allocation14 + $0x1c0] sm:$0xff]  ;;  %v2095_v14 = vrot.slane %v2085_v3, %v7049_v19  ;;  %v2125_v10 = vrot.slane %v2115_v7, %v7058_v23 }
 0x390   : > { %2495 = vmatprep.mubr.bf16.mxu1 %v2300_v22  ;;  %v7286_v34 = vld [vmem:[#allocation14 + $0x1e0] sm:$0xff] }
 0x391   : > { %2496 = vmatmul.mubr.bf16.vlgmr.msra.gmra.mxu1 %v2299_v31  ;;  %v7288_v61 = vld [vmem:[#allocation14 + $0x5c0] sm:$0xff]  ;;  %v5599_v2 = vcombine.low %v7284_v50, %v7286_v34  ;;  %v5600_v51 = vcombine.high %v7284_v50, %v7286_v34  ;;  %v2121_v31 = vrot.slane %v2111_v16, %v7058_v23 }
 0x392   : > { %2939 = vmatpush1.bf16.msra.mxu1 %v6195_v25  ;;  %3012 = vmatpush2.bf16.msra.mxu0 %v6261_v11  ;;  %v7292_v0 = vld [vmem:[#allocation14 + $0x5e0] sm:$0xff]  ;;  %v2091_v25 = vrot.slane %v2081_v5, %v7049_v19 }
 0x393   : > { %2940 = vmatprep.subr.bf16.mxu1 %v6203_v26  ;;  %v5727_v18 = vcombine.low %v7288_v61, %v7292_v0  ;;  %v5728_v62 = vcombine.high %v7288_v61, %v7292_v0  ;;  %v2145_v26 = vrot.slane %v2066_v27, %v7310_v17  ;;  %v3060_v61 = vld [vmem:[#allocation14 + $0xc0] sm:$0xff] }
 0x394   : > { %v3188_v0 = vld [vmem:[#allocation14 + $0x4c0] sm:$0xff] }
 0x395   : > { %4657 = vmatprep.subr.bf16.mxu0 %v5728_v62 }
 0x396   : > { %2941 = vmatpush1.bf16.msra.mxu1 %v6201_v29 }
 0x397   : > { %2942 = vmatprep.subr.bf16.mxu1 %v6206_v32 }
 0x39a   : > { %2943 = vmatpush1.bf16.msra.mxu1 %v6204_v38  ;;  %v2159_v38 = vrot.slane %v2149_v39, %v7310_v17  ;;  %v3084_v39 = vld [vmem:[#allocation14 + $0x180] sm:$0xff] }
 0x39b   : > { %2944 = vmatprep.subr.bf16.mxu1 %v6212_v33 }
 0x39e   : > { %2945 = vmatpush1.bf16.msra.mxu1 %v6210_v60 }
 0x39f   : > { %2946 = vmatprep.subr.bf16.mxu1 %v6215_v12 }
 0x3a2   : > { %2947 = vmatpush1.bf16.msra.mxu1 %v6213_v42 }
 0x3a3   : > { %2948 = vmatprep.subr.bf16.mxu1 %v6221_v13 }
 0x3a6   : > { %2949 = vmatpush1.bf16.msra.mxu1 %v6219_v45 }
 0x3a7   : > { %2950 = vmatprep.subr.bf16.mxu1 %v6224_v36  ;;  %v2155_v36 = vrot.slane %v2145_v26, %v7310_v17 }
 0x3aa   : > { %2951 = vmatpush1.bf16.msra.mxu1 %v6222_v20 }
 0x3ab   : > { %2952 = vmatprep.subr.bf16.mxu1 %v6230_v43 }
 0x3ae   : > { %2953 = vmatpush1.bf16.msra.mxu1 %v6228_v44 }
 0x3af   : > { %2954 = vmatprep.subr.bf16.mxu1 %v6233_v40 }
 0x3b2   : > { %2955 = vmatpush2.bf16.msra.mxu1 %v6231_v46 }
 0x3b3   : > { %2956 = vmatprep.subr.bf16.mxu1 %v6239_v47 }
 0x3b6   : > { %2957 = vmatpush2.bf16.msra.mxu1 %v6237_v24 }
 0x3b7   : > { %2958 = vmatprep.subr.bf16.mxu1 %v6242_v49 }
 0x3ba   : > { %2959 = vmatpush2.bf16.msra.mxu1 %v6240_v52 }
 0x3bb   : > { %2960 = vmatprep.subr.bf16.mxu1 %v6248_v56 }
 0x3be   : > { %2961 = vmatpush2.bf16.msra.mxu1 %v6246_v55 }
 0x3bf   : > { %2962 = vmatprep.subr.bf16.mxu1 %v6251_v28 }
 0x3c2   : > { %2963 = vmatpush2.bf16.msra.mxu1 %v6249_v41 }
 0x3c3   : > { %2964 = vmatprep.subr.bf16.mxu1 %v6257_v57 }
 0x3c6   : > { %2965 = vmatpush2.bf16.msra.mxu1 %v6255_v48  ;;  %v2510_v48 = vld [vmem:[#allocation11] sm:$0x3] }
 0x3c7   : > { %2966 = vmatprep.subr.bf16.mxu1 %v6260_v37  ;;  %v2519_v63 = vrot.slane %v2510_v48, %v7058_v23 }
 0x3ca   : > { %2967 = vmatpush2.bf16.msra.mxu1 %v6258_v35 }
 0x3cb   : > { %2968 = vmatprep.subr.bf16.mxu1 %v6266_v58 }
 0x3ce   : > { %2969 = vmatpush2.bf16.msra.mxu1 %v6264_v1  ;;  %v2515_v1 = vrot.slane %v2510_v48, %v7049_v19 }
 0x3cf   : > { %4614 = vmatprep.subr.bf16.mxu1 %v5600_v51 }
 0x3fe   : > { %v6075_v21 = vpop.permute.xlu0 %6074  ;;  %v6087_v29 = vpop.permute.xlu1 %6086 }
 0x3ff   : > { %v6076_v59 = vunpack.i.l.bf16 %v6075_v21  ;;  %v6077_v32 = vunpack.i.h.bf16 %v6075_v21  ;;  %v6088_v42 = vunpack.i.l.bf16 %v6087_v29  ;;  %v6089_v20 = vunpack.i.h.bf16 %v6087_v29 }
 0x401   : > { %v2097_v33 = vmul.f32 %v6076_v59, %v2095_v14  ;;  %v2096_v13 = vmul.f32 %v6076_v59, %v2091_v25  ;;  %v2098_v43 = vmul.f32 %v6077_v32, %v2091_v25  ;;  %v2161_v40 = vmul.f32 %v6088_v42, %v2159_v38  ;;  %v3216_v25 = vld [vmem:[#allocation14 + $0x5a0] sm:$0xff] }
 0x402   : > { %v2160_v47 = vmul.f32 %v6088_v42, %v2155_v36  ;;  %v2099_v49 = vmul.f32 %v6077_v32, %v2095_v14  ;;  %v2162_v56 = vmul.f32 %v6089_v20, %v2155_v36  ;;  %v2163_v54 = vmul.f32 %v6089_v20, %v2159_v38  ;;  %v3208_v42 = vld [vmem:[#allocation14 + $0x560] sm:$0xff] }
 0x403   : > { %v6081_v30 = vpop.permute.xlu0 %6080 }
 0x404   : > { %v6082_v22 = vunpack.i.l.bf16 %v6081_v30  ;;  %v6083_v60 = vunpack.i.h.bf16 %v6081_v30 }
 0x406   : > { %v2127_v12 = vmul.f32 %v6082_v22, %v2125_v10  ;;  %v2126_v45 = vmul.f32 %v6082_v22, %v2121_v31  ;;  %v2128_v44 = vmul.f32 %v6083_v60, %v2121_v31  ;;  %v2129_v52 = vmul.f32 %v6083_v60, %v2125_v10  ;;  %v3088_v10 = vld [vmem:[#allocation14 + $0x1a0] sm:$0xff] }
 0x407   : > { %v3212_v22 = vld [vmem:[#allocation14 + $0x580] sm:$0xff]  ;;  %v5592_v32 = vcombine.high %v3084_v39, %v3088_v10 }
 0x408   : > { %v2131_v46 = vadd.f32 %v2127_v12, %v2097_v33  ;;  %v2130_v24 = vadd.f32 %v2126_v45, %v2096_v13  ;;  %v2132_v41 = vadd.f32 %v2128_v44, %v2098_v43  ;;  %v2133_v57 = vadd.f32 %v2129_v52, %v2099_v49  ;;  %v3076_v33 = vld [vmem:[#allocation14 + $0x140] sm:$0xff] }
 0x409   : > { %v5720_v38 = vcombine.high %v3212_v22, %v3216_v25  ;;  %v3080_v60 = vld [vmem:[#allocation14 + $0x160] sm:$0xff]  ;;  %v5591_v13 = vcombine.low %v3084_v39, %v3088_v10  ;;  %v5719_v45 = vcombine.low %v3212_v22, %v3216_v25 }
 0x40a   : > { %v2165_v55 = vadd.f32 %v2161_v40, %v2131_v46  ;;  %v2164_v28 = vadd.f32 %v2160_v47, %v2130_v24  ;;  %v2166_v35 = vadd.f32 %v2162_v56, %v2132_v41  ;;  %v2167_v6 = vadd.f32 %v2163_v54, %v2133_v57  ;;  %v3204_v12 = vld [vmem:[#allocation14 + $0x540] sm:$0xff] }
 0x40b   : > { %v5584_v36 = vcombine.high %v3076_v33, %v3080_v60  ;;  %v5712_v20 = vcombine.high %v3204_v12, %v3208_v42  ;;  %v3068_v43 = vld [vmem:[#allocation14 + $0x100] sm:$0xff]  ;;  %v5583_v47 = vcombine.low %v3076_v33, %v3080_v60  ;;  %v5711_v24 = vcombine.low %v3204_v12, %v3208_v42 }
 0x40c   : > { %v3072_v44 = vld [vmem:[#allocation14 + $0x120] sm:$0xff] }
 0x40d   : > { %v3196_v40 = vld [vmem:[#allocation14 + $0x500] sm:$0xff]  ;;  %v5576_v50 = vcombine.high %v3068_v43, %v3072_v44  ;;  %v5575_v49 = vcombine.low %v3068_v43, %v3072_v44 }
 0x40e   : > { %v3200_v46 = vld [vmem:[#allocation14 + $0x520] sm:$0xff] }
 0x40f   : > { %v5704_v34 = vcombine.high %v3196_v40, %v3200_v46  ;;  %v5703_v52 = vcombine.low %v3196_v40, %v3200_v46  ;;  %v3052_v41 = vld [vmem:[#allocation14 + $0x80] sm:$0xff] }
 0x410   : > { %v3184_v54 = vld [vmem:[#allocation14 + $0x4a0] sm:$0xff] }
 0x411   : > { %v3160_v10 = vld [vmem:[#allocation14 + $0x3e0] sm:$0xff] }
 0x412   : > { %v3284_v22 = vld [vmem:[#allocation14 + $0x7c0] sm:$0xff] }
 0x413   : > { %v3288_v25 = vld [vmem:[#allocation14 + $0x7e0] sm:$0xff] }
 0x414   : > { %v3152_v33 = vld [vmem:[#allocation14 + $0x3a0] sm:$0xff] }
 0x415   : > { %v3276_v60 = vld [vmem:[#allocation14 + $0x780] sm:$0xff] }
 0x416   : > { %v3280_v12 = vld [vmem:[#allocation14 + $0x7a0] sm:$0xff] }
 0x417   : > { %v3144_v43 = vld [vmem:[#allocation14 + $0x360] sm:$0xff] }
 0x418   : > { %v3268_v44 = vld [vmem:[#allocation14 + $0x740] sm:$0xff] }
 0x419   : > { %v3272_v40 = vld [vmem:[#allocation14 + $0x760] sm:$0xff] }
 0x451   : > { %v2497_v53 = vpop.f32.mrf.mxu1 }
 0x452   : > { %v2506_v58 = vadd.f32 %v2497_v53, %v2164_v28  ;;  %v3056_v28 = vld [vmem:[#allocation14 + $0xa0] sm:$0xff] }
 0x453   : > { %v2499_v37 = vpop.f32.mrf.mxu1  ;;  %v3180_v53 = vld [vmem:[#allocation14 + $0x480] sm:$0xff] }
 0x454   : > { %v2507_v11 = vadd.f32 %v2499_v37, %v2165_v55  ;;  %v2522_v5 = vadd.f32 %v2515_v1, %v2506_v58  ;;  %v5560_v37 = vcombine.high %v3052_v41, %v3056_v28  ;;  %v3172_v58 = vld [vmem:[#allocation14 + $0x440] sm:$0xff] }
 0x455   : > { %v2501_v62 = vpop.f32.mrf.mxu1 }
 0x456   : > { %v2508_v51 = vadd.f32 %v2501_v62, %v2166_v35  ;;  %v2523_v27 = vadd.f32 %v2519_v63, %v2507_v11  ;;  %v2526_v31 = vmax.f32 %v2522_v5, 0.0  ;;  %v5688_v11 = vcombine.high %v3180_v53, %v3184_v54  ;;  %v3048_v35 = vld [vmem:[#allocation14 + $0x60] sm:$0xff] }
 0x457   : > { %v2503_v21 = vpop.f32.mrf.mxu1  ;;  %v5559_v62 = vcombine.low %v3052_v41, %v3056_v28  ;;  %v3168_v5 = vld [vmem:[#allocation14 + $0x420] sm:$0xff] }
 0x458   : > { %v2524_v3 = vadd.f32 %v2515_v1, %v2508_v51  ;;  %v2509_v7 = vadd.f32 %v2503_v21, %v2167_v6  ;;  %v2527_v14 = vmax.f32 %v2523_v27, 0.0  ;;  %v3176_v1 = vld [vmem:[#allocation14 + $0x460] sm:$0xff]  ;;  %v5687_v51 = vcombine.low %v3180_v53, %v3184_v54 }
 0x459   : > { %v5680_v21 = vcombine.high %v3172_v58, %v3176_v1  ;;  %v3036_v27 = vld [vmem:[#allocation14] sm:$0xff] }
 0x45a   : > { %v2525_v16 = vadd.f32 %v2519_v63, %v2509_v7  ;;  %v2528_v30 = vmax.f32 %v2524_v3, 0.0  ;;  %v3044_v63 = vld [vmem:[#allocation14 + $0x40] sm:$0xff] }
 0x45b   : > { %v5552_v6 = vcombine.high %v3044_v63, %v3048_v35  ;;  %v3040_v3 = vld [vmem:[#allocation14 + $0x20] sm:$0xff] }
 0x45c   : > { %v2529_v59 = vmax.f32 %v2525_v16, 0.0  ;;  %v2530_v29 = vpack.c.bf16 %v2528_v30, %v2526_v31  ;;  %v3164_v7 = vld [vmem:[#allocation14 + $0x400] sm:$0xff]  ;;  %v5551_v16 = vcombine.low %v3044_v63, %v3048_v35  ;;  %v5679_v30 = vcombine.low %v3172_v58, %v3176_v1 }
 0x45d   : > { %v5544_v39 = vcombine.high %v3036_v27, %v3040_v3  ;;  %v5543_v31 = vcombine.low %v3036_v27, %v3040_v3  ;;  %v3128_v41 = vld [vmem:[#allocation14 + $0x2e0] sm:$0xff] }
 0x45e   : > { %v2531_v26 = vpack.c.bf16 %v2529_v59, %v2527_v14  ;;  %v5672_v14 = vcombine.high %v3164_v7, %v3168_v5  ;;  %v3156_v59 = vld [vmem:[#allocation14 + $0x3c0] sm:$0xff] }
 0x45f   : > { %v5663_v42 = vcombine.low %v3156_v59, %v3160_v10  ;;  %v3252_v28 = vld [vmem:[#allocation14 + $0x6c0] sm:$0xff] }
 0x460   : > { %2970 = vmatprep.mubr.bf16.mxu1 %v2531_v26  ;;  %3013 = vmatprep.mubr.bf16.mxu0 %v2531_v26  ;;  %v5671_v26 = vcombine.low %v3164_v7, %v3168_v5  ;;  %v3256_v53 = vld [vmem:[#allocation14 + $0x6e0] sm:$0xff] }
 0x461   : > { %2971 = vmatmul.mubr.bf16.vlgmr.msra.gmra.mxu1 %v2530_v29  ;;  %3014 = vmatmul.mubr.bf16.vlgmr.msra.gmra.mxu0 %v2530_v29  ;;  %v5664_v29 = vcombine.high %v3156_v59, %v3160_v10  ;;  %v5759_v63 = vcombine.low %v3252_v28, %v3256_v53  ;;  %v3116_v35 = vld [vmem:[#allocation14 + $0x280] sm:$0xff] }
 0x462   : > { %4615 = vmatpush1.bf16.msra.mxu1 %v5599_v2  ;;  %4658 = vmatpush1.bf16.msra.mxu0 %v5727_v18  ;;  %v3064_v2 = vld [vmem:[#allocation14 + $0xe0] sm:$0xff] }
 0x463   : > { %4616 = vmatprep.subr.bf16.mxu1 %v5592_v32  ;;  %4659 = vmatprep.subr.bf16.mxu0 %v5720_v38  ;;  %v3192_v18 = vld [vmem:[#allocation14 + $0x4e0] sm:$0xff]  ;;  %v5568_v56 = vcombine.high %v3060_v61, %v3064_v2  ;;  %v5567_v48 = vcombine.low %v3060_v61, %v3064_v2  ;;  %v5792_v32 = vcombine.high %v3284_v22, %v3288_v25 }
 0x464   : > { %v5696_v55 = vcombine.high %v3188_v0, %v3192_v18  ;;  %v5695_v57 = vcombine.low %v3188_v0, %v3192_v18  ;;  %v3148_v38 = vld [vmem:[#allocation14 + $0x380] sm:$0xff] }
 0x465   : > { %v5655_v46 = vcombine.low %v3148_v38, %v3152_v33  ;;  %v3136_v61 = vld [vmem:[#allocation14 + $0x320] sm:$0xff] }
 0x466   : > { %4617 = vmatpush1.bf16.msra.mxu1 %v5591_v13  ;;  %4660 = vmatpush1.bf16.msra.mxu0 %v5719_v45  ;;  %v5791_v13 = vcombine.low %v3284_v22, %v3288_v25  ;;  %v5656_v45 = vcombine.high %v3148_v38, %v3152_v33  ;;  %v3260_v2 = vld [vmem:[#allocation14 + $0x700] sm:$0xff]  ;;  %v7329_v38 = vld [vmem:[#allocation14 + $0x1c8] sm:$0xff] }
 0x467   : > { %4618 = vmatprep.subr.bf16.mxu1 %v5584_v36  ;;  %4661 = vmatprep.subr.bf16.mxu0 %v5712_v20  ;;  %v5784_v36 = vcombine.high %v3276_v60, %v3280_v12  ;;  %v3140_v20 = vld [vmem:[#allocation14 + $0x340] sm:$0xff]  ;;  %v7331_v33 = vld [vmem:[#allocation14 + $0x1e8] sm:$0xff] }
 0x468   : > { %v3264_v0 = vld [vmem:[#allocation14 + $0x720] sm:$0xff]  ;;  %v5647_v18 = vcombine.low %v3140_v20, %v3144_v43 }
 0x469   : > { %v3120_v58 = vld [vmem:[#allocation14 + $0x2a0] sm:$0xff] }
 0x46a   : > { %4619 = vmatpush1.bf16.msra.mxu1 %v5583_v47  ;;  %4662 = vmatpush1.bf16.msra.mxu0 %v5711_v24  ;;  %v5783_v47 = vcombine.low %v3276_v60, %v3280_v12  ;;  %v5648_v24 = vcombine.high %v3140_v20, %v3144_v43  ;;  %v3244_v1 = vld [vmem:[#allocation14 + $0x680] sm:$0xff]  ;;  %v7333_v60 = vld [vmem:[#allocation14 + $0x5c8] sm:$0xff]  ;;  %v2612_v43 = vsub.s32 3, %v7040_v15 }
 0x46b   : > { %4620 = vmatprep.subr.bf16.mxu1 %v5576_v50  ;;  %4663 = vmatprep.subr.bf16.mxu0 %v5704_v34  ;;  %v5776_v50 = vcombine.high %v3268_v44, %v3272_v40  ;;  %v3132_v34 = vld [vmem:[#allocation14 + $0x300] sm:$0xff] }
 0x46c   : > { %v5639_v54 = vcombine.low %v3132_v34, %v3136_v61  ;;  %v3108_v3 = vld [vmem:[#allocation14 + $0x240] sm:$0xff] }
 0x46d   : > { %v3112_v7 = vld [vmem:[#allocation14 + $0x260] sm:$0xff] }
 0x46e   : > { %4621 = vmatpush1.bf16.msra.mxu1 %v5575_v49  ;;  %4664 = vmatpush1.bf16.msra.mxu0 %v5703_v52  ;;  %v5775_v49 = vcombine.low %v3268_v44, %v3272_v40  ;;  %v5640_v52 = vcombine.high %v3132_v34, %v3136_v61  ;;  %v3236_v5 = vld [vmem:[#allocation14 + $0x640] sm:$0xff]  ;;  %v2596_v44 = vld [vmem:[%s7441_s12] sm:$0xf] }
 0x46f   : > { %4622 = vmatprep.subr.bf16.mxu1 %v5568_v56  ;;  %4665 = vmatprep.subr.bf16.mxu0 %v5696_v55  ;;  %v5768_v56 = vcombine.high %v3260_v2, %v3264_v0  ;;  %v3124_v55 = vld [vmem:[#allocation14 + $0x2c0] sm:$0xff]  ;;  %v2609_v34 = vrot.slane %v2596_v44, %v7310_v17 }
 0x470   : > { %v3100_v10 = vld [vmem:[#allocation14 + $0x200] sm:$0xff] }
 0x471   : > { %v3104_v22 = vld [vmem:[#allocation14 + $0x220] sm:$0xff] }
 0x472   : > { %4623 = vmatpush1.bf16.msra.mxu1 %v5567_v48  ;;  %4666 = vmatpush1.bf16.msra.mxu0 %v5695_v57  ;;  %v5767_v48 = vcombine.low %v3260_v2, %v3264_v0  ;;  %v5632_v57 = vcombine.high %v3124_v55, %v3128_v41  ;;  %v3228_v25 = vld [vmem:[#allocation14 + $0x600] sm:$0xff] }
 0x473   : > { %4624 = vmatprep.subr.bf16.mxu1 %v5560_v37  ;;  %4667 = vmatprep.subr.bf16.mxu0 %v5688_v11  ;;  %v5760_v37 = vcombine.high %v3252_v28, %v3256_v53  ;;  %v5631_v11 = vcombine.low %v3124_v55, %v3128_v41 }
 0x476   : > { %4625 = vmatpush1.bf16.msra.mxu1 %v5559_v62  ;;  %4668 = vmatpush1.bf16.msra.mxu0 %v5687_v51  ;;  %v5623_v62 = vcombine.low %v3116_v35, %v3120_v58  ;;  %v5624_v51 = vcombine.high %v3116_v35, %v3120_v58 }
 0x477   : > { %4626 = vmatprep.subr.bf16.mxu1 %v5552_v6  ;;  %4669 = vmatprep.subr.bf16.mxu0 %v5680_v21  ;;  %v3248_v6 = vld [vmem:[#allocation14 + $0x6a0] sm:$0xff] }
 0x478   : > { %v5751_v21 = vcombine.low %v3244_v1, %v3248_v6  ;;  %v5752_v27 = vcombine.high %v3244_v1, %v3248_v6 }
 0x47a   : > { %4627 = vmatpush1.bf16.msra.mxu1 %v5551_v16  ;;  %4670 = vmatpush1.bf16.msra.mxu0 %v5679_v30  ;;  %v5615_v16 = vcombine.low %v3108_v3, %v3112_v7  ;;  %v5616_v30 = vcombine.high %v3108_v3, %v3112_v7  ;;  %v3217_v3 = vld [vmem:[#allocation14 + $0x5a8] sm:$0xff] }
 0x47b   : > { %4628 = vmatprep.subr.bf16.mxu1 %v5544_v39  ;;  %4671 = vmatprep.subr.bf16.mxu0 %v5672_v14  ;;  %v3240_v39 = vld [vmem:[#allocation14 + $0x660] sm:$0xff] }
 0x47c   : > { %v5743_v14 = vcombine.low %v3236_v5, %v3240_v39  ;;  %v5744_v59 = vcombine.high %v3236_v5, %v3240_v39  ;;  %v3077_v39 = vld [vmem:[#allocation14 + $0x148] sm:$0xff] }
 0x47e   : > { %4629 = vmatpush1.bf16.msra.mxu1 %v5543_v31  ;;  %4672 = vmatpush1.bf16.msra.mxu0 %v5671_v26  ;;  %v5608_v31 = vcombine.high %v3100_v10, %v3104_v22  ;;  %v3232_v26 = vld [vmem:[#allocation14 + $0x620] sm:$0xff] }
 0x47f   : > { %4630 = vmatprep.subr.bf16.mxu1 %v5664_v29  ;;  %4673 = vmatprep.subr.bf16.mxu0 %v5792_v32  ;;  %v5607_v29 = vcombine.low %v3100_v10, %v3104_v22  ;;  %v5736_v32 = vcombine.high %v3228_v25, %v3232_v26  ;;  %v5735_v12 = vcombine.low %v3228_v25, %v3232_v26  ;;  %v3081_v10 = vld [vmem:[#allocation14 + $0x168] sm:$0xff] }
 0x480   : > { %v3205_v22 = vld [vmem:[#allocation14 + $0x548] sm:$0xff] }
 0x481   : > { %v3209_v25 = vld [vmem:[#allocation14 + $0x568] sm:$0xff] }
 0x482   : > { %4631 = vmatpush2.bf16.msra.mxu1 %v5663_v42  ;;  %4674 = vmatpush2.bf16.msra.mxu0 %v5791_v13  ;;  %v5601_v42 = vcombine.low %v7329_v38, %v7331_v33  ;;  %v5602_v13 = vcombine.high %v7329_v38, %v7331_v33  ;;  %v3069_v38 = vld [vmem:[#allocation14 + $0x108] sm:$0xff] }
 0x483   : > { %4632 = vmatprep.subr.bf16.mxu1 %v5656_v45  ;;  %4675 = vmatprep.subr.bf16.mxu0 %v5784_v36  ;;  %v3225_v45 = vld [vmem:[#allocation14 + $0x5e8] sm:$0xff] }
 0x484   : > { %v5729_v36 = vcombine.low %v7333_v60, %v3225_v45  ;;  %v5730_v20 = vcombine.high %v7333_v60, %v3225_v45  ;;  %v3073_v33 = vld [vmem:[#allocation14 + $0x128] sm:$0xff]  ;;  %v5713_v45 = vcombine.low %v3205_v22, %v3209_v25 }
 0x485   : > { %v3197_v60 = vld [vmem:[#allocation14 + $0x508] sm:$0xff] }
 0x486   : > { %4633 = vmatpush2.bf16.msra.mxu1 %v5655_v46  ;;  %4676 = vmatpush2.bf16.msra.mxu0 %v5783_v47  ;;  %v2605_v47 = vrot.slane %v2596_v44, %v7058_v23 }
 0x487   : > { %4634 = vmatprep.subr.bf16.mxu1 %v5648_v24  ;;  %4677 = vmatprep.subr.bf16.mxu0 %v5776_v50  ;;  %v2613_v24 = vrot.slane %v2596_v44, %v2612_v43  ;;  %v2601_v50 = vrot.slane %v2596_v44, %v7049_v19  ;;  %v3065_v44 = vld [vmem:[#allocation14 + $0xe8] sm:$0xff] }
 0x48a   : > { %4635 = vmatpush2.bf16.msra.mxu1 %v5647_v18  ;;  %4678 = vmatpush2.bf16.msra.mxu0 %v5775_v49 }
 0x48b   : > { %4636 = vmatprep.subr.bf16.mxu1 %v5640_v52  ;;  %4679 = vmatprep.subr.bf16.mxu0 %v5768_v56 }
 0x48e   : > { %4637 = vmatpush2.bf16.msra.mxu1 %v5639_v54  ;;  %4680 = vmatpush2.bf16.msra.mxu0 %v5767_v48 }
 0x48f   : > { %4638 = vmatprep.subr.bf16.mxu1 %v5632_v57  ;;  %4681 = vmatprep.subr.bf16.mxu0 %v5760_v37 }
 0x492   : > { %4639 = vmatpush2.bf16.msra.mxu1 %v5631_v11  ;;  %4682 = vmatpush2.bf16.msra.mxu0 %v5759_v63 }
 0x493   : > { %4640 = vmatprep.subr.bf16.mxu1 %v5624_v51  ;;  %4683 = vmatprep.subr.bf16.mxu0 %v5752_v27  ;;  %v3213_v27 = vld [vmem:[#allocation14 + $0x588] sm:$0xff] }
 0x494   : > { %v5721_v26 = vcombine.low %v3213_v27, %v3217_v3 }
 0x496   : > { %4641 = vmatpush2.bf16.msra.mxu1 %v5623_v62  ;;  %4684 = vmatpush2.bf16.msra.mxu0 %v5751_v21  ;;  %v3085_v62 = vld [vmem:[#allocation14 + $0x188] sm:$0xff] }
 0x497   : > { %4642 = vmatprep.subr.bf16.mxu1 %v5616_v30  ;;  %4685 = vmatprep.subr.bf16.mxu0 %v5744_v59  ;;  %v3089_v21 = vld [vmem:[#allocation14 + $0x1a8] sm:$0xff]  ;;  %v5722_v59 = vcombine.high %v3213_v27, %v3217_v3 }
 0x498   : > { %v3157_v27 = vld [vmem:[#allocation14 + $0x3c8] sm:$0xff] }
 0x499   : > { %v3161_v3 = vld [vmem:[#allocation14 + $0x3e8] sm:$0xff] }
 0x49a   : > { %4643 = vmatpush2.bf16.msra.mxu1 %v5615_v16  ;;  %4686 = vmatpush2.bf16.msra.mxu0 %v5743_v14  ;;  %v5594_v14 = vcombine.high %v3085_v62, %v3089_v21 }
 0x49b   : > { %4644 = vmatprep.subr.bf16.mxu1 %v5608_v31  ;;  %4687 = vmatprep.subr.bf16.mxu0 %v5736_v32  ;;  %v5593_v31 = vcombine.low %v3085_v62, %v3089_v21  ;;  %v5714_v32 = vcombine.high %v3205_v22, %v3209_v25  ;;  %v5666_v22 = vcombine.high %v3157_v27, %v3161_v3 }
 0x49e   : > { %4645 = vmatpush2.bf16.msra.mxu1 %v5607_v29  ;;  %4688 = vmatpush2.bf16.msra.mxu0 %v5735_v12  ;;  %v5586_v29 = vcombine.high %v3077_v39, %v3081_v10  ;;  %v3201_v12 = vld [vmem:[#allocation14 + $0x528] sm:$0xff] }
 0x49f   : > { %4700 = vmatprep.subr.bf16.mxu1 %v5602_v13  ;;  %4743 = vmatprep.subr.bf16.mxu0 %v5730_v20  ;;  %v5585_v13 = vcombine.low %v3077_v39, %v3081_v10  ;;  %v3061_v20 = vld [vmem:[#allocation14 + $0xc8] sm:$0xff] }
 0x4a0   : > { %v3285_v39 = vld [vmem:[#allocation14 + $0x7c8] sm:$0xff] }
 0x521   : > { %v2972_v40 = vpop.f32.mrf.mxu1  ;;  %v3015_v46 = vpop.f32.mrf.mxu0 }
 0x522   : > { %v2973_v41 = vadd.f32 %v2972_v40, %v2601_v50  ;;  %v3016_v28 = vadd.f32 %v3015_v46, %v2609_v34  ;;  %v3189_v40 = vld [vmem:[#allocation14 + $0x4c8] sm:$0xff] }
 0x523   : > { %v2974_v61 = vpop.f32.mrf.mxu1  ;;  %v3017_v2 = vpop.f32.mrf.mxu0  ;;  %v3193_v46 = vld [vmem:[#allocation14 + $0x4e8] sm:$0xff] }
 0x524   : > { %v2975_v49 = vadd.f32 %v2974_v61, %v2605_v47  ;;  %v3018_v52 = vadd.f32 %v3017_v2, %v2613_v24  ;;  %v3024_v51 = vmax.f32 %v2973_v41, 0.0  ;;  %v3026_v6 = vmax.f32 %v3016_v28, 0.0  ;;  %v3053_v61 = vld [vmem:[#allocation14 + $0x88] sm:$0xff] }
 0x525   : > { %v2976_v0 = vpop.f32.mrf.mxu1  ;;  %v3019_v18 = vpop.f32.mrf.mxu0  ;;  %v3057_v2 = vld [vmem:[#allocation14 + $0xa8] sm:$0xff] }
 0x526   : > { %v2977_v56 = vadd.f32 %v2976_v0, %v2601_v50  ;;  %v3020_v55 = vadd.f32 %v3019_v18, %v2609_v34  ;;  %v3025_v63 = vmax.f32 %v2975_v49, 0.0  ;;  %v3027_v35 = vmax.f32 %v3018_v52, 0.0  ;;  %v3181_v0 = vld [vmem:[#allocation14 + $0x488] sm:$0xff] }
 0x527   : > { %v2978_v53 = vpop.f32.mrf.mxu1  ;;  %v3021_v54 = vpop.f32.mrf.mxu0  ;;  %v5570_v50 = vcombine.high %v3061_v20, %v3065_v44  ;;  %v5698_v34 = vcombine.high %v3189_v40, %v3193_v46  ;;  %v3185_v18 = vld [vmem:[#allocation14 + $0x4a8] sm:$0xff]  ;;  %v5569_v49 = vcombine.low %v3061_v20, %v3065_v44  ;;  %v5697_v52 = vcombine.low %v3189_v40, %v3193_v46 }
 0x528   : > { %v2979_v48 = vadd.f32 %v2978_v53, %v2605_v47  ;;  %v3022_v57 = vadd.f32 %v3021_v54, %v2613_v24  ;;  %v3028_v37 = vmax.f32 %v2977_v56, 0.0  ;;  %v3030_v11 = vmax.f32 %v3020_v55, 0.0  ;;  %v3045_v41 = vld [vmem:[#allocation14 + $0x48] sm:$0xff] }
 0x529   : > { %v5577_v47 = vcombine.low %v3069_v38, %v3073_v33  ;;  %v5705_v24 = vcombine.low %v3197_v60, %v3201_v12  ;;  %v5562_v56 = vcombine.high %v3053_v61, %v3057_v2  ;;  %v5690_v55 = vcombine.high %v3181_v0, %v3185_v18  ;;  %v3049_v28 = vld [vmem:[#allocation14 + $0x68] sm:$0xff] }
 0x52a   : > { %v3029_v58 = vmax.f32 %v2979_v48, 0.0  ;;  %v3031_v1 = vmax.f32 %v3022_v57, 0.0  ;;  %v7354_v16 = vpack.c.bf16 %v3028_v37, %v3024_v51  ;;  %v7356_v30 = vpack.c.bf16 %v3030_v11, %v3026_v6  ;;  %v3173_v53 = vld [vmem:[#allocation14 + $0x448] sm:$0xff] }
 0x52b   : > { %v3177_v54 = vld [vmem:[#allocation14 + $0x468] sm:$0xff]  ;;  %v5561_v48 = vcombine.low %v3053_v61, %v3057_v2  ;;  %v5689_v57 = vcombine.low %v3181_v0, %v3185_v18  ;;  %v5554_v37 = vcombine.high %v3045_v41, %v3049_v28  ;;  %v5553_v62 = vcombine.low %v3045_v41, %v3049_v28 }
 0x52c   : > { %v7350_v7 = vpack.c.bf16 %v3029_v58, %v3025_v63  ;;  %v7352_v5 = vpack.c.bf16 %v3031_v1, %v3027_v35  ;;  %v5682_v11 = vcombine.high %v3173_v53, %v3177_v54  ;;  %v3037_v63 = vld [vmem:[#allocation14 + $0x8] sm:$0xff]  ;;  %v5681_v51 = vcombine.low %v3173_v53, %v3177_v54 }
 0x52d   : > { %v3041_v35 = vld [vmem:[#allocation14 + $0x28] sm:$0xff] }
 0x52e   : > { %4646 = vmatprep.mubr.bf16.mxu1 %v7350_v7  ;;  %4689 = vmatprep.mubr.bf16.mxu0 %v7352_v5  ;;  %v3165_v58 = vld [vmem:[#allocation14 + $0x408] sm:$0xff]  ;;  %v5546_v6 = vcombine.high %v3037_v63, %v3041_v35 }
 0x52f   : > { %4647 = vmatmul.mubr.bf16.vlgmr.msra.gmra.mxu1 %v7354_v16  ;;  %4690 = vmatmul.mubr.bf16.vlgmr.msra.gmra.mxu0 %v7356_v30  ;;  %v3169_v1 = vld [vmem:[#allocation14 + $0x428] sm:$0xff] }
 0x530   : > { %4701 = vmatpush1.bf16.msra.mxu1 %v5601_v42  ;;  %4744 = vmatpush1.bf16.msra.mxu0 %v5729_v36  ;;  %v5578_v42 = vcombine.high %v3069_v38, %v3073_v33  ;;  %v5706_v36 = vcombine.high %v3197_v60, %v3201_v12  ;;  %v5674_v21 = vcombine.high %v3165_v58, %v3169_v1 }
 0x531   : > { %4732 = vmatprep.mubr.bf16.mxu1 %v7350_v7  ;;  %4775 = vmatprep.mubr.bf16.mxu0 %v7352_v5  ;;  %v5673_v10 = vcombine.low %v3165_v58, %v3169_v1  ;;  %v5665_v38 = vcombine.low %v3157_v27, %v3161_v3 }
 0x532   : > { %4702 = vmatprep.subr.bf16.mxu1 %v5594_v14  ;;  %4745 = vmatprep.subr.bf16.mxu0 %v5722_v59  ;;  %v3289_v14 = vld [vmem:[#allocation14 + $0x7e8] sm:$0xff]  ;;  %v5545_v59 = vcombine.low %v3037_v63, %v3041_v35 }
 0x533   : > { %v5794_v25 = vcombine.high %v3285_v39, %v3289_v14  ;;  %v5793_v33 = vcombine.low %v3285_v39, %v3289_v14 }
 0x534   : > { %4703 = vmatpush1.bf16.msra.mxu1 %v5593_v31  ;;  %4746 = vmatpush1.bf16.msra.mxu0 %v5721_v26  ;;  %v3149_v31 = vld [vmem:[#allocation14 + $0x388] sm:$0xff] }
 0x535   : > { %4704 = vmatprep.subr.bf16.mxu1 %v5586_v29  ;;  %4747 = vmatprep.subr.bf16.mxu0 %v5714_v32  ;;  %v3153_v26 = vld [vmem:[#allocation14 + $0x3a8] sm:$0xff] }
 0x536   : > { %v3277_v29 = vld [vmem:[#allocation14 + $0x788] sm:$0xff]  ;;  %v5658_v60 = vcombine.high %v3149_v31, %v3153_v26  ;;  %v5657_v20 = vcombine.low %v3149_v31, %v3153_v26 }
 0x537   : > { %v3281_v32 = vld [vmem:[#allocation14 + $0x7a8] sm:$0xff] }
 0x538   : > { %4705 = vmatpush1.bf16.msra.mxu1 %v5585_v13  ;;  %4748 = vmatpush1.bf16.msra.mxu0 %v5713_v45  ;;  %v5786_v12 = vcombine.high %v3277_v29, %v3281_v32  ;;  %v3141_v13 = vld [vmem:[#allocation14 + $0x348] sm:$0xff]  ;;  %v5785_v44 = vcombine.low %v3277_v29, %v3281_v32 }
 0x539   : > { %4706 = vmatprep.subr.bf16.mxu1 %v5578_v42  ;;  %4749 = vmatprep.subr.bf16.mxu0 %v5706_v36  ;;  %v3145_v45 = vld [vmem:[#allocation14 + $0x368] sm:$0xff] }
 0x53a   : > { %v3269_v42 = vld [vmem:[#allocation14 + $0x748] sm:$0xff]  ;;  %v5650_v40 = vcombine.high %v3141_v13, %v3145_v45  ;;  %v5649_v61 = vcombine.low %v3141_v13, %v3145_v45 }
 0x53b   : > { %v3273_v36 = vld [vmem:[#allocation14 + $0x768] sm:$0xff] }
 0x53c   : > { %4707 = vmatpush1.bf16.msra.mxu1 %v5577_v47  ;;  %4750 = vmatpush1.bf16.msra.mxu0 %v5705_v24  ;;  %v5778_v46 = vcombine.high %v3269_v42, %v3273_v36  ;;  %v3133_v47 = vld [vmem:[#allocation14 + $0x308] sm:$0xff]  ;;  %v5777_v2 = vcombine.low %v3269_v42, %v3273_v36 }
 0x53d   : > { %4708 = vmatprep.subr.bf16.mxu1 %v5570_v50  ;;  %4751 = vmatprep.subr.bf16.mxu0 %v5698_v34  ;;  %v3137_v24 = vld [vmem:[#allocation14 + $0x328] sm:$0xff] }
 0x53e   : > { %v3261_v50 = vld [vmem:[#allocation14 + $0x708] sm:$0xff]  ;;  %v5642_v0 = vcombine.high %v3133_v47, %v3137_v24  ;;  %v5641_v41 = vcombine.low %v3133_v47, %v3137_v24 }
 0x53f   : > { %v3265_v34 = vld [vmem:[#allocation14 + $0x728] sm:$0xff] }
 0x540   : > { %4709 = vmatpush1.bf16.msra.mxu1 %v5569_v49  ;;  %4752 = vmatpush1.bf16.msra.mxu0 %v5697_v52  ;;  %v5770_v18 = vcombine.high %v3261_v50, %v3265_v34  ;;  %v3125_v49 = vld [vmem:[#allocation14 + $0x2c8] sm:$0xff]  ;;  %v5769_v28 = vcombine.low %v3261_v50, %v3265_v34 }
 0x541   : > { %4710 = vmatprep.subr.bf16.mxu1 %v5562_v56  ;;  %4753 = vmatprep.subr.bf16.mxu0 %v5690_v55  ;;  %v3129_v52 = vld [vmem:[#allocation14 + $0x2e8] sm:$0xff] }
 0x542   : > { %v3253_v56 = vld [vmem:[#allocation14 + $0x6c8] sm:$0xff]  ;;  %v5634_v53 = vcombine.high %v3125_v49, %v3129_v52  ;;  %v5633_v63 = vcombine.low %v3125_v49, %v3129_v52 }
 0x543   : > { %v3257_v55 = vld [vmem:[#allocation14 + $0x6e8] sm:$0xff] }
 0x544   : > { %4711 = vmatpush1.bf16.msra.mxu1 %v5561_v48  ;;  %4754 = vmatpush1.bf16.msra.mxu0 %v5689_v57  ;;  %v5762_v54 = vcombine.high %v3253_v56, %v3257_v55  ;;  %v3117_v48 = vld [vmem:[#allocation14 + $0x288] sm:$0xff]  ;;  %v5761_v35 = vcombine.low %v3253_v56, %v3257_v55 }
 0x545   : > { %4712 = vmatprep.subr.bf16.mxu1 %v5554_v37  ;;  %4755 = vmatprep.subr.bf16.mxu0 %v5682_v11  ;;  %v3121_v57 = vld [vmem:[#allocation14 + $0x2a8] sm:$0xff] }
 0x546   : > { %v3245_v37 = vld [vmem:[#allocation14 + $0x688] sm:$0xff]  ;;  %v5626_v58 = vcombine.high %v3117_v48, %v3121_v57  ;;  %v5625_v27 = vcombine.low %v3117_v48, %v3121_v57 }
 0x547   : > { %v3249_v11 = vld [vmem:[#allocation14 + $0x6a8] sm:$0xff] }
 0x548   : > { %4713 = vmatpush1.bf16.msra.mxu1 %v5553_v62  ;;  %4756 = vmatpush1.bf16.msra.mxu0 %v5681_v51  ;;  %v5754_v1 = vcombine.high %v3245_v37, %v3249_v11  ;;  %v3109_v62 = vld [vmem:[#allocation14 + $0x248] sm:$0xff]  ;;  %v5753_v3 = vcombine.low %v3245_v37, %v3249_v11 }
 0x549   : > { %4714 = vmatprep.subr.bf16.mxu1 %v5546_v6  ;;  %4757 = vmatprep.subr.bf16.mxu0 %v5674_v21  ;;  %v3113_v51 = vld [vmem:[#allocation14 + $0x268] sm:$0xff] }
 0x54a   : > { %v3237_v6 = vld [vmem:[#allocation14 + $0x648] sm:$0xff]  ;;  %v5618_v39 = vcombine.high %v3109_v62, %v3113_v51  ;;  %v5617_v31 = vcombine.low %v3109_v62, %v3113_v51 }
 0x54b   : > { %v3241_v21 = vld [vmem:[#allocation14 + $0x668] sm:$0xff] }
 0x54c   : > { %4715 = vmatpush1.bf16.msra.mxu1 %v5545_v59  ;;  %4758 = vmatpush1.bf16.msra.mxu0 %v5673_v10  ;;  %v5746_v14 = vcombine.high %v3237_v6, %v3241_v21  ;;  %v3101_v59 = vld [vmem:[#allocation14 + $0x208] sm:$0xff]  ;;  %v5745_v26 = vcombine.low %v3237_v6, %v3241_v21 }
 0x54d   : > { %4716 = vmatprep.subr.bf16.mxu1 %v5666_v22  ;;  %4759 = vmatprep.subr.bf16.mxu0 %v5794_v25  ;;  %v3105_v10 = vld [vmem:[#allocation14 + $0x228] sm:$0xff] }
 0x54e   : > { %v3229_v22 = vld [vmem:[#allocation14 + $0x608] sm:$0xff]  ;;  %v5610_v29 = vcombine.high %v3101_v59, %v3105_v10  ;;  %v5609_v13 = vcombine.low %v3101_v59, %v3105_v10 }
 0x54f   : > { %v3233_v25 = vld [vmem:[#allocation14 + $0x628] sm:$0xff] }
 0x550   : > { %4717 = vmatpush2.bf16.msra.mxu1 %v5665_v38  ;;  %4760 = vmatpush2.bf16.msra.mxu0 %v5793_v33  ;;  %v5738_v32 = vcombine.high %v3229_v22, %v3233_v25  ;;  %v3094_v38 = vld [vmem:[#allocation14 + $0x1d0] sm:$0xff]  ;;  %v5737_v45 = vcombine.low %v3229_v22, %v3233_v25 }
 0x551   : > { %4718 = vmatprep.subr.bf16.mxu1 %v5658_v60  ;;  %4761 = vmatprep.subr.bf16.mxu0 %v5786_v12  ;;  %v3098_v33 = vld [vmem:[#allocation14 + $0x1f0] sm:$0xff] }
 0x552   : > { %v3222_v60 = vld [vmem:[#allocation14 + $0x5d0] sm:$0xff]  ;;  %v5604_v42 = vcombine.high %v3094_v38, %v3098_v33  ;;  %v5603_v47 = vcombine.low %v3094_v38, %v3098_v33 }
 0x553   : > { %v3226_v12 = vld [vmem:[#allocation14 + $0x5f0] sm:$0xff] }
 0x554   : > { %4719 = vmatpush2.bf16.msra.mxu1 %v5657_v20  ;;  %4762 = vmatpush2.bf16.msra.mxu0 %v5785_v44  ;;  %v5732_v36 = vcombine.high %v3222_v60, %v3226_v12  ;;  %v3086_v20 = vld [vmem:[#allocation14 + $0x190] sm:$0xff]  ;;  %v5731_v24 = vcombine.low %v3222_v60, %v3226_v12 }
 0x555   : > { %4720 = vmatprep.subr.bf16.mxu1 %v5650_v40  ;;  %4763 = vmatprep.subr.bf16.mxu0 %v5778_v46  ;;  %v3090_v44 = vld [vmem:[#allocation14 + $0x1b0] sm:$0xff] }
 0x556   : > { %v3214_v40 = vld [vmem:[#allocation14 + $0x590] sm:$0xff]  ;;  %v5596_v50 = vcombine.high %v3086_v20, %v3090_v44  ;;  %v5595_v49 = vcombine.low %v3086_v20, %v3090_v44 }
 0x557   : > { %v3218_v46 = vld [vmem:[#allocation14 + $0x5b0] sm:$0xff] }
 0x558   : > { %4721 = vmatpush2.bf16.msra.mxu1 %v5649_v61  ;;  %4764 = vmatpush2.bf16.msra.mxu0 %v5777_v2  ;;  %v5724_v34 = vcombine.high %v3214_v40, %v3218_v46  ;;  %v3078_v61 = vld [vmem:[#allocation14 + $0x150] sm:$0xff]  ;;  %v5723_v52 = vcombine.low %v3214_v40, %v3218_v46 }
 0x559   : > { %4722 = vmatprep.subr.bf16.mxu1 %v5642_v0  ;;  %4765 = vmatprep.subr.bf16.mxu0 %v5770_v18  ;;  %v3082_v2 = vld [vmem:[#allocation14 + $0x170] sm:$0xff] }
 0x55a   : > { %v3206_v0 = vld [vmem:[#allocation14 + $0x550] sm:$0xff]  ;;  %v5588_v56 = vcombine.high %v3078_v61, %v3082_v2  ;;  %v5587_v48 = vcombine.low %v3078_v61, %v3082_v2 }
 0x55b   : > { %v3210_v18 = vld [vmem:[#allocation14 + $0x570] sm:$0xff] }
 0x55c   : > { %4723 = vmatpush2.bf16.msra.mxu1 %v5641_v41  ;;  %4766 = vmatpush2.bf16.msra.mxu0 %v5769_v28  ;;  %v5716_v55 = vcombine.high %v3206_v0, %v3210_v18  ;;  %v3070_v41 = vld [vmem:[#allocation14 + $0x110] sm:$0xff]  ;;  %v5715_v57 = vcombine.low %v3206_v0, %v3210_v18 }
 0x55d   : > { %4724 = vmatprep.subr.bf16.mxu1 %v5634_v53  ;;  %4767 = vmatprep.subr.bf16.mxu0 %v5762_v54  ;;  %v3074_v28 = vld [vmem:[#allocation14 + $0x130] sm:$0xff] }
 0x55e   : > { %v3198_v53 = vld [vmem:[#allocation14 + $0x510] sm:$0xff]  ;;  %v5580_v37 = vcombine.high %v3070_v41, %v3074_v28  ;;  %v5579_v62 = vcombine.low %v3070_v41, %v3074_v28 }
 0x55f   : > { %v3202_v54 = vld [vmem:[#allocation14 + $0x530] sm:$0xff] }
 0x560   : > { %4725 = vmatpush2.bf16.msra.mxu1 %v5633_v63  ;;  %4768 = vmatpush2.bf16.msra.mxu0 %v5761_v35  ;;  %v5708_v11 = vcombine.high %v3198_v53, %v3202_v54  ;;  %v3062_v63 = vld [vmem:[#allocation14 + $0xd0] sm:$0xff]  ;;  %v5707_v51 = vcombine.low %v3198_v53, %v3202_v54 }
 0x561   : > { %4726 = vmatprep.subr.bf16.mxu1 %v5626_v58  ;;  %4769 = vmatprep.subr.bf16.mxu0 %v5754_v1  ;;  %v3066_v35 = vld [vmem:[#allocation14 + $0xf0] sm:$0xff] }
 0x562   : > { %v3190_v58 = vld [vmem:[#allocation14 + $0x4d0] sm:$0xff]  ;;  %v5572_v6 = vcombine.high %v3062_v63, %v3066_v35  ;;  %v5571_v59 = vcombine.low %v3062_v63, %v3066_v35 }
 0x563   : > { %v3194_v1 = vld [vmem:[#allocation14 + $0x4f0] sm:$0xff] }
 0x564   : > { %4727 = vmatpush2.bf16.msra.mxu1 %v5625_v27  ;;  %4770 = vmatpush2.bf16.msra.mxu0 %v5753_v3  ;;  %v5700_v21 = vcombine.high %v3190_v58, %v3194_v1  ;;  %v3054_v27 = vld [vmem:[#allocation14 + $0x90] sm:$0xff]  ;;  %v5699_v10 = vcombine.low %v3190_v58, %v3194_v1 }
 0x565   : > { %4728 = vmatprep.subr.bf16.mxu1 %v5618_v39  ;;  %4771 = vmatprep.subr.bf16.mxu0 %v5746_v14  ;;  %v3058_v3 = vld [vmem:[#allocation14 + $0xb0] sm:$0xff] }
 0x566   : > { %v3182_v39 = vld [vmem:[#allocation14 + $0x490] sm:$0xff]  ;;  %v5564_v22 = vcombine.high %v3054_v27, %v3058_v3  ;;  %v5563_v38 = vcombine.low %v3054_v27, %v3058_v3 }
 0x567   : > { %v3186_v14 = vld [vmem:[#allocation14 + $0x4b0] sm:$0xff] }
 0x568   : > { %4729 = vmatpush2.bf16.msra.mxu1 %v5617_v31  ;;  %4772 = vmatpush2.bf16.msra.mxu0 %v5745_v26  ;;  %v5692_v25 = vcombine.high %v3182_v39, %v3186_v14  ;;  %v3046_v31 = vld [vmem:[#allocation14 + $0x50] sm:$0xff]  ;;  %v5691_v33 = vcombine.low %v3182_v39, %v3186_v14 }
 0x569   : > { %4730 = vmatprep.subr.bf16.mxu1 %v5610_v29  ;;  %4773 = vmatprep.subr.bf16.mxu0 %v5738_v32  ;;  %v3050_v26 = vld [vmem:[#allocation14 + $0x70] sm:$0xff] }
 0x56a   : > { %v3174_v29 = vld [vmem:[#allocation14 + $0x450] sm:$0xff]  ;;  %v5556_v60 = vcombine.high %v3046_v31, %v3050_v26  ;;  %v5555_v20 = vcombine.low %v3046_v31, %v3050_v26 }
 0x56b   : > { %v3178_v32 = vld [vmem:[#allocation14 + $0x470] sm:$0xff] }
 0x56c   : > { %4731 = vmatpush2.bf16.msra.mxu1 %v5609_v13  ;;  %4774 = vmatpush2.bf16.msra.mxu0 %v5737_v45  ;;  %v5684_v12 = vcombine.high %v3174_v29, %v3178_v32  ;;  %v3038_v13 = vld [vmem:[#allocation14 + $0x10] sm:$0xff]  ;;  %v5683_v44 = vcombine.low %v3174_v29, %v3178_v32 }
 0x56d   : > { %4786 = vmatprep.subr.bf16.mxu1 %v5604_v42  ;;  %4829 = vmatprep.subr.bf16.mxu0 %v5732_v36  ;;  %v3042_v45 = vld [vmem:[#allocation14 + $0x30] sm:$0xff] }
 0x56e   : > { %v3166_v42 = vld [vmem:[#allocation14 + $0x410] sm:$0xff]  ;;  %v5548_v40 = vcombine.high %v3038_v13, %v3042_v45  ;;  %v5547_v61 = vcombine.low %v3038_v13, %v3042_v45 }
 0x56f   : > { %4733 = vmatmul.mubr.bf16.vlgmr.msra.gmra.mxu1 %v7354_v16  ;;  %4776 = vmatmul.mubr.bf16.vlgmr.msra.gmra.mxu0 %v7356_v30  ;;  %v3170_v36 = vld [vmem:[#allocation14 + $0x430] sm:$0xff] }
 0x570   : > { %4787 = vmatpush1.bf16.msra.mxu1 %v5603_v47  ;;  %4818 = vmatprep.mubr.bf16.mxu1 %v7350_v7  ;;  %v5676_v46 = vcombine.high %v3166_v42, %v3170_v36  ;;  %v3158_v47 = vld [vmem:[#allocation14 + $0x3d0] sm:$0xff]  ;;  %v5675_v2 = vcombine.low %v3166_v42, %v3170_v36 }
 0x571   : > { %4830 = vmatpush1.bf16.msra.mxu0 %v5731_v24  ;;  %4861 = vmatprep.mubr.bf16.mxu0 %v7352_v5  ;;  %v3162_v24 = vld [vmem:[#allocation14 + $0x3f0] sm:$0xff] }
 0x572   : > { %4788 = vmatprep.subr.bf16.mxu1 %v5596_v50  ;;  %4831 = vmatprep.subr.bf16.mxu0 %v5724_v34  ;;  %v3286_v50 = vld [vmem:[#allocation14 + $0x7d0] sm:$0xff]  ;;  %v5668_v0 = vcombine.high %v3158_v47, %v3162_v24  ;;  %v5667_v41 = vcombine.low %v3158_v47, %v3162_v24 }
 0x573   : > { %v3290_v34 = vld [vmem:[#allocation14 + $0x7f0] sm:$0xff] }
 0x574   : > { %4789 = vmatpush1.bf16.msra.mxu1 %v5595_v49  ;;  %v5796_v18 = vcombine.high %v3286_v50, %v3290_v34  ;;  %v3150_v49 = vld [vmem:[#allocation14 + $0x390] sm:$0xff]  ;;  %v5795_v28 = vcombine.low %v3286_v50, %v3290_v34 }
 0x575   : > { %4832 = vmatpush1.bf16.msra.mxu0 %v5723_v52  ;;  %4790 = vmatprep.subr.bf16.mxu1 %v5588_v56  ;;  %v3154_v52 = vld [vmem:[#allocation14 + $0x3b0] sm:$0xff] }
 0x576   : > { %4833 = vmatprep.subr.bf16.mxu0 %v5716_v55  ;;  %v3278_v56 = vld [vmem:[#allocation14 + $0x790] sm:$0xff]  ;;  %v5660_v53 = vcombine.high %v3150_v49, %v3154_v52  ;;  %v5659_v63 = vcombine.low %v3150_v49, %v3154_v52 }
 0x577   : > { %v3282_v55 = vld [vmem:[#allocation14 + $0x7b0] sm:$0xff] }
 0x578   : > { %4791 = vmatpush1.bf16.msra.mxu1 %v5587_v48  ;;  %v5788_v54 = vcombine.high %v3278_v56, %v3282_v55  ;;  %v3142_v48 = vld [vmem:[#allocation14 + $0x350] sm:$0xff]  ;;  %v5787_v35 = vcombine.low %v3278_v56, %v3282_v55 }
 0x579   : > { %4834 = vmatpush1.bf16.msra.mxu0 %v5715_v57  ;;  %4792 = vmatprep.subr.bf16.mxu1 %v5580_v37  ;;  %v3146_v57 = vld [vmem:[#allocation14 + $0x370] sm:$0xff] }
 0x57a   : > { %4835 = vmatprep.subr.bf16.mxu0 %v5708_v11  ;;  %v3270_v37 = vld [vmem:[#allocation14 + $0x750] sm:$0xff]  ;;  %v5652_v58 = vcombine.high %v3142_v48, %v3146_v57  ;;  %v5651_v27 = vcombine.low %v3142_v48, %v3146_v57 }
 0x57b   : > { %v3274_v11 = vld [vmem:[#allocation14 + $0x770] sm:$0xff] }
 0x57c   : > { %4793 = vmatpush1.bf16.msra.mxu1 %v5579_v62  ;;  %v5780_v1 = vcombine.high %v3270_v37, %v3274_v11  ;;  %v3134_v62 = vld [vmem:[#allocation14 + $0x310] sm:$0xff]  ;;  %v5779_v3 = vcombine.low %v3270_v37, %v3274_v11 }
 0x57d   : > { %4836 = vmatpush1.bf16.msra.mxu0 %v5707_v51  ;;  %4794 = vmatprep.subr.bf16.mxu1 %v5572_v6  ;;  %v3138_v51 = vld [vmem:[#allocation14 + $0x330] sm:$0xff] }
 0x57e   : > { %4837 = vmatprep.subr.bf16.mxu0 %v5700_v21  ;;  %v3262_v6 = vld [vmem:[#allocation14 + $0x710] sm:$0xff]  ;;  %v5644_v39 = vcombine.high %v3134_v62, %v3138_v51  ;;  %v5643_v31 = vcombine.low %v3134_v62, %v3138_v51  ;;  %v3219_v62 = vld [vmem:[#allocation14 + $0x5b8] sm:$0xff] }
 0x57f   : > { %v3266_v21 = vld [vmem:[#allocation14 + $0x730] sm:$0xff] }
 0x580   : > { %4795 = vmatpush1.bf16.msra.mxu1 %v5571_v59  ;;  %v5772_v14 = vcombine.high %v3262_v6, %v3266_v21  ;;  %v3126_v59 = vld [vmem:[#allocation14 + $0x2d0] sm:$0xff]  ;;  %v5771_v26 = vcombine.low %v3262_v6, %v3266_v21  ;;  %v3079_v21 = vld [vmem:[#allocation14 + $0x158] sm:$0xff] }
 0x581   : > { %4838 = vmatpush1.bf16.msra.mxu0 %v5699_v10  ;;  %4796 = vmatprep.subr.bf16.mxu1 %v5564_v22  ;;  %v3130_v10 = vld [vmem:[#allocation14 + $0x2f0] sm:$0xff] }
 0x582   : > { %4839 = vmatprep.subr.bf16.mxu0 %v5692_v25  ;;  %v3254_v22 = vld [vmem:[#allocation14 + $0x6d0] sm:$0xff]  ;;  %v5636_v29 = vcombine.high %v3126_v59, %v3130_v10  ;;  %v5635_v13 = vcombine.low %v3126_v59, %v3130_v10 }
 0x583   : > { %v3258_v25 = vld [vmem:[#allocation14 + $0x6f0] sm:$0xff] }
 0x584   : > { %4797 = vmatpush1.bf16.msra.mxu1 %v5563_v38  ;;  %v5764_v32 = vcombine.high %v3254_v22, %v3258_v25  ;;  %v3118_v38 = vld [vmem:[#allocation14 + $0x290] sm:$0xff]  ;;  %v5763_v45 = vcombine.low %v3254_v22, %v3258_v25 }
 0x585   : > { %4840 = vmatpush1.bf16.msra.mxu0 %v5691_v33  ;;  %4798 = vmatprep.subr.bf16.mxu1 %v5556_v60  ;;  %v3122_v33 = vld [vmem:[#allocation14 + $0x2b0] sm:$0xff] }
 0x586   : > { %4841 = vmatprep.subr.bf16.mxu0 %v5684_v12  ;;  %v3246_v60 = vld [vmem:[#allocation14 + $0x690] sm:$0xff]  ;;  %v5628_v42 = vcombine.high %v3118_v38, %v3122_v33  ;;  %v5627_v47 = vcombine.low %v3118_v38, %v3122_v33 }
 0x587   : > { %v3250_v12 = vld [vmem:[#allocation14 + $0x6b0] sm:$0xff] }
 0x588   : > { %4799 = vmatpush1.bf16.msra.mxu1 %v5555_v20  ;;  %v5756_v36 = vcombine.high %v3246_v60, %v3250_v12  ;;  %v3110_v20 = vld [vmem:[#allocation14 + $0x250] sm:$0xff]  ;;  %v5755_v24 = vcombine.low %v3246_v60, %v3250_v12  ;;  %v3063_v12 = vld [vmem:[#allocation14 + $0xd8] sm:$0xff] }
 0x589   : > { %4842 = vmatpush1.bf16.msra.mxu0 %v5683_v44  ;;  %4800 = vmatprep.subr.bf16.mxu1 %v5548_v40  ;;  %v3114_v44 = vld [vmem:[#allocation14 + $0x270] sm:$0xff] }
 0x58a   : > { %4843 = vmatprep.subr.bf16.mxu0 %v5676_v46  ;;  %v3238_v40 = vld [vmem:[#allocation14 + $0x650] sm:$0xff]  ;;  %v5620_v50 = vcombine.high %v3110_v20, %v3114_v44  ;;  %v5619_v49 = vcombine.low %v3110_v20, %v3114_v44 }
 0x58b   : > { %v3242_v46 = vld [vmem:[#allocation14 + $0x670] sm:$0xff] }
 0x58c   : > { %4801 = vmatpush1.bf16.msra.mxu1 %v5547_v61  ;;  %v5748_v34 = vcombine.high %v3238_v40, %v3242_v46  ;;  %v3102_v61 = vld [vmem:[#allocation14 + $0x210] sm:$0xff]  ;;  %v5747_v52 = vcombine.low %v3238_v40, %v3242_v46  ;;  %v3055_v40 = vld [vmem:[#allocation14 + $0x98] sm:$0xff] }
 0x58d   : > { %4844 = vmatpush1.bf16.msra.mxu0 %v5675_v2  ;;  %4802 = vmatprep.subr.bf16.mxu1 %v5668_v0  ;;  %v3106_v2 = vld [vmem:[#allocation14 + $0x230] sm:$0xff]  ;;  %v3059_v46 = vld [vmem:[#allocation14 + $0xb8] sm:$0xff] }
 0x58e   : > { %4845 = vmatprep.subr.bf16.mxu0 %v5796_v18  ;;  %v3230_v0 = vld [vmem:[#allocation14 + $0x610] sm:$0xff]  ;;  %v5612_v56 = vcombine.high %v3102_v61, %v3106_v2  ;;  %v5611_v48 = vcombine.low %v3102_v61, %v3106_v2  ;;  %v5566_v61 = vcombine.high %v3055_v40, %v3059_v46 }
 0x58f   : > { %v3234_v18 = vld [vmem:[#allocation14 + $0x630] sm:$0xff] }
 0x590   : > { %4803 = vmatpush2.bf16.msra.mxu1 %v5667_v41  ;;  %v5740_v55 = vcombine.high %v3230_v0, %v3234_v18  ;;  %v3095_v41 = vld [vmem:[#allocation14 + $0x1d8] sm:$0xff]  ;;  %v5739_v57 = vcombine.low %v3230_v0, %v3234_v18 }
 0x591   : > { %4846 = vmatpush2.bf16.msra.mxu0 %v5795_v28  ;;  %4804 = vmatprep.subr.bf16.mxu1 %v5660_v53  ;;  %v3099_v28 = vld [vmem:[#allocation14 + $0x1f8] sm:$0xff] }
 0x592   : > { %4847 = vmatprep.subr.bf16.mxu0 %v5788_v54  ;;  %v3223_v53 = vld [vmem:[#allocation14 + $0x5d8] sm:$0xff]  ;;  %v5606_v37 = vcombine.high %v3095_v41, %v3099_v28 }
 0x593   : > { %v3227_v54 = vld [vmem:[#allocation14 + $0x5f8] sm:$0xff] }
 0x594   : > { %4805 = vmatpush2.bf16.msra.mxu1 %v5659_v63  ;;  %v5734_v11 = vcombine.high %v3223_v53, %v3227_v54  ;;  %v3087_v63 = vld [vmem:[#allocation14 + $0x198] sm:$0xff]  ;;  %v5733_v51 = vcombine.low %v3223_v53, %v3227_v54 }
 0x595   : > { %4848 = vmatpush2.bf16.msra.mxu0 %v5787_v35  ;;  %4806 = vmatprep.subr.bf16.mxu1 %v5652_v58  ;;  %v3091_v35 = vld [vmem:[#allocation14 + $0x1b8] sm:$0xff]  ;;  %v5605_v58 = vcombine.low %v3095_v41, %v3099_v28 }
 0x596   : > { %4849 = vmatprep.subr.bf16.mxu0 %v5780_v1  ;;  %v3215_v1 = vld [vmem:[#allocation14 + $0x598] sm:$0xff]  ;;  %v5598_v6 = vcombine.high %v3087_v63, %v3091_v35  ;;  %v5597_v59 = vcombine.low %v3087_v63, %v3091_v35 }
 0x597   : > { %v5725_v10 = vcombine.low %v3215_v1, %v3219_v62  ;;  %v3047_v0 = vld [vmem:[#allocation14 + $0x58] sm:$0xff] }
 0x598   : > { %4807 = vmatpush2.bf16.msra.mxu1 %v5651_v27  ;;  %v3083_v27 = vld [vmem:[#allocation14 + $0x178] sm:$0xff] }
 0x599   : > { %4850 = vmatpush2.bf16.msra.mxu0 %v5779_v3  ;;  %4808 = vmatprep.subr.bf16.mxu1 %v5644_v39  ;;  %v5726_v3 = vcombine.high %v3215_v1, %v3219_v62  ;;  %v3207_v39 = vld [vmem:[#allocation14 + $0x558] sm:$0xff]  ;;  %v5590_v22 = vcombine.high %v3079_v21, %v3083_v27  ;;  %v5589_v38 = vcombine.low %v3079_v21, %v3083_v27 }
 0x59a   : > { %4851 = vmatprep.subr.bf16.mxu0 %v5772_v14  ;;  %v3211_v14 = vld [vmem:[#allocation14 + $0x578] sm:$0xff] }
 0x59b   : > { %v5718_v25 = vcombine.high %v3207_v39, %v3211_v14  ;;  %v5717_v33 = vcombine.low %v3207_v39, %v3211_v14  ;;  %v3051_v18 = vld [vmem:[#allocation14 + $0x78] sm:$0xff] }
 0x59c   : > { %4809 = vmatpush2.bf16.msra.mxu1 %v5643_v31  ;;  %v3071_v31 = vld [vmem:[#allocation14 + $0x118] sm:$0xff]  ;;  %v5558_v41 = vcombine.high %v3047_v0, %v3051_v18 }
 0x59d   : > { %4852 = vmatpush2.bf16.msra.mxu0 %v5771_v26  ;;  %4810 = vmatprep.subr.bf16.mxu1 %v5636_v29  ;;  %v3075_v26 = vld [vmem:[#allocation14 + $0x138] sm:$0xff] }
 0x59e   : > { %4853 = vmatprep.subr.bf16.mxu0 %v5764_v32  ;;  %v3199_v29 = vld [vmem:[#allocation14 + $0x518] sm:$0xff]  ;;  %v5582_v60 = vcombine.high %v3071_v31, %v3075_v26 }
 0x59f   : > { %v3203_v32 = vld [vmem:[#allocation14 + $0x538] sm:$0xff] }
 0x5a0   : > { %4811 = vmatpush2.bf16.msra.mxu1 %v5635_v13  ;;  %v3067_v13 = vld [vmem:[#allocation14 + $0xf8] sm:$0xff] }
 0x5a1   : > { %4854 = vmatpush2.bf16.msra.mxu0 %v5763_v45  ;;  %4812 = vmatprep.subr.bf16.mxu1 %v5628_v42  ;;  %v3191_v45 = vld [vmem:[#allocation14 + $0x4d8] sm:$0xff]  ;;  %v5574_v20 = vcombine.high %v3063_v12, %v3067_v13 }
 0x5a2   : > { %4855 = vmatprep.subr.bf16.mxu0 %v5756_v36  ;;  %v3195_v42 = vld [vmem:[#allocation14 + $0x4f8] sm:$0xff]  ;;  %v5709_v36 = vcombine.low %v3199_v29, %v3203_v32 }
 0x5a3   : > { %v5702_v44 = vcombine.high %v3191_v45, %v3195_v42  ;;  %v3039_v53 = vld [vmem:[#allocation14 + $0x18] sm:$0xff] }
 0x5a4   : > { %4813 = vmatpush2.bf16.msra.mxu1 %v5627_v47  ;;  %v3183_v47 = vld [vmem:[#allocation14 + $0x498] sm:$0xff] }
 0x5a5   : > { %4856 = vmatpush2.bf16.msra.mxu0 %v5755_v24  ;;  %4814 = vmatprep.subr.bf16.mxu1 %v5620_v50  ;;  %v3187_v24 = vld [vmem:[#allocation14 + $0x4b8] sm:$0xff]  ;;  %v5573_v50 = vcombine.low %v3063_v12, %v3067_v13 }
 0x5a6   : > { %4857 = vmatprep.subr.bf16.mxu0 %v5748_v34  ;;  %v5701_v34 = vcombine.low %v3191_v45, %v3195_v42  ;;  %v5694_v2 = vcombine.high %v3183_v47, %v3187_v24  ;;  %v3043_v54 = vld [vmem:[#allocation14 + $0x38] sm:$0xff] }
 0x5a7   : > { %v5550_v63 = vcombine.high %v3039_v53, %v3043_v54  ;;  %v3163_v1 = vld [vmem:[#allocation14 + $0x3f8] sm:$0xff] }
 0x5a8   : > { %4815 = vmatpush2.bf16.msra.mxu1 %v5619_v49  ;;  %v3175_v49 = vld [vmem:[#allocation14 + $0x458] sm:$0xff] }
 0x5a9   : > { %4858 = vmatpush2.bf16.msra.mxu0 %v5747_v52  ;;  %4816 = vmatprep.subr.bf16.mxu1 %v5612_v56  ;;  %v3179_v52 = vld [vmem:[#allocation14 + $0x478] sm:$0xff]  ;;  %v5565_v56 = vcombine.low %v3055_v40, %v3059_v46 }
 0x5aa   : > { %4859 = vmatprep.subr.bf16.mxu0 %v5740_v55  ;;  %v5693_v55 = vcombine.low %v3183_v47, %v3187_v24  ;;  %v5686_v28 = vcombine.high %v3175_v49, %v3179_v52  ;;  %v3287_v62 = vld [vmem:[#allocation14 + $0x7d8] sm:$0xff] }
 0x5ab   : > { %v3151_v39 = vld [vmem:[#allocation14 + $0x398] sm:$0xff] }
 0x5ac   : > { %4817 = vmatpush2.bf16.msra.mxu1 %v5611_v48  ;;  %v3167_v48 = vld [vmem:[#allocation14 + $0x418] sm:$0xff] }
 0x5ad   : > { %4860 = vmatpush2.bf16.msra.mxu0 %v5739_v57  ;;  %4872 = vmatprep.subr.bf16.mxu1 %v5606_v37  ;;  %v3171_v57 = vld [vmem:[#allocation14 + $0x438] sm:$0xff]  ;;  %v5557_v37 = vcombine.low %v3047_v0, %v3051_v18 }
 0x5ae   : > { %4915 = vmatprep.subr.bf16.mxu0 %v5734_v11  ;;  %v5685_v11 = vcombine.low %v3175_v49, %v3179_v52  ;;  %v5678_v35 = vcombine.high %v3167_v48, %v3171_v57  ;;  %v5677_v21 = vcombine.low %v3167_v48, %v3171_v57  ;;  %v3155_v14 = vld [vmem:[#allocation14 + $0x3b8] sm:$0xff] }
 0x5af   : > { %4819 = vmatmul.mubr.bf16.vlgmr.msra.gmra.mxu1 %v7354_v16  ;;  %v3135_v45 = vld [vmem:[#allocation14 + $0x318] sm:$0xff] }
 0x5b0   : > { %4862 = vmatmul.mubr.bf16.vlgmr.msra.gmra.mxu0 %v7356_v30  ;;  %4873 = vmatpush1.bf16.msra.mxu1 %v5605_v58  ;;  %v3159_v58 = vld [vmem:[#allocation14 + $0x3d8] sm:$0xff] }
 0x5b1   : > { %4904 = vmatprep.mubr.bf16.mxu1 %v7350_v7  ;;  %4916 = vmatpush1.bf16.msra.mxu0 %v5733_v51  ;;  %v5710_v7 = vcombine.high %v3199_v29, %v3203_v32  ;;  %v3291_v51 = vld [vmem:[#allocation14 + $0x7f8] sm:$0xff]  ;;  %v5670_v27 = vcombine.high %v3159_v58, %v3163_v1 }
 0x5b2   : > { %4947 = vmatprep.mubr.bf16.mxu0 %v7352_v5  ;;  %4874 = vmatprep.subr.bf16.mxu1 %v5598_v6  ;;  %v5581_v5 = vcombine.low %v3071_v31, %v3075_v26  ;;  %v5549_v6 = vcombine.low %v3039_v53, %v3043_v54  ;;  %v5662_v31 = vcombine.high %v3151_v39, %v3155_v14  ;;  %v3143_v29 = vld [vmem:[#allocation14 + $0x358] sm:$0xff] }
 0x5b3   : > { %4917 = vmatprep.subr.bf16.mxu0 %v5726_v3  ;;  %v5798_v3 = vcombine.high %v3287_v62, %v3291_v51  ;;  %v3147_v32 = vld [vmem:[#allocation14 + $0x378] sm:$0xff] }
 0x5b4   : > { %4875 = vmatpush1.bf16.msra.mxu1 %v5597_v59  ;;  %v3279_v59 = vld [vmem:[#allocation14 + $0x798] sm:$0xff]  ;;  %v5654_v12 = vcombine.high %v3143_v29, %v3147_v32 }
 0x5b5   : > { %4918 = vmatpush1.bf16.msra.mxu0 %v5725_v10  ;;  %4876 = vmatprep.subr.bf16.mxu1 %v5590_v22  ;;  %v3283_v10 = vld [vmem:[#allocation14 + $0x7b8] sm:$0xff]  ;;  %v5669_v22 = vcombine.low %v3159_v58, %v3163_v1 }
 0x5b6   : > { %4919 = vmatprep.subr.bf16.mxu0 %v5718_v25  ;;  %v5797_v25 = vcombine.low %v3287_v62, %v3291_v51  ;;  %v5790_v26 = vcombine.high %v3279_v59, %v3283_v10  ;;  %v3139_v42 = vld [vmem:[#allocation14 + $0x338] sm:$0xff] }
 0x5b7   : > { %v5646_v40 = vcombine.high %v3135_v45, %v3139_v42  ;;  %v3127_v47 = vld [vmem:[#allocation14 + $0x2d8] sm:$0xff] }
 0x5b8   : > { %4877 = vmatpush1.bf16.msra.mxu1 %v5589_v38  ;;  %v3271_v38 = vld [vmem:[#allocation14 + $0x758] sm:$0xff] }
 0x5b9   : > { %4920 = vmatpush1.bf16.msra.mxu0 %v5717_v33  ;;  %4878 = vmatprep.subr.bf16.mxu1 %v5582_v60  ;;  %v3275_v33 = vld [vmem:[#allocation14 + $0x778] sm:$0xff]  ;;  %v5661_v60 = vcombine.low %v3151_v39, %v3155_v14 }
 0x5ba   : > { %4921 = vmatprep.subr.bf16.mxu0 %v5710_v7  ;;  %v5789_v7 = vcombine.low %v3279_v59, %v3283_v10  ;;  %v5782_v13 = vcombine.high %v3271_v38, %v3275_v33  ;;  %v3131_v24 = vld [vmem:[#allocation14 + $0x2f8] sm:$0xff] }
 0x5bb   : > { %v5638_v0 = vcombine.high %v3127_v47, %v3131_v24  ;;  %v3119_v49 = vld [vmem:[#allocation14 + $0x298] sm:$0xff] }
 0x5bc   : > { %4879 = vmatpush1.bf16.msra.mxu1 %v5581_v5  ;;  %v3263_v5 = vld [vmem:[#allocation14 + $0x718] sm:$0xff] }
 0x5bd   : > { %4922 = vmatpush1.bf16.msra.mxu0 %v5709_v36  ;;  %4880 = vmatprep.subr.bf16.mxu1 %v5574_v20  ;;  %v3267_v36 = vld [vmem:[#allocation14 + $0x738] sm:$0xff]  ;;  %v5653_v20 = vcombine.low %v3143_v29, %v3147_v32 }
 0x5be   : > { %4923 = vmatprep.subr.bf16.mxu0 %v5702_v44  ;;  %v5781_v44 = vcombine.low %v3271_v38, %v3275_v33  ;;  %v5774_v46 = vcombine.high %v3263_v5, %v3267_v36  ;;  %v3123_v52 = vld [vmem:[#allocation14 + $0x2b8] sm:$0xff] }
 0x5bf   : > { %v5630_v53 = vcombine.high %v3119_v49, %v3123_v52  ;;  %v3111_v48 = vld [vmem:[#allocation14 + $0x258] sm:$0xff] }
 0x5c0   : > { %4881 = vmatpush1.bf16.msra.mxu1 %v5573_v50  ;;  %v3255_v50 = vld [vmem:[#allocation14 + $0x6d8] sm:$0xff] }
 0x5c1   : > { %4924 = vmatpush1.bf16.msra.mxu0 %v5701_v34  ;;  %4882 = vmatprep.subr.bf16.mxu1 %v5566_v61  ;;  %v3259_v34 = vld [vmem:[#allocation14 + $0x6f8] sm:$0xff]  ;;  %v5645_v61 = vcombine.low %v3135_v45, %v3139_v42 }
 0x5c2   : > { %4925 = vmatprep.subr.bf16.mxu0 %v5694_v2  ;;  %v5773_v2 = vcombine.low %v3263_v5, %v3267_v36  ;;  %v5766_v18 = vcombine.high %v3255_v50, %v3259_v34  ;;  %v3115_v57 = vld [vmem:[#allocation14 + $0x278] sm:$0xff] }
 0x5c3   : > { %v5622_v58 = vcombine.high %v3111_v48, %v3115_v57  ;;  %v3103_v62 = vld [vmem:[#allocation14 + $0x218] sm:$0xff] }
 0x5c4   : > { %4883 = vmatpush1.bf16.msra.mxu1 %v5565_v56  ;;  %v3247_v56 = vld [vmem:[#allocation14 + $0x698] sm:$0xff] }
 0x5c5   : > { %4926 = vmatpush1.bf16.msra.mxu0 %v5693_v55  ;;  %4884 = vmatprep.subr.bf16.mxu1 %v5558_v41  ;;  %v3251_v55 = vld [vmem:[#allocation14 + $0x6b8] sm:$0xff]  ;;  %v5637_v41 = vcombine.low %v3127_v47, %v3131_v24 }
 0x5c6   : > { %4927 = vmatprep.subr.bf16.mxu0 %v5686_v28  ;;  %v5765_v28 = vcombine.low %v3255_v50, %v3259_v34  ;;  %v5758_v54 = vcombine.high %v3247_v56, %v3251_v55  ;;  %v3107_v51 = vld [vmem:[#allocation14 + $0x238] sm:$0xff] }
 0x5c7   : > { %v5614_v39 = vcombine.high %v3103_v62, %v3107_v51  ;;  %v5613_v59 = vcombine.low %v3103_v62, %v3107_v51 }
 0x5c8   : > { %4885 = vmatpush1.bf16.msra.mxu1 %v5557_v37  ;;  %v3239_v37 = vld [vmem:[#allocation14 + $0x658] sm:$0xff] }
 0x5c9   : > { %4928 = vmatpush1.bf16.msra.mxu0 %v5685_v11  ;;  %4886 = vmatprep.subr.bf16.mxu1 %v5550_v63  ;;  %v3243_v11 = vld [vmem:[#allocation14 + $0x678] sm:$0xff]  ;;  %v5629_v63 = vcombine.low %v3119_v49, %v3123_v52 }
 0x5ca   : > { %4929 = vmatprep.subr.bf16.mxu0 %v5678_v35  ;;  %v5757_v35 = vcombine.low %v3247_v56, %v3251_v55  ;;  %v5750_v1 = vcombine.high %v3239_v37, %v3243_v11 }
 0x5cc   : > { %4887 = vmatpush1.bf16.msra.mxu1 %v5549_v6  ;;  %v3231_v6 = vld [vmem:[#allocation14 + $0x618] sm:$0xff] }
 0x5cd   : > { %4930 = vmatpush1.bf16.msra.mxu0 %v5677_v21  ;;  %4888 = vmatprep.subr.bf16.mxu1 %v5670_v27  ;;  %v3235_v21 = vld [vmem:[#allocation14 + $0x638] sm:$0xff]  ;;  %v5621_v27 = vcombine.low %v3111_v48, %v3115_v57 }
 0x5ce   : > { %4931 = vmatprep.subr.bf16.mxu0 %v5798_v3  ;;  %v5749_v3 = vcombine.low %v3239_v37, %v3243_v11  ;;  %v5742_v14 = vcombine.high %v3231_v6, %v3235_v21  ;;  %v5741_v10 = vcombine.low %v3231_v6, %v3235_v21 }
 0x5d0   : > { %4889 = vmatpush2.bf16.msra.mxu1 %v5669_v22 }
 0x5d1   : > { %4932 = vmatpush2.bf16.msra.mxu0 %v5797_v25  ;;  %4890 = vmatprep.subr.bf16.mxu1 %v5662_v31 }
 0x5d2   : > { %4933 = vmatprep.subr.bf16.mxu0 %v5790_v26 }
 0x5d4   : > { %4891 = vmatpush2.bf16.msra.mxu1 %v5661_v60 }
 0x5d5   : > { %4934 = vmatpush2.bf16.msra.mxu0 %v5789_v7  ;;  %4892 = vmatprep.subr.bf16.mxu1 %v5654_v12 }
 0x5d6   : > { %4935 = vmatprep.subr.bf16.mxu0 %v5782_v13 }
 0x5d8   : > { %4893 = vmatpush2.bf16.msra.mxu1 %v5653_v20 }
 0x5d9   : > { %4936 = vmatpush2.bf16.msra.mxu0 %v5781_v44  ;;  %4894 = vmatprep.subr.bf16.mxu1 %v5646_v40 }
 0x5da   : > { %4937 = vmatprep.subr.bf16.mxu0 %v5774_v46 }
 0x5dc   : > { %4895 = vmatpush2.bf16.msra.mxu1 %v5645_v61 }
 0x5dd   : > { %4938 = vmatpush2.bf16.msra.mxu0 %v5773_v2  ;;  %4896 = vmatprep.subr.bf16.mxu1 %v5638_v0 }
 0x5de   : > { %4939 = vmatprep.subr.bf16.mxu0 %v5766_v18 }
 0x5e0   : > { %4897 = vmatpush2.bf16.msra.mxu1 %v5637_v41 }
 0x5e1   : > { %4940 = vmatpush2.bf16.msra.mxu0 %v5765_v28  ;;  %4898 = vmatprep.subr.bf16.mxu1 %v5630_v53 }
 0x5e2   : > { %4941 = vmatprep.subr.bf16.mxu0 %v5758_v54 }
 0x5e4   : > { %4899 = vmatpush2.bf16.msra.mxu1 %v5629_v63 }
 0x5e5   : > { %4942 = vmatpush2.bf16.msra.mxu0 %v5757_v35  ;;  %4900 = vmatprep.subr.bf16.mxu1 %v5622_v58 }
 0x5e6   : > { %4943 = vmatprep.subr.bf16.mxu0 %v5750_v1 }
 0x5e8   : > { %4901 = vmatpush2.bf16.msra.mxu1 %v5621_v27 }
 0x5e9   : > { %4944 = vmatpush2.bf16.msra.mxu0 %v5749_v3  ;;  %4902 = vmatprep.subr.bf16.mxu1 %v5614_v39 }
 0x5ea   : > { %4945 = vmatprep.subr.bf16.mxu0 %v5742_v14 }
 0x5ec   : > { %4903 = vmatpush2.bf16.msra.mxu1 %v5613_v59 }
 0x5ed   : > { %4946 = vmatpush2.bf16.msra.mxu0 %v5741_v10 }
 0x5ef   : > { %4905 = vmatmul.mubr.bf16.vlgmr.msra.gmra.mxu1 %v7354_v16  ;;  %v4648_v22 = vpop.f32.mrf.mxu1  ;;  %v4691_v31 = vpop.f32.mrf.mxu0 }
 0x5f0   : > { %4948 = vmatmul.mubr.bf16.vlgmr.msra.gmra.mxu0 %v7356_v30  ;;  %v3292_v30 = vld [vmem:[%s7443_s14] sm:$0xff] }
 0x5f1   : > { %v4650_v25 = vpop.f32.mrf.mxu1  ;;  %v4693_v29 = vpop.f32.mrf.mxu0  ;;  %v3309_v40 = vrot.slane %v3292_v30, %v2612_v43  ;;  %v3301_v47 = vrot.slane %v3292_v30, %v7058_v23  ;;  %v3305_v24 = vrot.slane %v3292_v30, %v7310_v17  ;;  %v3297_v61 = vrot.slane %v3292_v30, %v7049_v19 }
 0x5f2   : > { %v3317_v52 = vrot.slane %v3292_v30, %v2114_v9  ;;  %v3313_v23 = vrot.slane %v3292_v30, %v2084_v8 }
 0x5f3   : > { %v4652_v26 = vpop.f32.mrf.mxu1  ;;  %v4695_v38 = vpop.f32.mrf.mxu0  ;;  %v4651_v56 = vadd.f32 %v4650_v25, %v3301_v47  ;;  %v4649_v53 = vadd.f32 %v4648_v22, %v3297_v61 }
 0x5f4   : > { %v4653_v55 = vadd.f32 %v4652_v26, %v3297_v61 }
 0x5f5   : > { %v4654_v32 = vpop.f32.mrf.mxu1  ;;  %v4697_v60 = vpop.f32.mrf.mxu0  ;;  %v4694_v11 = vadd.f32 %v4693_v29, %v4651_v56  ;;  %v4692_v51 = vadd.f32 %v4691_v31, %v4649_v53 }
 0x5f6   : > { %v4655_v2 = vadd.f32 %v4654_v32, %v3301_v47  ;;  %v4696_v63 = vadd.f32 %v4695_v38, %v4653_v55 }
 0x5f7   : > { %v4959_v39 = vmax.f32 %v4694_v11, 0.0  ;;  %v4958_v26 = vmax.f32 %v4692_v51, 0.0 }
 0x5f8   : > { %v4698_v54 = vadd.f32 %v4697_v60, %v4655_v2  ;;  %v4966_v14 = vmax.f32 %v4696_v63, 0.0  ;;  %v3324_v60 = vsub.s32 7, %v7040_v15 }
 0x5fa   : > { %v4967_v6 = vmax.f32 %v4698_v54, 0.0 }
 0x5fc   : > { %v4981_v29 = vmax.f32 %v4959_v39, %v4967_v6 }
 0x62f   : > { %v4734_v33 = vpop.f32.mrf.mxu1  ;;  %v4777_v12 = vpop.f32.mrf.mxu0 }
 0x630   : > { %v4735_v41 = vadd.f32 %v4734_v33, %v3305_v24 }
 0x631   : > { %v4736_v7 = vpop.f32.mrf.mxu1  ;;  %v4779_v45 = vpop.f32.mrf.mxu0 }
 0x632   : > { %v4737_v0 = vadd.f32 %v4736_v7, %v3309_v40  ;;  %v4778_v35 = vadd.f32 %v4777_v12, %v4735_v41  ;;  %v4974_v7 = vmax.f32 %v4958_v26, %v4966_v14 }
 0x633   : > { %v4738_v13 = vpop.f32.mrf.mxu1  ;;  %v4781_v5 = vpop.f32.mrf.mxu0 }
 0x634   : > { %v4739_v18 = vadd.f32 %v4738_v13, %v3305_v24  ;;  %v4780_v48 = vadd.f32 %v4779_v45, %v4737_v0  ;;  %v4960_v59 = vmax.f32 %v4778_v35, 0.0  ;;  %v3321_v45 = vrot.slane %v3292_v30, %v2148_v4 }
 0x635   : > { %v4740_v42 = vpop.f32.mrf.mxu1  ;;  %v4783_v20 = vpop.f32.mrf.mxu0 }
 0x636   : > { %v4741_v50 = vadd.f32 %v4740_v42, %v3309_v40  ;;  %v4782_v19 = vadd.f32 %v4781_v5, %v4739_v18  ;;  %v4961_v21 = vmax.f32 %v4780_v48, 0.0  ;;  %v4982_v42 = vrot.slane %v4981_v29, 4 }
 0x638   : > { %v4784_v43 = vadd.f32 %v4783_v20, %v4741_v50  ;;  %v4968_v27 = vmax.f32 %v4782_v19, 0.0  ;;  %v3325_v20 = vrot.slane %v3292_v30, %v3324_v60  ;;  %v4983_v50 = vmax.f32 %v4981_v29, %v4982_v42 }
 0x63a   : > { %v4969_v58 = vmax.f32 %v4784_v43, 0.0  ;;  %v4988_v32 = vmax.f32 %v4960_v59, %v4968_v27  ;;  %v4984_v30 = vrot.slane %v4983_v50, 2 }
 0x63c   : > { %v4995_v10 = vmax.f32 %v4961_v21, %v4969_v58  ;;  %v4989_v5 = vrot.slane %v4988_v32, 4 }
 0x63e   : > { %v4996_v31 = vrot.slane %v4995_v10, 4 }
 0x66f   : > { %v4820_v36 = vpop.f32.mrf.mxu1 }
 0x670   : > { %v4863_v44 = vpop.f32.mrf.mxu0  ;;  %v4821_v1 = vadd.f32 %v4820_v36, %v3313_v23 }
 0x671   : > { %v4822_v16 = vpop.f32.mrf.mxu1 }
 0x672   : > { %v4865_v34 = vpop.f32.mrf.mxu0  ;;  %v4823_v57 = vadd.f32 %v4822_v16, %v3317_v52  ;;  %v4864_v22 = vadd.f32 %v4863_v44, %v4821_v1  ;;  %v4975_v16 = vrot.slane %v4974_v7, 4  ;;  %v4997_v44 = vmax.f32 %v4995_v10, %v4996_v31 }
 0x673   : > { %v4824_v46 = vpop.f32.mrf.mxu1  ;;  %v6590_v10 = vmov 1966171168  }
 0x674   : > { %v4867_v28 = vpop.f32.mrf.mxu0  ;;  %v4825_v37 = vadd.f32 %v4824_v46, %v3313_v23  ;;  %v4866_v3 = vadd.f32 %v4865_v34, %v4823_v57  ;;  %v4962_v12 = vmax.f32 %v4864_v22, 0.0  ;;  %v4990_v34 = vmax.f32 %v4988_v32, %v4989_v5 }
 0x675   : > { %v4826_v49 = vpop.f32.mrf.mxu1  ;;  %v5047_v22 = vunpack.c.l.s4 %v6590_v10 }
 0x676   : > { %v4827_v17 = vadd.f32 %v4826_v49, %v3317_v52  ;;  %v4869_v9 = vpop.f32.mrf.mxu0  ;;  %v4868_v8 = vadd.f32 %v4867_v28, %v4825_v37  ;;  %v4963_v38 = vmax.f32 %v4866_v3, 0.0  ;;  %v4976_v49 = vmax.f32 %v4974_v7, %v4975_v16 }
 0x677   : > { %v4998_v52 = vrot.slane %v4997_v44, 2  ;;  %v4991_v28 = vrot.slane %v4990_v34, 2 }
 0x678   : > { %v4870_v62 = vadd.f32 %v4869_v9, %v4827_v17  ;;  %v4970_v33 = vmax.f32 %v4868_v8, 0.0  ;;  %v4977_v19 = vrot.slane %v4976_v49, 2  ;;  %v4985_v9 = vmax.f32 %v4983_v50, %v4984_v30 }
 0x679   : > { %v4999_v57 = vmax.f32 %v4997_v44, %v4998_v52  ;;  %v4992_v1 = vmax.f32 %v4990_v34, %v4991_v28 }
 0x67a   : > { %v4971_v25 = vmax.f32 %v4870_v62, 0.0  ;;  %v5002_v36 = vmax.f32 %v4962_v12, %v4970_v33  ;;  %v4978_v27 = vmax.f32 %v4976_v49, %v4977_v19  ;;  %v4986_v59 = vrot.slane %v4985_v9, 1 }
 0x67b   : > { %v5000_v3 = vrot.slane %v4999_v57, 1 }
 0x67c   : > { %v5009_v13 = vmax.f32 %v4963_v38, %v4971_v25  ;;  %v5003_v2 = vrot.slane %v5002_v36, 4  ;;  %v4993_v25 = vrot.slane %v4992_v1, 1  ;;  %v4979_v38 = vrot.slane %v4978_v27, 1 }
 0x67d   : > { %v5001_v33 = vmax.f32 %v4999_v57, %v5000_v3  ;;  %v4987_v12 = vmax.f32 %v4985_v9, %v4986_v59 }
 0x67e   : > { %v5010_v46 = vrot.slane %v5009_v13, 4  ;;  %v5004_v17 = vmax.f32 %v5002_v36, %v5003_v2 }
 0x680   : > { %v5011_v4 = vmax.f32 %v5009_v13, %v5010_v46  ;;  %v5005_v62 = vrot.slane %v5004_v17, 2  ;;  %v5048_v13 = vunpack.c.0.s8 %v5047_v22 }
 0x682   : > { %v5012_v11 = vrot.slane %v5011_v4, 2  ;;  %v5006_v26 = vmax.f32 %v5004_v17, %v5005_v62 }
 0x684   : > { %v5013_v8 = vmax.f32 %v5011_v4, %v5012_v11  ;;  %v5007_v42 = vrot.slane %v5006_v26, 1 }
 0x686   : > { %v5014_v60 = vrot.slane %v5013_v8, 1  ;;  %v5008_v50 = vmax.f32 %v5006_v26, %v5007_v42 }
 0x688   : > { %v5015_v44 = vmax.f32 %v5013_v8, %v5014_v60 }
 0x68a   : > { %v5044_v2 = vcombine.low %v5008_v50, %v5015_v44 }
 0x6af   : > { %v4906_v40 = vpop.f32.mrf.mxu1 }
 0x6b0   : > { %v4907_v47 = vadd.f32 %v4906_v40, %v3321_v45  ;;  %v4949_v24 = vpop.f32.mrf.mxu0 }
 0x6b1   : > { %v4908_v61 = vpop.f32.mrf.mxu1 }
 0x6b2   : > { %v4909_v0 = vadd.f32 %v4908_v61, %v3325_v20  ;;  %v4951_v18 = vpop.f32.mrf.mxu0  ;;  %v4950_v55 = vadd.f32 %v4949_v24, %v4907_v47  ;;  %v5051_v24 = vsub.s32 %v5048_v13, %v7040_v15 }
 0x6b3   : > { %v4910_v56 = vpop.f32.mrf.mxu1 }
 0x6b4   : > { %v4911_v41 = vadd.f32 %v4910_v56, %v3321_v45  ;;  %v4953_v43 = vpop.f32.mrf.mxu0  ;;  %v4952_v53 = vadd.f32 %v4951_v18, %v4909_v0  ;;  %v4964_v63 = vmax.f32 %v4950_v55, 0.0  ;;  %v4994_v45 = vmax.f32 %v4992_v1, %v4993_v25 }
 0x6b5   : > { %v4912_v23 = vpop.f32.mrf.mxu1  ;;  %v5066_v56 = vrot.slane %v5044_v2, %v5051_v24 }
 0x6b6   : > { %v4954_v54 = vadd.f32 %v4953_v43, %v4911_v41  ;;  %v4913_v48 = vadd.f32 %v4912_v23, %v3325_v20  ;;  %v4955_v37 = vpop.f32.mrf.mxu0  ;;  %v4965_v51 = vmax.f32 %v4952_v53, 0.0  ;;  %v4980_v20 = vmax.f32 %v4978_v27, %v4979_v38 }
 0x6b7   : > { %v5043_v16 = vcombine.low %v4994_v45, %v5001_v33 }
 0x6b8   : > { %v4972_v35 = vmax.f32 %v4954_v54, 0.0  ;;  %v4956_v58 = vadd.f32 %v4955_v37, %v4913_v48  ;;  %v5042_v47 = vcombine.low %v4980_v20, %v4987_v12 }
 0x6b9   : > { %v5059_v61 = vrot.slane %v5043_v16, %v5051_v24 }
 0x6ba   : > { %v5016_v6 = vmax.f32 %v4964_v63, %v4972_v35  ;;  %v4973_v21 = vmax.f32 %v4956_v58, 0.0  ;;  %v5052_v49 = vrot.slane %v5042_v47, %v5051_v24 }
 0x6bc   : > { %v5017_v39 = vrot.slane %v5016_v6, 4  ;;  %v5023_v14 = vmax.f32 %v4965_v51, %v4973_v21  ;;  %v5074_v55 = vcombine.low %v5052_v49, %v5059_v61 }
 0x6be   : > { %v5018_v29 = vmax.f32 %v5016_v6, %v5017_v39  ;;  %v5024_v32 = vrot.slane %v5023_v14, 4  ;;  %v5082_v43 = vrot.slane %v5074_v55, %v5051_v24 }
 0x6c0   : > { %v5019_v7 = vrot.slane %v5018_v29, 2  ;;  %v5025_v31 = vmax.f32 %v5023_v14, %v5024_v32 }
 0x6c2   : > { %v5020_v5 = vmax.f32 %v5018_v29, %v5019_v7  ;;  %v5026_v36 = vrot.slane %v5025_v31, 2 }
 0x6c4   : > { %v5021_v40 = vrot.slane %v5020_v5, 1  ;;  %v5027_v46 = vmax.f32 %v5025_v31, %v5026_v36 }
 0x6c6   : > { %v5028_v34 = vrot.slane %v5027_v46, 1  ;;  %v5022_v0 = vmax.f32 %v5020_v5, %v5021_v40 }
 0x6c8   : > { %v5029_v18 = vmax.f32 %v5027_v46, %v5028_v34 }
 0x6ca   : > { %v5045_v52 = vcombine.low %v5022_v0, %v5029_v18 }
 0x6cc   : > { %v5073_v4 = vrot.slane %v5045_v52, %v5051_v24 }
 0x6ce   : > { %v5075_v41 = vcombine.low %v5066_v56, %v5073_v4 }
 0x6d0   : > { %v5089_v15 = vrot.slane %v5075_v41, %v5051_v24 }
 0x6d2   : > { %v5090_v30 = vcombine.low %v5082_v43, %v5089_v15 }
 0x6d4   : > { %5092 = vst [vmem:[%s643_s18] sm:$0xff] %v5090_v30 }
 0x6d5   : > { %6488 = shalt.err (!%p6485_p6)
}
 0x6d6   : > { %s6489_s5 = scalar_lea.hbm %s5171_s16, 128  ;;  %s6493_s17 = scalar_lea.hbm %s7444_s15, 256 }
 0x6d7   : > { %p6490_p7 = scmp.ne.s32.totalorder %s5171_s16, %s6489_s5  ;;  %p6494_p12 = scmp.lt.s32.totalorder %s5171_s16, %s7444_s15 }
 0x6d8   : > { %p6495_p4 = scmp.lt.s32.totalorder %s6493_s17, %s6489_s5 }
 0x6d9   : > { %p6491_p8 = pnand %p6490_p7, %p7477_p10 }
 0x6da   : > { %p6496_p13 = por %p6495_p4, %p6494_p12 }
 0x6db   : > { %p6492_p9 = pneg %p6491_p8 }
 0x6dd   : > { %p6497_p0 = pnand %p6496_p13, %p6492_p9 }
 0x6df   : > { %6500 = shalt.err (!%p6497_p0)
}
 0x6e0   : > { %5958 = dma.vmem_to_hbm [thread:$0]  (%p7477_p10), %s5174_s29, 128, %s5171_s16, %s5159_s24  }
 0x6e1 PF: > { %s7478_s18 = sld [smem:[#allocation26_spill]] }
 0x6e2   : > { %s7479_s30 = sld [smem:[#allocation23_spill]] }
 0x6e3   : > { %s7480_s22 = sld [smem:[#allocation28_spill]] }
 0x6e7   : > { %p6005_p11 = scmp.ge.s32.totalorder %s7478_s18, 2 }
 0x6e8   : > { %s5185_s23 = sand.u32 1, %s7479_s30  }
 0x6e9   : > { %p7481_p1 = scmp.ne.s32.totalorder %s7480_s22, 0  ;;  %s5186_s26 = scalar_lea.sflag [#allocation4], %s5185_s23 }
 0x6eb   : > { %p5986_p2 = pnand %p6005_p11, %p7481_p1 }
 0x6ed   : > { %p5987_p3 = pneg %p5986_p2 }
 0x6ef   : > { %6546 = dma.done.wait (%p5987_p3), %s5186_s26, 128  }
 0x6f0   : > { %6548 = vsyncadd (%p5987_p3), %s5186_s26, 4294967168  ;;  %s33_s23 = sadd.s32 1, %s7478_s18   ;;  %s7482_s2 = sld [smem:[#allocation24_spill]] }
 0x6f1   : > { %p30_p5 = scmp.ge.s32.totalorder %s33_s23, 4   ;;  %s7483_s20 = sld [smem:[#allocation29_spill]] }
 0x6f2   : > { %s7484_s21 = sld [smem:[#allocation25_spill]]  ;;  %s7486_s18 = smov %s6555_s19 }
 0x6f3   : > { %s7485_s22 = sld [smem:[#allocation27_spill]]  ;;  %32 = sbr.rel (!%p30_p5) target bundleno = 13 (0xd), region = 159 }
 0x6f6   : > { %s7487_s19 = smov %s7482_s2 }
 0x6f8   :  { %5191 = vsyncpa [#allocation3], 1 }
 0x6f9   :  { %5193 = vsyncpa [#allocation3 + $0x1], 1 }
 0x6fa   :  { %5194 = vsyncpa [#allocation6], 1 }
 0x6fb   :  { %5195 = vsyncpa [#allocation9], 1 }
 0x6fc   :  { %5196 = vsyncpa [#allocation12], 1 }
 0x6fd   :  { %5197 = vsyncpa [#allocation15], 1 }
 0x6fe   :  { %5198 = vsyncpa [#allocation4], 1 }
 0x6ff   :  { %5200 = vsyncpa [#allocation4 + $0x1], 1 }

</bundles_post_ra>
